<compile_context>
chip_gen: v7x
topology: tpu7x:2x2x1
jax: 0.10.0
libtpu: 0.0.40
codegen_flags: <defaults>
</compile_context>

<pallas_src>
import functools
import numpy as np

import jax
import jax.numpy as jnp
from jax import lax
from jax.experimental import pallas as pl
from jax.experimental.pallas import tpu as pltpu

# ----------------------------- configuration --------------------------------
BSZ = 2
L_X = 16
INPUT_SIZE = 8
MEM_HIDDEN = 12
MEM_LEN = 6

HIDDEN = 32
NUM_HEADS = 2
HEAD_DIM = HIDDEN // NUM_HEADS
INTERMEDIATE = 64
MAX_POS = 32

NUM_SAMPLES = 2
SAMPLE_LENGTH = 8
POS_MASK_RATIO = 0.5
NEG_REPL_RATIO = 0.5

LN_EPS = 1e-12
NEG_BIAS = -1e9
ATT_SCALE = 1.0 / float(np.sqrt(HEAD_DIM))

# derived static sizes
SAMPLE_LEN_EFF = min(SAMPLE_LENGTH, L_X)                       # 8
NUM_MASK = int(SAMPLE_LEN_EFF * POS_MASK_RATIO)                # 4
NUM_REPL = int((SAMPLE_LEN_EFF - NUM_MASK) * NEG_REPL_RATIO)   # 2
SEQ = 1 + SAMPLE_LEN_EFF                                       # 9  (CLS + fragment)
HALF = BSZ * NUM_SAMPLES                                       # sequences per half (pos / neg)
BT = 2 * HALF                                                  # total sequences
GRID_B = 2                                                     # grid: pos half / neg half
BB = BT // GRID_B                                              # sequences per grid step (== HALF)
T_TOK = BB * SEQ                                               # 36 tokens per grid step
T_MEM = BB * MEM_LEN                                           # 24 memory rows per grid step

# compile-time constant layout helpers (numpy -> folded into the jit as constants)
_seq_id = np.repeat(np.arange(BB), SEQ)
_mem_id = np.repeat(np.arange(BB), MEM_LEN)
BLOCK_SELF = np.where(_seq_id[:, None] == _seq_id[None, :], 0.0, NEG_BIAS).astype(np.float32)
BLOCK_CROSS = np.where(_seq_id[:, None] == _mem_id[None, :], 0.0, NEG_BIAS).astype(np.float32)
CLS_FLAG = np.tile(
    np.concatenate([np.ones((1, 1), np.float32), np.zeros((SEQ - 1, 1), np.float32)], axis=0),
    (BB, 1))                                                   # (T_TOK, 1), 1.0 at each CLS slot


# ------------------------------- kernels ------------------------------------
def _fused_decoder_kernel(tok_ref, cls_ref, mflag_ref, sbias_ref, xbias_ref, mem_ref,
                          w_in_ref, w_em_ref, tok_emb_ref, pe_ref, emb_ln_ref,
                          self_wqkv_ref, self_bqkv_ref, self_wo_ref, self_bo_ref, self_ln_ref,
                          cross_wq_ref, cross_bq_ref, cross_wkv_ref, cross_bkv_ref,
                          cross_wo_ref, cross_bo_ref, cross_ln_ref,
                          ffn_wi_ref, ffn_bi_ref, ffn_wo_ref, ffn_bo_ref, ffn_ln_ref,
                          out_ref):
    """One grid step = one half (positive or negative) of the batch, flattened to
    a [T_TOK, HIDDEN] slab.  Per-sequence attention is enforced with the
    precomputed block-diagonal additive biases."""
    H = w_in_ref.shape[1]

    def ln(x, ln_pair_ref):
        mu = jnp.mean(x, axis=-1, keepdims=True)
        var = jnp.mean(jnp.square(x - mu), axis=-1, keepdims=True)
        return (x - mu) * lax.rsqrt(var + LN_EPS) * ln_pair_ref[0:1, :] + ln_pair_ref[1:2, :]

    def mha(q2d, k2d, v2d, bias, wo_ref, bo_ref):
        heads = []
        for h in range(NUM_HEADS):           # 2 heads, unrolled; lane-slices of fused QKV
            sl = slice(h * HEAD_DIM, (h + 1) * HEAD_DIM)
            s = lax.dot_general(q2d[:, sl], k2d[:, sl], (((1,), (1,)), ((), ())),
                                preferred_element_type=jnp.float32) * ATT_SCALE + bias
            m = jnp.max(s, axis=-1, keepdims=True)
            p = jnp.exp(s - m)
            p = p / jnp.sum(p, axis=-1, keepdims=True)
            heads.append(jnp.dot(p, v2d[:, sl], preferred_element_type=jnp.float32))
        ctx = jnp.concatenate(heads, axis=-1)
        return jnp.dot(ctx, wo_ref[...], preferred_element_type=jnp.float32) + bo_ref[...]

    # ---- embeddings: project raw tokens, insert CLS / MASK tokens, pos+type, LN ----
    proj = jnp.dot(tok_ref[0], w_in_ref[...], preferred_element_type=jnp.float32)   # (T, H)
    x = jnp.where(cls_ref[...] > 0.5, tok_emb_ref[0:1, :], proj)
    x = jnp.where(mflag_ref[...] > 0.5, tok_emb_ref[1:2, :], x)
    x = ln(x + pe_ref[...], emb_ln_ref)

    # ---- self-attention (fused QKV projection) ----
    qkv = jnp.dot(x, self_wqkv_ref[...], preferred_element_type=jnp.float32) + self_bqkv_ref[...]
    attn = mha(qkv[:, :H], qkv[:, H:2 * H], qkv[:, 2 * H:], sbias_ref[...],
               self_wo_ref, self_bo_ref)
    x = ln(attn + x, self_ln_ref)

    # ---- cross-attention over the projected memory (fused KV projection) ----
    memp = jnp.dot(mem_ref[...], w_em_ref[...], preferred_element_type=jnp.float32)  # (T_MEM, H)
    q = jnp.dot(x, cross_wq_ref[...], preferred_element_type=jnp.float32) + cross_bq_ref[...]
    kv = jnp.dot(memp, cross_wkv_ref[...], preferred_element_type=jnp.float32) + cross_bkv_ref[...]
    attn = mha(q, kv[:, :H], kv[:, H:], xbias_ref[...], cross_wo_ref, cross_bo_ref)
    x = ln(attn + x, cross_ln_ref)

    # ---- GELU FFN ----
    inter = jnp.dot(x, ffn_wi_ref[...], preferred_element_type=jnp.float32) + ffn_bi_ref[...]
    inter = 0.5 * inter * (1.0 + lax.erf(inter * 0.7071067811865476))
    out = jnp.dot(inter, ffn_wo_ref[...], preferred_element_type=jnp.float32) + ffn_bo_ref[...]
    x = ln(out + x, ffn_ln_ref)

    out_ref[0] = x.astype(out_ref.dtype)


def _loss_kernel(hid_ref, tgt_ref, w_rec_ref, pos_ref, neg_ref, wproj_ref,
                 rec_ref, fam_ref, *, rec_denom, fam_denom):
    # ---- recollection: log_softmax(<reconstructed, target>) trace per group ----
    G, M, H = hid_ref.shape
    IN = tgt_ref.shape[2]
    rec = jnp.dot(hid_ref[...].reshape(G * M, H), w_rec_ref[...],
                  preferred_element_type=jnp.float32).reshape(G, M, IN)
    prod = lax.dot_general(rec, tgt_ref[...], (((2,), (2,)), ((0,), (0,))),
                           preferred_element_type=jnp.float32)        # (G, M, M) == torch.inner
    mx = jnp.max(prod, axis=-1, keepdims=True)
    lse = mx + jnp.log(jnp.sum(jnp.exp(prod - mx), axis=-1, keepdims=True))
    logsm = prod - lse
    r = lax.broadcasted_iota(jnp.int32, prod.shape, 1)
    c = lax.broadcasted_iota(jnp.int32, prod.shape, 2)
    trace_sum = jnp.sum(jnp.where(r == c, logsm, 0.0))
    rec_ref[...] = jnp.full((1, 1), -trace_sum / rec_denom, dtype=rec_ref.dtype)

    # ---- familiarity: stable log-sigmoid of the CLS projections ----
    w = wproj_ref[...]                                                  # (1, H)
    pos_logit = jnp.sum(pos_ref[...] * w, axis=-1, keepdims=True)
    neg_logit = jnp.sum(neg_ref[...] * w, axis=-1, keepdims=True)

    def log_sigmoid(z):   # log(sigmoid(z)) without underflow
        return jnp.minimum(z, 0.0) - jnp.log(1.0 + jnp.exp(-jnp.abs(z)))

    fam_sum = jnp.sum(log_sigmoid(pos_logit) + log_sigmoid(-neg_logit))
    fam_ref[...] = jnp.full((1, 1), -fam_sum / fam_denom, dtype=fam_ref.dtype)


# ------------------------------ device forward -------------------------------
@jax.jit
def _device_forward(params, memory, mem_mask, original_input,
                    pos_flat_idx, neg_flat_idx, mask_flag, key_pad, midx, tgt_flat_idx):
    flat_in = original_input.reshape(BSZ * L_X, INPUT_SIZE)

    # device-side sample construction from host-precomputed indices (no host sync)
    pos_raw = jnp.take(flat_in, pos_flat_idx, axis=0).reshape(HALF, SAMPLE_LEN_EFF, INPUT_SIZE)
    neg_raw = jnp.take(flat_in, neg_flat_idx, axis=0).reshape(HALF, SAMPLE_LEN_EFF, INPUT_SIZE)
    pos_tok = jnp.pad(pos_raw, ((0, 0), (1, 0), (0, 0))).reshape(1, T_TOK, INPUT_SIZE)
    neg_tok = jnp.pad(neg_raw, ((0, 0), (1, 0), (0, 0))).reshape(1, T_TOK, INPUT_SIZE)
    tok_g = jnp.concatenate([pos_tok, neg_tok], axis=0)                       # (2, T_TOK, IN)

    mflag_col = mask_flag.reshape(T_TOK, 1)                                   # same for both halves
    self_bias = jnp.asarray(BLOCK_SELF) + (1.0 - key_pad.reshape(1, T_TOK)) * NEG_BIAS
    mem_pad = jnp.tile(mem_mask, (NUM_SAMPLES, 1)).reshape(1, T_MEM)          # torch .repeat semantics
    cross_bias = jnp.asarray(BLOCK_CROSS) + (1.0 - mem_pad) * NEG_BIAS
    mem_flat = jnp.tile(memory, (NUM_SAMPLES, 1, 1)).reshape(T_MEM, MEM_HIDDEN)
    pe_full = jnp.tile(params["pos_emb"][2:2 + SEQ] + params["tok_type_emb"][0], (BB, 1))

    shared_args = (jnp.asarray(CLS_FLAG), mflag_col, self_bias, cross_bias, mem_flat)
    weight_args = (params["w_in"], params["w_em"], params["tok_emb"], pe_full, params["emb_ln"],
                   params["self_wqkv"], params["self_bqkv"], params["self_wo"],
                   params["self_bo"], params["self_ln"],
                   params["cross_wq"], params["cross_bq"], params["cross_wkv"],
                   params["cross_bkv"], params["cross_wo"], params["cross_bo"], params["cross_ln"],
                   params["ffn_wi"], params["ffn_bi"], params["ffn_wo"],
                   params["ffn_bo"], params["ffn_ln"])

    def full2d(a):
        return pl.BlockSpec(a.shape, lambda i: (0, 0))

    out_g = pl.pallas_call(
        _fused_decoder_kernel,
        out_shape=jax.ShapeDtypeStruct((GRID_B, T_TOK, HIDDEN), jnp.float32),
        grid=(GRID_B,),
        in_specs=([pl.BlockSpec((1, T_TOK, INPUT_SIZE), lambda i: (i, 0, 0))]
                  + [full2d(a) for a in shared_args]
                  + [full2d(a) for a in weight_args]),
        out_specs=pl.BlockSpec((1, T_TOK, HIDDEN), lambda i: (i, 0, 0)),
        compiler_params=pltpu.CompilerParams(dimension_semantics=("parallel",)),
    )(tok_g, *shared_args, *weight_args)

    last_hidden = out_g.reshape(BT, SEQ, HIDDEN)
    hp = last_hidden[:HALF].reshape(BSZ, NUM_SAMPLES, SEQ, HIDDEN)
    hn = last_hidden[HALF:].reshape(BSZ, NUM_SAMPLES, SEQ, HIDDEN)

    # batched gathers (precomputed indices) feeding the loss kernel
    hid_masked = jnp.take_along_axis(hp, midx[..., None], axis=2).reshape(HALF, NUM_MASK, HIDDEN)
    targets = jnp.take(flat_in, tgt_flat_idx, axis=0).reshape(HALF, NUM_MASK, INPUT_SIZE)
    pos_cls = hp[:, :, 0, :].reshape(HALF, HIDDEN)
    neg_cls = hn[:, :, 0, :].reshape(HALF, HIDDEN)

    rec, fam = pl.pallas_call(
        functools.partial(_loss_kernel,
                          rec_denom=float(NUM_MASK * NUM_SAMPLES * BSZ),
                          fam_denom=float(NUM_SAMPLES * BSZ)),
        out_shape=(jax.ShapeDtypeStruct((1, 1), jnp.float32),
                   jax.ShapeDtypeStruct((1, 1), jnp.float32)),
        grid=(1,),
        in_specs=[pl.BlockSpec((HALF, NUM_MASK, HIDDEN), lambda i: (0, 0, 0)),
                  pl.BlockSpec((HALF, NUM_MASK, INPUT_SIZE), lambda i: (0, 0, 0)),
                  pl.BlockSpec((HIDDEN, INPUT_SIZE), lambda i: (0, 0)),
                  pl.BlockSpec((HALF, HIDDEN), lambda i: (0, 0)),
                  pl.BlockSpec((HALF, HIDDEN), lambda i: (0, 0)),
                  pl.BlockSpec((1, HIDDEN), lambda i: (0, 0))],
        out_specs=(pl.BlockSpec((1, 1), lambda i: (0, 0)),
                   pl.BlockSpec((1, 1), lambda i: (0, 0))),
    )(hid_masked, targets, params["w_in"].T, pos_cls, neg_cls,
      params["w_proj"].reshape(1, HIDDEN))
    return rec[0, 0], fam[0, 0]


# ------------------------------ host wrapper ----------------------------------
def rehearsal_forward(params, memory, mem_mask, original_input, input_mask, batch_sample_ids):
    """Host side only replicates the reference np.random.choice bookkeeping and ships
    small int32 index arrays to the device; all tensor math runs in the two kernels.
    `input_mask` is expected as host data (numpy), like `batch_sample_ids`."""
    del batch_sample_ids  # teacher_sampling_weights is None -> ids unused
    # TODO(synk): teacher-weighted sampling / cumsum path untranslated (weights file unsupported)
    assert BSZ > 1
    L = SAMPLE_LEN_EFF
    num_frag = L_X - L + 1
    input_mask_np = np.asarray(input_mask).astype(bool)

    rng = np.random.RandomState(0)
    start = np.stack([rng.choice(max(1, num_frag), NUM_SAMPLES, replace=False)
                      for _ in range(BSZ)]).astype(np.int64)

    all_idx = np.arange(1, 1 + L)
    masked_map = np.zeros((BSZ, NUM_SAMPLES, SEQ), bool)
    padding = np.ones((BSZ, NUM_SAMPLES, SEQ), bool)
    pos_flat = np.zeros((BSZ, NUM_SAMPLES, L), np.int32)
    neg_flat = np.zeros((BSZ, NUM_SAMPLES, L), np.int32)
    midx = np.zeros((BSZ, NUM_SAMPLES, NUM_MASK), np.int32)
    tgt_flat = np.zeros((BSZ, NUM_SAMPLES, NUM_MASK), np.int32)

    for i in range(BSZ):
        for s in range(NUM_SAMPLES):
            st = int(start[i, s])
            padding[i, s, 1:] = input_mask_np[i, st:st + L]
            mask_idx = rng.choice(all_idx, NUM_MASK, replace=False)
            masked_map[i, s, mask_idx] = padding[i, s, mask_idx]
            unmasked = [int(j) for j in all_idx
                        if j not in set(mask_idx.tolist()) and padding[i, s, j]]
            repl_idx = np.asarray(rng.choice(unmasked, NUM_REPL, replace=False))

            src_pos = st + np.arange(L)                       # original index for positions 1..L
            pos_flat[i, s] = i * L_X + src_pos
            neg_batch = np.full(L, i, np.int64)
            neg_batch[repl_idx - 1] = (i + 1) % BSZ           # negatives take next batch element
            neg_flat[i, s] = neg_batch * L_X + src_pos

            sel = np.nonzero(masked_map[i, s])[0]
            # TODO(synk): assumes >= NUM_MASK maskable tokens per fragment (true for all-ones
            # input_mask); ragged masks would need the reference's per-sample scalar loop.
            midx[i, s] = sel[:NUM_MASK]
            tgt_flat[i, s] = i * L_X + (sel[:NUM_MASK] + st - 1)

    mask_flag = jnp.asarray(masked_map.reshape(HALF, SEQ), jnp.float32)
    key_pad = jnp.asarray(padding.reshape(HALF, SEQ), jnp.float32)

    return _device_forward(params, memory, jnp.asarray(mem_mask, jnp.float32), original_input,
                           jnp.asarray(pos_flat.reshape(-1), jnp.int32),
                           jnp.asarray(neg_flat.reshape(-1), jnp.int32),
                           mask_flag, key_pad,
                           jnp.asarray(midx, jnp.int32),
                           jnp.asarray(tgt_flat.reshape(-1), jnp.int32))


# ------------------------------ parameters -----------------------------------
def init_params(key):
    ks = iter(jax.random.split(key, 16))

    def w(shape):
        return jax.random.normal(next(ks), shape, jnp.float32) * 0.02

    def ln_pair():
        return jnp.stack([jnp.ones((HIDDEN,), jnp.float32), jnp.zeros((HIDDEN,), jnp.float32)])

    p = {
        # RehearsalTrainingModule params
        "w_in": w((INPUT_SIZE, HIDDEN)),                 # input_dimension_adjustment (no bias)
        "w_em": w((MEM_HIDDEN, HIDDEN)),                 # em_dimension_adjustment (no bias)
        "tok_emb": jax.random.uniform(next(ks), (2, HIDDEN), jnp.float32, -0.3, 0.3),  # [CLS; MASK]
        "w_proj": w((HIDDEN, 1)),                        # pos_neg_projection Linear(h, 1, bias=False)
        # Roberta embeddings
        "pos_emb": w((MAX_POS, HIDDEN)),
        "tok_type_emb": w((1, HIDDEN)),
        "emb_ln": ln_pair(),
        # self-attention (QKV fused)
        "self_wqkv": w((HIDDEN, 3 * HIDDEN)),
        "self_bqkv": jnp.zeros((1, 3 * HIDDEN), jnp.float32),
        "self_wo": w((HIDDEN, HIDDEN)),
        "self_bo": jnp.zeros((1, HIDDEN), jnp.float32),
        "self_ln": ln_pair(),
        # cross-attention (KV fused)
        "cross_wq": w((HIDDEN, HIDDEN)),
        "cross_bq": jnp.zeros((1, HIDDEN), jnp.float32),
        "cross_wkv": w((HIDDEN, 2 * HIDDEN)),
        "cross_bkv": jnp.zeros((1, 2 * HIDDEN), jnp.float32),
        "cross_wo": w((HIDDEN, HIDDEN)),
        "cross_bo": jnp.zeros((1, HIDDEN), jnp.float32),
        "cross_ln": ln_pair(),
        # FFN
        "ffn_wi": w((HIDDEN, INTERMEDIATE)),
        "ffn_bi": jnp.zeros((1, INTERMEDIATE), jnp.float32),
        "ffn_wo": w((INTERMEDIATE, HIDDEN)),
        "ffn_bo": jnp.zeros((1, HIDDEN), jnp.float32),
        "ffn_ln": ln_pair(),
    }
    return p


# ---------------------------------- main --------------------------------------
if __name__ == "__main__":
    key = jax.random.PRNGKey(0)
    k_p, k_mem, k_in = jax.random.split(key, 3)

    params = init_params(k_p)
    memory = jax.random.normal(k_mem, (BSZ, MEM_LEN, MEM_HIDDEN), jnp.float32)
    mem_mask = jnp.ones((BSZ, MEM_LEN), jnp.float32)
    original_input = jax.random.normal(k_in, (BSZ, L_X, INPUT_SIZE), jnp.float32)
    input_mask = np.ones((BSZ, L_X), np.int32)          # host-side metadata, like sample ids
    batch_sample_ids = list(range(BSZ))

    rec_loss, fam_loss = rehearsal_forward(params, memory, mem_mask,
                                           original_input, input_mask, batch_sample_ids)
    rec_loss = jax.block_until_ready(rec_loss)
    fam_loss = jax.block_until_ready(fam_loss)
    assert bool(jnp.isfinite(rec_loss)) and bool(jnp.isfinite(fam_loss))
    print("KERNEL_OK")
</pallas_src>

<mosaic_0001>
module attributes {stable_mosaic.version = 11 : i64} {
  func.func @_fused_decoder_kernel(%arg0: i32, %arg1: memref<1x36x8xf32, #tpu.memory_space<vmem>>, %arg2: memref<36x1xf32, #tpu.memory_space<vmem>>, %arg3: memref<36x1xf32, #tpu.memory_space<vmem>>, %arg4: memref<36x36xf32, #tpu.memory_space<vmem>>, %arg5: memref<36x24xf32, #tpu.memory_space<vmem>>, %arg6: memref<24x12xf32, #tpu.memory_space<vmem>>, %arg7: memref<8x32xf32, #tpu.memory_space<vmem>>, %arg8: memref<12x32xf32, #tpu.memory_space<vmem>>, %arg9: memref<2x32xf32, #tpu.memory_space<vmem>>, %arg10: memref<36x32xf32, #tpu.memory_space<vmem>>, %arg11: memref<2x32xf32, #tpu.memory_space<vmem>>, %arg12: memref<32x96xf32, #tpu.memory_space<vmem>>, %arg13: memref<1x96xf32, #tpu.memory_space<vmem>>, %arg14: memref<32x32xf32, #tpu.memory_space<vmem>>, %arg15: memref<1x32xf32, #tpu.memory_space<vmem>>, %arg16: memref<2x32xf32, #tpu.memory_space<vmem>>, %arg17: memref<32x32xf32, #tpu.memory_space<vmem>>, %arg18: memref<1x32xf32, #tpu.memory_space<vmem>>, %arg19: memref<32x64xf32, #tpu.memory_space<vmem>>, %arg20: memref<1x64xf32, #tpu.memory_space<vmem>>, %arg21: memref<32x32xf32, #tpu.memory_space<vmem>>, %arg22: memref<1x32xf32, #tpu.memory_space<vmem>>, %arg23: memref<2x32xf32, #tpu.memory_space<vmem>>, %arg24: memref<32x64xf32, #tpu.memory_space<vmem>>, %arg25: memref<1x64xf32, #tpu.memory_space<vmem>>, %arg26: memref<64x32xf32, #tpu.memory_space<vmem>>, %arg27: memref<1x32xf32, #tpu.memory_space<vmem>>, %arg28: memref<2x32xf32, #tpu.memory_space<vmem>>, %arg29: memref<1x36x32xf32, #tpu.memory_space<vmem>>) attributes {dimension_semantics = [#tpu.dimension_semantics<parallel>], iteration_bounds = array<i64: 2>, scalar_prefetch = 0 : i64, scratch_operands = 0 : i64, tpu.core_type = #tpu.core_type<tc>, window_params = [{transform_indices = @transform_0, window_bounds = array<i64: 1, 36, 8>}, {pipeline_mode = #tpu.pipeline_mode<synchronous>, transform_indices = @transform_1, window_bounds = array<i64: 36, 1>}, {pipeline_mode = #tpu.pipeline_mode<synchronous>, transform_indices = @transform_2, window_bounds = array<i64: 36, 1>}, {pipeline_mode = #tpu.pipeline_mode<synchronous>, transform_indices = @transform_3, window_bounds = array<i64: 36, 36>}, {pipeline_mode = #tpu.pipeline_mode<synchronous>, transform_indices = @transform_4, window_bounds = array<i64: 36, 24>}, {pipeline_mode = #tpu.pipeline_mode<synchronous>, transform_indices = @transform_5, window_bounds = array<i64: 24, 12>}, {pipeline_mode = #tpu.pipeline_mode<synchronous>, transform_indices = @transform_6, window_bounds = array<i64: 8, 32>}, {pipeline_mode = #tpu.pipeline_mode<synchronous>, transform_indices = @transform_7, window_bounds = array<i64: 12, 32>}, {pipeline_mode = #tpu.pipeline_mode<synchronous>, transform_indices = @transform_8, window_bounds = array<i64: 2, 32>}, {pipeline_mode = #tpu.pipeline_mode<synchronous>, transform_indices = @transform_9, window_bounds = array<i64: 36, 32>}, {pipeline_mode = #tpu.pipeline_mode<synchronous>, transform_indices = @transform_10, window_bounds = array<i64: 2, 32>}, {pipeline_mode = #tpu.pipeline_mode<synchronous>, transform_indices = @transform_11, window_bounds = array<i64: 32, 96>}, {pipeline_mode = #tpu.pipeline_mode<synchronous>, transform_indices = @transform_12, window_bounds = array<i64: 1, 96>}, {pipeline_mode = #tpu.pipeline_mode<synchronous>, transform_indices = @transform_13, window_bounds = array<i64: 32, 32>}, {pipeline_mode = #tpu.pipeline_mode<synchronous>, transform_indices = @transform_14, window_bounds = array<i64: 1, 32>}, {pipeline_mode = #tpu.pipeline_mode<synchronous>, transform_indices = @transform_15, window_bounds = array<i64: 2, 32>}, {pipeline_mode = #tpu.pipeline_mode<synchronous>, transform_indices = @transform_16, window_bounds = array<i64: 32, 32>}, {pipeline_mode = #tpu.pipeline_mode<synchronous>, transform_indices = @transform_17, window_bounds = array<i64: 1, 32>}, {pipeline_mode = #tpu.pipeline_mode<synchronous>, transform_indices = @transform_18, window_bounds = array<i64: 32, 64>}, {pipeline_mode = #tpu.pipeline_mode<synchronous>, transform_indices = @transform_19, window_bounds = array<i64: 1, 64>}, {pipeline_mode = #tpu.pipeline_mode<synchronous>, transform_indices = @transform_20, window_bounds = array<i64: 32, 32>}, {pipeline_mode = #tpu.pipeline_mode<synchronous>, transform_indices = @transform_21, window_bounds = array<i64: 1, 32>}, {pipeline_mode = #tpu.pipeline_mode<synchronous>, transform_indices = @transform_22, window_bounds = array<i64: 2, 32>}, {pipeline_mode = #tpu.pipeline_mode<synchronous>, transform_indices = @transform_23, window_bounds = array<i64: 32, 64>}, {pipeline_mode = #tpu.pipeline_mode<synchronous>, transform_indices = @transform_24, window_bounds = array<i64: 1, 64>}, {pipeline_mode = #tpu.pipeline_mode<synchronous>, transform_indices = @transform_25, window_bounds = array<i64: 64, 32>}, {pipeline_mode = #tpu.pipeline_mode<synchronous>, transform_indices = @transform_26, window_bounds = array<i64: 1, 32>}, {pipeline_mode = #tpu.pipeline_mode<synchronous>, transform_indices = @transform_27, window_bounds = array<i64: 2, 32>}, {transform_indices = @transform_28, window_bounds = array<i64: 1, 36, 32>}]} {
    %c0 = arith.constant 0 : index
    %c0_0 = arith.constant 0 : index
    %c0_1 = arith.constant 0 : index
    %0 = vector.load %arg1[%c0, %c0_0, %c0_1] : memref<1x36x8xf32, #tpu.memory_space<vmem>>, vector<1x36x8xf32>
    %1 = vector.shape_cast %0 : vector<1x36x8xf32> to vector<36x8xf32>
    %c0_2 = arith.constant 0 : index
    %c0_3 = arith.constant 0 : index
    %2 = vector.load %arg7[%c0_2, %c0_3] : memref<8x32xf32, #tpu.memory_space<vmem>>, vector<8x32xf32>
    %cst = arith.constant dense<0.000000e+00> : vector<36x32xf32>
    %3 = tpu.matmul %1, %2, %cst {dimension_numbers = #tpu.dot_dimension_numbers<[1], [0], [0], [1], [0, 0, 1, 1], [], []>} : vector<36x8xf32>, vector<8x32xf32>, vector<36x32xf32> -> vector<36x32xf32>
    %c0_4 = arith.constant 0 : index
    %c0_5 = arith.constant 0 : index
    %4 = vector.load %arg2[%c0_4, %c0_5] : memref<36x1xf32, #tpu.memory_space<vmem>>, vector<36x1xf32>
    %cst_6 = arith.constant 5.000000e-01 : f32
    %5 = vector.broadcast %cst_6 : f32 to vector<36x1xf32>
    %6 = arith.cmpf ogt, %4, %5 : vector<36x1xf32>
    %c0_7 = arith.constant 0 : index
    %c0_8 = arith.constant 0 : index
    %7 = vector.load %arg9[%c0_7, %c0_8] : memref<2x32xf32, #tpu.memory_space<vmem>>, vector<1x32xf32>
    %8 = vector.shape_cast %6 : vector<36x1xi1> to vector<36x1xi1>
    %9 = vector.broadcast %8 : vector<36x1xi1> to vector<36x32xi1>
    %10 = vector.shape_cast %7 : vector<1x32xf32> to vector<1x32xf32>
    %11 = vector.broadcast %10 : vector<1x32xf32> to vector<36x32xf32>
    %12 = arith.select %9, %11, %3 : vector<36x32xi1>, vector<36x32xf32>
    %c0_9 = arith.constant 0 : index
    %c0_10 = arith.constant 0 : index
    %13 = vector.load %arg3[%c0_9, %c0_10] : memref<36x1xf32, #tpu.memory_space<vmem>>, vector<36x1xf32>
    %cst_11 = arith.constant 5.000000e-01 : f32
    %14 = vector.broadcast %cst_11 : f32 to vector<36x1xf32>
    %15 = arith.cmpf ogt, %13, %14 : vector<36x1xf32>
    %c1 = arith.constant 1 : index
    %c0_12 = arith.constant 0 : index
    %16 = vector.load %arg9[%c1, %c0_12] : memref<2x32xf32, #tpu.memory_space<vmem>>, vector<1x32xf32>
    %17 = vector.shape_cast %15 : vector<36x1xi1> to vector<36x1xi1>
    %18 = vector.broadcast %17 : vector<36x1xi1> to vector<36x32xi1>
    %19 = vector.shape_cast %16 : vector<1x32xf32> to vector<1x32xf32>
    %20 = vector.broadcast %19 : vector<1x32xf32> to vector<36x32xf32>
    %21 = arith.select %18, %20, %12 : vector<36x32xi1>, vector<36x32xf32>
    %c0_13 = arith.constant 0 : index
    %c0_14 = arith.constant 0 : index
    %22 = vector.load %arg10[%c0_13, %c0_14] : memref<36x32xf32, #tpu.memory_space<vmem>>, vector<36x32xf32>
    %23 = arith.addf %21, %22 : vector<36x32xf32>
    %cst_15 = arith.constant dense<0.000000e+00> : vector<36xf32>
    %24 = vector.multi_reduction <add>, %23, %cst_15 [1] : vector<36x32xf32> to vector<36xf32>
    %25 = vector.shape_cast %24 : vector<36xf32> to vector<36x1xf32>
    %cst_16 = arith.constant 3.200000e+01 : f32
    %26 = vector.broadcast %cst_16 : f32 to vector<36x1xf32>
    %27 = arith.divf %25, %26 : vector<36x1xf32>
    %28 = vector.broadcast %27 : vector<36x1xf32> to vector<36x32xf32>
    %29 = arith.subf %23, %28 : vector<36x32xf32>
    %30 = arith.mulf %29, %29 : vector<36x32xf32>
    %cst_17 = arith.constant dense<0.000000e+00> : vector<36xf32>
    %31 = vector.multi_reduction <add>, %30, %cst_17 [1] : vector<36x32xf32> to vector<36xf32>
    %32 = vector.shape_cast %31 : vector<36xf32> to vector<36x1xf32>
    %cst_18 = arith.constant 3.200000e+01 : f32
    %33 = vector.broadcast %cst_18 : f32 to vector<36x1xf32>
    %34 = arith.divf %32, %33 : vector<36x1xf32>
    %35 = vector.broadcast %27 : vector<36x1xf32> to vector<36x32xf32>
    %36 = arith.subf %23, %35 : vector<36x32xf32>
    %cst_19 = arith.constant 9.99999996E-13 : f32
    %37 = vector.broadcast %cst_19 : f32 to vector<36x1xf32>
    %38 = arith.addf %34, %37 : vector<36x1xf32>
    %39 = math.rsqrt %38 : vector<36x1xf32>
    %40 = vector.broadcast %39 : vector<36x1xf32> to vector<36x32xf32>
    %41 = arith.mulf %36, %40 : vector<36x32xf32>
    %c0_20 = arith.constant 0 : index
    %c0_21 = arith.constant 0 : index
    %42 = vector.load %arg11[%c0_20, %c0_21] : memref<2x32xf32, #tpu.memory_space<vmem>>, vector<1x32xf32>
    %43 = vector.broadcast %42 : vector<1x32xf32> to vector<36x32xf32>
    %44 = arith.mulf %41, %43 : vector<36x32xf32>
    %c1_22 = arith.constant 1 : index
    %c0_23 = arith.constant 0 : index
    %45 = vector.load %arg11[%c1_22, %c0_23] : memref<2x32xf32, #tpu.memory_space<vmem>>, vector<1x32xf32>
    %46 = vector.broadcast %45 : vector<1x32xf32> to vector<36x32xf32>
    %47 = arith.addf %44, %46 : vector<36x32xf32>
    %c0_24 = arith.constant 0 : index
    %c0_25 = arith.constant 0 : index
    %48 = vector.load %arg12[%c0_24, %c0_25] : memref<32x96xf32, #tpu.memory_space<vmem>>, vector<32x96xf32>
    %cst_26 = arith.constant dense<0.000000e+00> : vector<36x96xf32>
    %49 = tpu.matmul %47, %48, %cst_26 {dimension_numbers = #tpu.dot_dimension_numbers<[1], [0], [0], [1], [0, 0, 1, 1], [], []>} : vector<36x32xf32>, vector<32x96xf32>, vector<36x96xf32> -> vector<36x96xf32>
    %c0_27 = arith.constant 0 : index
    %c0_28 = arith.constant 0 : index
    %50 = vector.load %arg13[%c0_27, %c0_28] : memref<1x96xf32, #tpu.memory_space<vmem>>, vector<1x96xf32>
    %51 = vector.broadcast %50 : vector<1x96xf32> to vector<36x96xf32>
    %52 = arith.addf %49, %51 : vector<36x96xf32>
    %53 = vector.extract_strided_slice %52 {offsets = [0, 0], sizes = [36, 32], strides = [1, 1]} : vector<36x96xf32> to vector<36x32xf32>
    %54 = vector.extract_strided_slice %52 {offsets = [0, 32], sizes = [36, 32], strides = [1, 1]} : vector<36x96xf32> to vector<36x32xf32>
    %55 = vector.extract_strided_slice %52 {offsets = [0, 64], sizes = [36, 32], strides = [1, 1]} : vector<36x96xf32> to vector<36x32xf32>
    %c0_29 = arith.constant 0 : index
    %c0_30 = arith.constant 0 : index
    %56 = vector.load %arg4[%c0_29, %c0_30] : memref<36x36xf32, #tpu.memory_space<vmem>>, vector<36x36xf32>
    %57 = vector.extract_strided_slice %53 {offsets = [0, 0], sizes = [36, 16], strides = [1, 1]} : vector<36x32xf32> to vector<36x16xf32>
    %58 = vector.extract_strided_slice %54 {offsets = [0, 0], sizes = [36, 16], strides = [1, 1]} : vector<36x32xf32> to vector<36x16xf32>
    %cst_31 = arith.constant dense<0.000000e+00> : vector<36x36xf32>
    %59 = tpu.matmul %57, %58, %cst_31 {dimension_numbers = #tpu.dot_dimension_numbers<[1], [1], [0], [0], [0, 0, 1, 0], [], []>} : vector<36x16xf32>, vector<36x16xf32>, vector<36x36xf32> -> vector<36x36xf32>
    %cst_32 = arith.constant 2.500000e-01 : f32
    %60 = vector.broadcast %cst_32 : f32 to vector<36x36xf32>
    %61 = arith.mulf %59, %60 : vector<36x36xf32>
    %62 = arith.addf %61, %56 : vector<36x36xf32>
    %cst_33 = arith.constant dense<0xFF800000> : vector<36xf32>
    %63 = vector.multi_reduction <maximumf>, %62, %cst_33 [1] : vector<36x36xf32> to vector<36xf32>
    %64 = vector.shape_cast %63 : vector<36xf32> to vector<36x1xf32>
    %65 = vector.broadcast %64 : vector<36x1xf32> to vector<36x36xf32>
    %66 = arith.subf %62, %65 : vector<36x36xf32>
    %67 = math.exp %66 : vector<36x36xf32>
    %cst_34 = arith.constant dense<0.000000e+00> : vector<36xf32>
    %68 = vector.multi_reduction <add>, %67, %cst_34 [1] : vector<36x36xf32> to vector<36xf32>
    %69 = vector.shape_cast %68 : vector<36xf32> to vector<36x1xf32>
    %70 = vector.broadcast %69 : vector<36x1xf32> to vector<36x36xf32>
    %71 = arith.divf %67, %70 : vector<36x36xf32>
    %72 = vector.extract_strided_slice %55 {offsets = [0, 0], sizes = [36, 16], strides = [1, 1]} : vector<36x32xf32> to vector<36x16xf32>
    %cst_35 = arith.constant dense<0.000000e+00> : vector<36x16xf32>
    %73 = tpu.matmul %71, %72, %cst_35 {dimension_numbers = #tpu.dot_dimension_numbers<[1], [0], [0], [1], [0, 0, 1, 1], [], []>} : vector<36x36xf32>, vector<36x16xf32>, vector<36x16xf32> -> vector<36x16xf32>
    %74 = vector.extract_strided_slice %53 {offsets = [0, 16], sizes = [36, 16], strides = [1, 1]} : vector<36x32xf32> to vector<36x16xf32>
    %75 = vector.extract_strided_slice %54 {offsets = [0, 16], sizes = [36, 16], strides = [1, 1]} : vector<36x32xf32> to vector<36x16xf32>
    %cst_36 = arith.constant dense<0.000000e+00> : vector<36x36xf32>
    %76 = tpu.matmul %74, %75, %cst_36 {dimension_numbers = #tpu.dot_dimension_numbers<[1], [1], [0], [0], [0, 0, 1, 0], [], []>} : vector<36x16xf32>, vector<36x16xf32>, vector<36x36xf32> -> vector<36x36xf32>
    %cst_37 = arith.constant 2.500000e-01 : f32
    %77 = vector.broadcast %cst_37 : f32 to vector<36x36xf32>
    %78 = arith.mulf %76, %77 : vector<36x36xf32>
    %79 = arith.addf %78, %56 : vector<36x36xf32>
    %cst_38 = arith.constant dense<0xFF800000> : vector<36xf32>
    %80 = vector.multi_reduction <maximumf>, %79, %cst_38 [1] : vector<36x36xf32> to vector<36xf32>
    %81 = vector.shape_cast %80 : vector<36xf32> to vector<36x1xf32>
    %82 = vector.broadcast %81 : vector<36x1xf32> to vector<36x36xf32>
    %83 = arith.subf %79, %82 : vector<36x36xf32>
    %84 = math.exp %83 : vector<36x36xf32>
    %cst_39 = arith.constant dense<0.000000e+00> : vector<36xf32>
    %85 = vector.multi_reduction <add>, %84, %cst_39 [1] : vector<36x36xf32> to vector<36xf32>
    %86 = vector.shape_cast %85 : vector<36xf32> to vector<36x1xf32>
    %87 = vector.broadcast %86 : vector<36x1xf32> to vector<36x36xf32>
    %88 = arith.divf %84, %87 : vector<36x36xf32>
    %89 = vector.extract_strided_slice %55 {offsets = [0, 16], sizes = [36, 16], strides = [1, 1]} : vector<36x32xf32> to vector<36x16xf32>
    %cst_40 = arith.constant dense<0.000000e+00> : vector<36x16xf32>
    %90 = tpu.matmul %88, %89, %cst_40 {dimension_numbers = #tpu.dot_dimension_numbers<[1], [0], [0], [1], [0, 0, 1, 1], [], []>} : vector<36x36xf32>, vector<36x16xf32>, vector<36x16xf32> -> vector<36x16xf32>
    %91 = tpu.concatenate %73, %90 in 1 : vector<36x16xf32>, vector<36x16xf32> -> vector<36x32xf32>
    %c0_41 = arith.constant 0 : index
    %c0_42 = arith.constant 0 : index
    %92 = vector.load %arg14[%c0_41, %c0_42] : memref<32x32xf32, #tpu.memory_space<vmem>>, vector<32x32xf32>
    %cst_43 = arith.constant dense<0.000000e+00> : vector<36x32xf32>
    %93 = tpu.matmul %91, %92, %cst_43 {dimension_numbers = #tpu.dot_dimension_numbers<[1], [0], [0], [1], [0, 0, 1, 1], [], []>} : vector<36x32xf32>, vector<32x32xf32>, vector<36x32xf32> -> vector<36x32xf32>
    %c0_44 = arith.constant 0 : index
    %c0_45 = arith.constant 0 : index
    %94 = vector.load %arg15[%c0_44, %c0_45] : memref<1x32xf32, #tpu.memory_space<vmem>>, vector<1x32xf32>
    %95 = vector.broadcast %94 : vector<1x32xf32> to vector<36x32xf32>
    %96 = arith.addf %93, %95 : vector<36x32xf32>
    %97 = arith.addf %96, %47 : vector<36x32xf32>
    %cst_46 = arith.constant dense<0.000000e+00> : vector<36xf32>
    %98 = vector.multi_reduction <add>, %97, %cst_46 [1] : vector<36x32xf32> to vector<36xf32>
    %99 = vector.shape_cast %98 : vector<36xf32> to vector<36x1xf32>
    %cst_47 = arith.constant 3.200000e+01 : f32
    %100 = vector.broadcast %cst_47 : f32 to vector<36x1xf32>
    %101 = arith.divf %99, %100 : vector<36x1xf32>
    %102 = vector.broadcast %101 : vector<36x1xf32> to vector<36x32xf32>
    %103 = arith.subf %97, %102 : vector<36x32xf32>
    %104 = arith.mulf %103, %103 : vector<36x32xf32>
    %cst_48 = arith.constant dense<0.000000e+00> : vector<36xf32>
    %105 = vector.multi_reduction <add>, %104, %cst_48 [1] : vector<36x32xf32> to vector<36xf32>
    %106 = vector.shape_cast %105 : vector<36xf32> to vector<36x1xf32>
    %cst_49 = arith.constant 3.200000e+01 : f32
    %107 = vector.broadcast %cst_49 : f32 to vector<36x1xf32>
    %108 = arith.divf %106, %107 : vector<36x1xf32>
    %109 = vector.broadcast %101 : vector<36x1xf32> to vector<36x32xf32>
    %110 = arith.subf %97, %109 : vector<36x32xf32>
    %cst_50 = arith.constant 9.99999996E-13 : f32
    %111 = vector.broadcast %cst_50 : f32 to vector<36x1xf32>
    %112 = arith.addf %108, %111 : vector<36x1xf32>
    %113 = math.rsqrt %112 : vector<36x1xf32>
    %114 = vector.broadcast %113 : vector<36x1xf32> to vector<36x32xf32>
    %115 = arith.mulf %110, %114 : vector<36x32xf32>
    %c0_51 = arith.constant 0 : index
    %c0_52 = arith.constant 0 : index
    %116 = vector.load %arg16[%c0_51, %c0_52] : memref<2x32xf32, #tpu.memory_space<vmem>>, vector<1x32xf32>
    %117 = vector.broadcast %116 : vector<1x32xf32> to vector<36x32xf32>
    %118 = arith.mulf %115, %117 : vector<36x32xf32>
    %c1_53 = arith.constant 1 : index
    %c0_54 = arith.constant 0 : index
    %119 = vector.load %arg16[%c1_53, %c0_54] : memref<2x32xf32, #tpu.memory_space<vmem>>, vector<1x32xf32>
    %120 = vector.broadcast %119 : vector<1x32xf32> to vector<36x32xf32>
    %121 = arith.addf %118, %120 : vector<36x32xf32>
    %c0_55 = arith.constant 0 : index
    %c0_56 = arith.constant 0 : index
    %122 = vector.load %arg6[%c0_55, %c0_56] : memref<24x12xf32, #tpu.memory_space<vmem>>, vector<24x12xf32>
    %c0_57 = arith.constant 0 : index
    %c0_58 = arith.constant 0 : index
    %123 = vector.load %arg8[%c0_57, %c0_58] : memref<12x32xf32, #tpu.memory_space<vmem>>, vector<12x32xf32>
    %cst_59 = arith.constant dense<0.000000e+00> : vector<24x32xf32>
    %124 = tpu.matmul %122, %123, %cst_59 {dimension_numbers = #tpu.dot_dimension_numbers<[1], [0], [0], [1], [0, 0, 1, 1], [], []>} : vector<24x12xf32>, vector<12x32xf32>, vector<24x32xf32> -> vector<24x32xf32>
    %c0_60 = arith.constant 0 : index
    %c0_61 = arith.constant 0 : index
    %125 = vector.load %arg17[%c0_60, %c0_61] : memref<32x32xf32, #tpu.memory_space<vmem>>, vector<32x32xf32>
    %cst_62 = arith.constant dense<0.000000e+00> : vector<36x32xf32>
    %126 = tpu.matmul %121, %125, %cst_62 {dimension_numbers = #tpu.dot_dimension_numbers<[1], [0], [0], [1], [0, 0, 1, 1], [], []>} : vector<36x32xf32>, vector<32x32xf32>, vector<36x32xf32> -> vector<36x32xf32>
    %c0_63 = arith.constant 0 : index
    %c0_64 = arith.constant 0 : index
    %127 = vector.load %arg18[%c0_63, %c0_64] : memref<1x32xf32, #tpu.memory_space<vmem>>, vector<1x32xf32>
    %128 = vector.broadcast %127 : vector<1x32xf32> to vector<36x32xf32>
    %129 = arith.addf %126, %128 : vector<36x32xf32>
    %c0_65 = arith.constant 0 : index
    %c0_66 = arith.constant 0 : index
    %130 = vector.load %arg19[%c0_65, %c0_66] : memref<32x64xf32, #tpu.memory_space<vmem>>, vector<32x64xf32>
    %cst_67 = arith.constant dense<0.000000e+00> : vector<24x64xf32>
    %131 = tpu.matmul %124, %130, %cst_67 {dimension_numbers = #tpu.dot_dimension_numbers<[1], [0], [0], [1], [0, 0, 1, 1], [], []>} : vector<24x32xf32>, vector<32x64xf32>, vector<24x64xf32> -> vector<24x64xf32>
    %c0_68 = arith.constant 0 : index
    %c0_69 = arith.constant 0 : index
    %132 = vector.load %arg20[%c0_68, %c0_69] : memref<1x64xf32, #tpu.memory_space<vmem>>, vector<1x64xf32>
    %133 = vector.broadcast %132 : vector<1x64xf32> to vector<24x64xf32>
    %134 = arith.addf %131, %133 : vector<24x64xf32>
    %135 = vector.extract_strided_slice %134 {offsets = [0, 0], sizes = [24, 32], strides = [1, 1]} : vector<24x64xf32> to vector<24x32xf32>
    %136 = vector.extract_strided_slice %134 {offsets = [0, 32], sizes = [24, 32], strides = [1, 1]} : vector<24x64xf32> to vector<24x32xf32>
    %c0_70 = arith.constant 0 : index
    %c0_71 = arith.constant 0 : index
    %137 = vector.load %arg5[%c0_70, %c0_71] : memref<36x24xf32, #tpu.memory_space<vmem>>, vector<36x24xf32>
    %138 = vector.extract_strided_slice %129 {offsets = [0, 0], sizes = [36, 16], strides = [1, 1]} : vector<36x32xf32> to vector<36x16xf32>
    %139 = vector.extract_strided_slice %135 {offsets = [0, 0], sizes = [24, 16], strides = [1, 1]} : vector<24x32xf32> to vector<24x16xf32>
    %cst_72 = arith.constant dense<0.000000e+00> : vector<36x24xf32>
    %140 = tpu.matmul %138, %139, %cst_72 {dimension_numbers = #tpu.dot_dimension_numbers<[1], [1], [0], [0], [0, 0, 1, 0], [], []>} : vector<36x16xf32>, vector<24x16xf32>, vector<36x24xf32> -> vector<36x24xf32>
    %cst_73 = arith.constant 2.500000e-01 : f32
    %141 = vector.broadcast %cst_73 : f32 to vector<36x24xf32>
    %142 = arith.mulf %140, %141 : vector<36x24xf32>
    %143 = arith.addf %142, %137 : vector<36x24xf32>
    %cst_74 = arith.constant dense<0xFF800000> : vector<36xf32>
    %144 = vector.multi_reduction <maximumf>, %143, %cst_74 [1] : vector<36x24xf32> to vector<36xf32>
    %145 = vector.shape_cast %144 : vector<36xf32> to vector<36x1xf32>
    %146 = vector.broadcast %145 : vector<36x1xf32> to vector<36x24xf32>
    %147 = arith.subf %143, %146 : vector<36x24xf32>
    %148 = math.exp %147 : vector<36x24xf32>
    %cst_75 = arith.constant dense<0.000000e+00> : vector<36xf32>
    %149 = vector.multi_reduction <add>, %148, %cst_75 [1] : vector<36x24xf32> to vector<36xf32>
    %150 = vector.shape_cast %149 : vector<36xf32> to vector<36x1xf32>
    %151 = vector.broadcast %150 : vector<36x1xf32> to vector<36x24xf32>
    %152 = arith.divf %148, %151 : vector<36x24xf32>
    %153 = vector.extract_strided_slice %136 {offsets = [0, 0], sizes = [24, 16], strides = [1, 1]} : vector<24x32xf32> to vector<24x16xf32>
    %cst_76 = arith.constant dense<0.000000e+00> : vector<36x16xf32>
    %154 = tpu.matmul %152, %153, %cst_76 {dimension_numbers = #tpu.dot_dimension_numbers<[1], [0], [0], [1], [0, 0, 1, 1], [], []>} : vector<36x24xf32>, vector<24x16xf32>, vector<36x16xf32> -> vector<36x16xf32>
    %155 = vector.extract_strided_slice %129 {offsets = [0, 16], sizes = [36, 16], strides = [1, 1]} : vector<36x32xf32> to vector<36x16xf32>
    %156 = vector.extract_strided_slice %135 {offsets = [0, 16], sizes = [24, 16], strides = [1, 1]} : vector<24x32xf32> to vector<24x16xf32>
    %cst_77 = arith.constant dense<0.000000e+00> : vector<36x24xf32>
    %157 = tpu.matmul %155, %156, %cst_77 {dimension_numbers = #tpu.dot_dimension_numbers<[1], [1], [0], [0], [0, 0, 1, 0], [], []>} : vector<36x16xf32>, vector<24x16xf32>, vector<36x24xf32> -> vector<36x24xf32>
    %cst_78 = arith.constant 2.500000e-01 : f32
    %158 = vector.broadcast %cst_78 : f32 to vector<36x24xf32>
    %159 = arith.mulf %157, %158 : vector<36x24xf32>
    %160 = arith.addf %159, %137 : vector<36x24xf32>
    %cst_79 = arith.constant dense<0xFF800000> : vector<36xf32>
    %161 = vector.multi_reduction <maximumf>, %160, %cst_79 [1] : vector<36x24xf32> to vector<36xf32>
    %162 = vector.shape_cast %161 : vector<36xf32> to vector<36x1xf32>
    %163 = vector.broadcast %162 : vector<36x1xf32> to vector<36x24xf32>
    %164 = arith.subf %160, %163 : vector<36x24xf32>
    %165 = math.exp %164 : vector<36x24xf32>
    %cst_80 = arith.constant dense<0.000000e+00> : vector<36xf32>
    %166 = vector.multi_reduction <add>, %165, %cst_80 [1] : vector<36x24xf32> to vector<36xf32>
    %167 = vector.shape_cast %166 : vector<36xf32> to vector<36x1xf32>
    %168 = vector.broadcast %167 : vector<36x1xf32> to vector<36x24xf32>
    %169 = arith.divf %165, %168 : vector<36x24xf32>
    %170 = vector.extract_strided_slice %136 {offsets = [0, 16], sizes = [24, 16], strides = [1, 1]} : vector<24x32xf32> to vector<24x16xf32>
    %cst_81 = arith.constant dense<0.000000e+00> : vector<36x16xf32>
    %171 = tpu.matmul %169, %170, %cst_81 {dimension_numbers = #tpu.dot_dimension_numbers<[1], [0], [0], [1], [0, 0, 1, 1], [], []>} : vector<36x24xf32>, vector<24x16xf32>, vector<36x16xf32> -> vector<36x16xf32>
    %172 = tpu.concatenate %154, %171 in 1 : vector<36x16xf32>, vector<36x16xf32> -> vector<36x32xf32>
    %c0_82 = arith.constant 0 : index
    %c0_83 = arith.constant 0 : index
    %173 = vector.load %arg21[%c0_82, %c0_83] : memref<32x32xf32, #tpu.memory_space<vmem>>, vector<32x32xf32>
    %cst_84 = arith.constant dense<0.000000e+00> : vector<36x32xf32>
    %174 = tpu.matmul %172, %173, %cst_84 {dimension_numbers = #tpu.dot_dimension_numbers<[1], [0], [0], [1], [0, 0, 1, 1], [], []>} : vector<36x32xf32>, vector<32x32xf32>, vector<36x32xf32> -> vector<36x32xf32>
    %c0_85 = arith.constant 0 : index
    %c0_86 = arith.constant 0 : index
    %175 = vector.load %arg22[%c0_85, %c0_86] : memref<1x32xf32, #tpu.memory_space<vmem>>, vector<1x32xf32>
    %176 = vector.broadcast %175 : vector<1x32xf32> to vector<36x32xf32>
    %177 = arith.addf %174, %176 : vector<36x32xf32>
    %178 = arith.addf %177, %121 : vector<36x32xf32>
    %cst_87 = arith.constant dense<0.000000e+00> : vector<36xf32>
    %179 = vector.multi_reduction <add>, %178, %cst_87 [1] : vector<36x32xf32> to vector<36xf32>
    %180 = vector.shape_cast %179 : vector<36xf32> to vector<36x1xf32>
    %cst_88 = arith.constant 3.200000e+01 : f32
    %181 = vector.broadcast %cst_88 : f32 to vector<36x1xf32>
    %182 = arith.divf %180, %181 : vector<36x1xf32>
    %183 = vector.broadcast %182 : vector<36x1xf32> to vector<36x32xf32>
    %184 = arith.subf %178, %183 : vector<36x32xf32>
    %185 = arith.mulf %184, %184 : vector<36x32xf32>
    %cst_89 = arith.constant dense<0.000000e+00> : vector<36xf32>
    %186 = vector.multi_reduction <add>, %185, %cst_89 [1] : vector<36x32xf32> to vector<36xf32>
    %187 = vector.shape_cast %186 : vector<36xf32> to vector<36x1xf32>
    %cst_90 = arith.constant 3.200000e+01 : f32
    %188 = vector.broadcast %cst_90 : f32 to vector<36x1xf32>
    %189 = arith.divf %187, %188 : vector<36x1xf32>
    %190 = vector.broadcast %182 : vector<36x1xf32> to vector<36x32xf32>
    %191 = arith.subf %178, %190 : vector<36x32xf32>
    %cst_91 = arith.constant 9.99999996E-13 : f32
    %192 = vector.broadcast %cst_91 : f32 to vector<36x1xf32>
    %193 = arith.addf %189, %192 : vector<36x1xf32>
    %194 = math.rsqrt %193 : vector<36x1xf32>
    %195 = vector.broadcast %194 : vector<36x1xf32> to vector<36x32xf32>
    %196 = arith.mulf %191, %195 : vector<36x32xf32>
    %c0_92 = arith.constant 0 : index
    %c0_93 = arith.constant 0 : index
    %197 = vector.load %arg23[%c0_92, %c0_93] : memref<2x32xf32, #tpu.memory_space<vmem>>, vector<1x32xf32>
    %198 = vector.broadcast %197 : vector<1x32xf32> to vector<36x32xf32>
    %199 = arith.mulf %196, %198 : vector<36x32xf32>
    %c1_94 = arith.constant 1 : index
    %c0_95 = arith.constant 0 : index
    %200 = vector.load %arg23[%c1_94, %c0_95] : memref<2x32xf32, #tpu.memory_space<vmem>>, vector<1x32xf32>
    %201 = vector.broadcast %200 : vector<1x32xf32> to vector<36x32xf32>
    %202 = arith.addf %199, %201 : vector<36x32xf32>
    %c0_96 = arith.constant 0 : index
    %c0_97 = arith.constant 0 : index
    %203 = vector.load %arg24[%c0_96, %c0_97] : memref<32x64xf32, #tpu.memory_space<vmem>>, vector<32x64xf32>
    %cst_98 = arith.constant dense<0.000000e+00> : vector<36x64xf32>
    %204 = tpu.matmul %202, %203, %cst_98 {dimension_numbers = #tpu.dot_dimension_numbers<[1], [0], [0], [1], [0, 0, 1, 1], [], []>} : vector<36x32xf32>, vector<32x64xf32>, vector<36x64xf32> -> vector<36x64xf32>
    %c0_99 = arith.constant 0 : index
    %c0_100 = arith.constant 0 : index
    %205 = vector.load %arg25[%c0_99, %c0_100] : memref<1x64xf32, #tpu.memory_space<vmem>>, vector<1x64xf32>
    %206 = vector.broadcast %205 : vector<1x64xf32> to vector<36x64xf32>
    %207 = arith.addf %204, %206 : vector<36x64xf32>
    %cst_101 = arith.constant 5.000000e-01 : f32
    %208 = vector.broadcast %cst_101 : f32 to vector<36x64xf32>
    %209 = arith.mulf %208, %207 : vector<36x64xf32>
    %cst_102 = arith.constant 0.707106769 : f32
    %210 = vector.broadcast %cst_102 : f32 to vector<36x64xf32>
    %211 = arith.mulf %207, %210 : vector<36x64xf32>
    %212 = math.erf %211 : vector<36x64xf32>
    %cst_103 = arith.constant 1.000000e+00 : f32
    %213 = vector.broadcast %cst_103 : f32 to vector<36x64xf32>
    %214 = arith.addf %213, %212 : vector<36x64xf32>
    %215 = arith.mulf %209, %214 : vector<36x64xf32>
    %c0_104 = arith.constant 0 : index
    %c0_105 = arith.constant 0 : index
    %216 = vector.load %arg26[%c0_104, %c0_105] : memref<64x32xf32, #tpu.memory_space<vmem>>, vector<64x32xf32>
    %cst_106 = arith.constant dense<0.000000e+00> : vector<36x32xf32>
    %217 = tpu.matmul %215, %216, %cst_106 {dimension_numbers = #tpu.dot_dimension_numbers<[1], [0], [0], [1], [0, 0, 1, 1], [], []>} : vector<36x64xf32>, vector<64x32xf32>, vector<36x32xf32> -> vector<36x32xf32>
    %c0_107 = arith.constant 0 : index
    %c0_108 = arith.constant 0 : index
    %218 = vector.load %arg27[%c0_107, %c0_108] : memref<1x32xf32, #tpu.memory_space<vmem>>, vector<1x32xf32>
    %219 = vector.broadcast %218 : vector<1x32xf32> to vector<36x32xf32>
    %220 = arith.addf %217, %219 : vector<36x32xf32>
    %221 = arith.addf %220, %202 : vector<36x32xf32>
    %cst_109 = arith.constant dense<0.000000e+00> : vector<36xf32>
    %222 = vector.multi_reduction <add>, %221, %cst_109 [1] : vector<36x32xf32> to vector<36xf32>
    %223 = vector.shape_cast %222 : vector<36xf32> to vector<36x1xf32>
    %cst_110 = arith.constant 3.200000e+01 : f32
    %224 = vector.broadcast %cst_110 : f32 to vector<36x1xf32>
    %225 = arith.divf %223, %224 : vector<36x1xf32>
    %226 = vector.broadcast %225 : vector<36x1xf32> to vector<36x32xf32>
    %227 = arith.subf %221, %226 : vector<36x32xf32>
    %228 = arith.mulf %227, %227 : vector<36x32xf32>
    %cst_111 = arith.constant dense<0.000000e+00> : vector<36xf32>
    %229 = vector.multi_reduction <add>, %228, %cst_111 [1] : vector<36x32xf32> to vector<36xf32>
    %230 = vector.shape_cast %229 : vector<36xf32> to vector<36x1xf32>
    %cst_112 = arith.constant 3.200000e+01 : f32
    %231 = vector.broadcast %cst_112 : f32 to vector<36x1xf32>
    %232 = arith.divf %230, %231 : vector<36x1xf32>
    %233 = vector.broadcast %225 : vector<36x1xf32> to vector<36x32xf32>
    %234 = arith.subf %221, %233 : vector<36x32xf32>
    %cst_113 = arith.constant 9.99999996E-13 : f32
    %235 = vector.broadcast %cst_113 : f32 to vector<36x1xf32>
    %236 = arith.addf %232, %235 : vector<36x1xf32>
    %237 = math.rsqrt %236 : vector<36x1xf32>
    %238 = vector.broadcast %237 : vector<36x1xf32> to vector<36x32xf32>
    %239 = arith.mulf %234, %238 : vector<36x32xf32>
    %c0_114 = arith.constant 0 : index
    %c0_115 = arith.constant 0 : index
    %240 = vector.load %arg28[%c0_114, %c0_115] : memref<2x32xf32, #tpu.memory_space<vmem>>, vector<1x32xf32>
    %241 = vector.broadcast %240 : vector<1x32xf32> to vector<36x32xf32>
    %242 = arith.mulf %239, %241 : vector<36x32xf32>
    %c1_116 = arith.constant 1 : index
    %c0_117 = arith.constant 0 : index
    %243 = vector.load %arg28[%c1_116, %c0_117] : memref<2x32xf32, #tpu.memory_space<vmem>>, vector<1x32xf32>
    %244 = vector.broadcast %243 : vector<1x32xf32> to vector<36x32xf32>
    %245 = arith.addf %242, %244 : vector<36x32xf32>
    %c0_118 = arith.constant 0 : index
    %c0_119 = arith.constant 0 : index
    %c0_120 = arith.constant 0 : index
    %246 = vector.load %arg29[%c0_118, %c0_119, %c0_120] : memref<1x36x32xf32, #tpu.memory_space<vmem>>, vector<1x36x32xf32>
    %247 = vector.shape_cast %246 : vector<1x36x32xf32> to vector<36x32xf32>
    %248 = vector.shape_cast %245 : vector<36x32xf32> to vector<1x36x32xf32>
    tpu.vector_store %arg29[%c0_118, %c0_119, %c0_120], %248 {strides = array<i32>} : memref<1x36x32xf32, #tpu.memory_space<vmem>>, vector<1x36x32xf32>,
    return
  }
  func.func @transform_0(%arg0: i32) -> (i32, i32, i32) {
    %c0_i32 = arith.constant 0 : i32
    %c0_i32_0 = arith.constant 0 : i32
    %c0_i32_1 = arith.constant 0 : i32
    return %arg0, %c0_i32, %c0_i32_0 : i32, i32, i32
  }
  func.func @transform_1(%arg0: i32) -> (i32, i32) {
    %c0_i32 = arith.constant 0 : i32
    %c0_i32_0 = arith.constant 0 : i32
    %c0_i32_1 = arith.constant 0 : i32
    return %c0_i32, %c0_i32_0 : i32, i32
  }
  func.func @transform_2(%arg0: i32) -> (i32, i32) {
    %c0_i32 = arith.constant 0 : i32
    %c0_i32_0 = arith.constant 0 : i32
    %c0_i32_1 = arith.constant 0 : i32
    return %c0_i32, %c0_i32_0 : i32, i32
  }
  func.func @transform_3(%arg0: i32) -> (i32, i32) {
    %c0_i32 = arith.constant 0 : i32
    %c0_i32_0 = arith.constant 0 : i32
    %c0_i32_1 = arith.constant 0 : i32
    return %c0_i32, %c0_i32_0 : i32, i32
  }
  func.func @transform_4(%arg0: i32) -> (i32, i32) {
    %c0_i32 = arith.constant 0 : i32
    %c0_i32_0 = arith.constant 0 : i32
    %c0_i32_1 = arith.constant 0 : i32
    return %c0_i32, %c0_i32_0 : i32, i32
  }
  func.func @transform_5(%arg0: i32) -> (i32, i32) {
    %c0_i32 = arith.constant 0 : i32
    %c0_i32_0 = arith.constant 0 : i32
    %c0_i32_1 = arith.constant 0 : i32
    return %c0_i32, %c0_i32_0 : i32, i32
  }
  func.func @transform_6(%arg0: i32) -> (i32, i32) {
    %c0_i32 = arith.constant 0 : i32
    %c0_i32_0 = arith.constant 0 : i32
    %c0_i32_1 = arith.constant 0 : i32
    return %c0_i32, %c0_i32_0 : i32, i32
  }
  func.func @transform_7(%arg0: i32) -> (i32, i32) {
    %c0_i32 = arith.constant 0 : i32
    %c0_i32_0 = arith.constant 0 : i32
    %c0_i32_1 = arith.constant 0 : i32
    return %c0_i32, %c0_i32_0 : i32, i32
  }
  func.func @transform_8(%arg0: i32) -> (i32, i32) {
    %c0_i32 = arith.constant 0 : i32
    %c0_i32_0 = arith.constant 0 : i32
    %c0_i32_1 = arith.constant 0 : i32
    return %c0_i32, %c0_i32_0 : i32, i32
  }
  func.func @transform_9(%arg0: i32) -> (i32, i32) {
    %c0_i32 = arith.constant 0 : i32
    %c0_i32_0 = arith.constant 0 : i32
    %c0_i32_1 = arith.constant 0 : i32
    return %c0_i32, %c0_i32_0 : i32, i32
  }
  func.func @transform_10(%arg0: i32) -> (i32, i32) {
    %c0_i32 = arith.constant 0 : i32
    %c0_i32_0 = arith.constant 0 : i32
    %c0_i32_1 = arith.constant 0 : i32
    return %c0_i32, %c0_i32_0 : i32, i32
  }
  func.func @transform_11(%arg0: i32) -> (i32, i32) {
    %c0_i32 = arith.constant 0 : i32
    %c0_i32_0 = arith.constant 0 : i32
    %c0_i32_1 = arith.constant 0 : i32
    return %c0_i32, %c0_i32_0 : i32, i32
  }
  func.func @transform_12(%arg0: i32) -> (i32, i32) {
    %c0_i32 = arith.constant 0 : i32
    %c0_i32_0 = arith.constant 0 : i32
    %c0_i32_1 = arith.constant 0 : i32
    return %c0_i32, %c0_i32_0 : i32, i32
  }
  func.func @transform_13(%arg0: i32) -> (i32, i32) {
    %c0_i32 = arith.constant 0 : i32
    %c0_i32_0 = arith.constant 0 : i32
    %c0_i32_1 = arith.constant 0 : i32
    return %c0_i32, %c0_i32_0 : i32, i32
  }
  func.func @transform_14(%arg0: i32) -> (i32, i32) {
    %c0_i32 = arith.constant 0 : i32
    %c0_i32_0 = arith.constant 0 : i32
    %c0_i32_1 = arith.constant 0 : i32
    return %c0_i32, %c0_i32_0 : i32, i32
  }
  func.func @transform_15(%arg0: i32) -> (i32, i32) {
    %c0_i32 = arith.constant 0 : i32
    %c0_i32_0 = arith.constant 0 : i32
    %c0_i32_1 = arith.constant 0 : i32
    return %c0_i32, %c0_i32_0 : i32, i32
  }
  func.func @transform_16(%arg0: i32) -> (i32, i32) {
    %c0_i32 = arith.constant 0 : i32
    %c0_i32_0 = arith.constant 0 : i32
    %c0_i32_1 = arith.constant 0 : i32
    return %c0_i32, %c0_i32_0 : i32, i32
  }
  func.func @transform_17(%arg0: i32) -> (i32, i32) {
    %c0_i32 = arith.constant 0 : i32
    %c0_i32_0 = arith.constant 0 : i32
    %c0_i32_1 = arith.constant 0 : i32
    return %c0_i32, %c0_i32_0 : i32, i32
  }
  func.func @transform_18(%arg0: i32) -> (i32, i32) {
    %c0_i32 = arith.constant 0 : i32
    %c0_i32_0 = arith.constant 0 : i32
    %c0_i32_1 = arith.constant 0 : i32
    return %c0_i32, %c0_i32_0 : i32, i32
  }
  func.func @transform_19(%arg0: i32) -> (i32, i32) {
    %c0_i32 = arith.constant 0 : i32
    %c0_i32_0 = arith.constant 0 : i32
    %c0_i32_1 = arith.constant 0 : i32
    return %c0_i32, %c0_i32_0 : i32, i32
  }
  func.func @transform_20(%arg0: i32) -> (i32, i32) {
    %c0_i32 = arith.constant 0 : i32
    %c0_i32_0 = arith.constant 0 : i32
    %c0_i32_1 = arith.constant 0 : i32
    return %c0_i32, %c0_i32_0 : i32, i32
  }
  func.func @transform_21(%arg0: i32) -> (i32, i32) {
    %c0_i32 = arith.constant 0 : i32
    %c0_i32_0 = arith.constant 0 : i32
    %c0_i32_1 = arith.constant 0 : i32
    return %c0_i32, %c0_i32_0 : i32, i32
  }
  func.func @transform_22(%arg0: i32) -> (i32, i32) {
    %c0_i32 = arith.constant 0 : i32
    %c0_i32_0 = arith.constant 0 : i32
    %c0_i32_1 = arith.constant 0 : i32
    return %c0_i32, %c0_i32_0 : i32, i32
  }
  func.func @transform_23(%arg0: i32) -> (i32, i32) {
    %c0_i32 = arith.constant 0 : i32
    %c0_i32_0 = arith.constant 0 : i32
    %c0_i32_1 = arith.constant 0 : i32
    return %c0_i32, %c0_i32_0 : i32, i32
  }
  func.func @transform_24(%arg0: i32) -> (i32, i32) {
    %c0_i32 = arith.constant 0 : i32
    %c0_i32_0 = arith.constant 0 : i32
    %c0_i32_1 = arith.constant 0 : i32
    return %c0_i32, %c0_i32_0 : i32, i32
  }
  func.func @transform_25(%arg0: i32) -> (i32, i32) {
    %c0_i32 = arith.constant 0 : i32
    %c0_i32_0 = arith.constant 0 : i32
    %c0_i32_1 = arith.constant 0 : i32
    return %c0_i32, %c0_i32_0 : i32, i32
  }
  func.func @transform_26(%arg0: i32) -> (i32, i32) {
    %c0_i32 = arith.constant 0 : i32
    %c0_i32_0 = arith.constant 0 : i32
    %c0_i32_1 = arith.constant 0 : i32
    return %c0_i32, %c0_i32_0 : i32, i32
  }
  func.func @transform_27(%arg0: i32) -> (i32, i32) {
    %c0_i32 = arith.constant 0 : i32
    %c0_i32_0 = arith.constant 0 : i32
    %c0_i32_1 = arith.constant 0 : i32
    return %c0_i32, %c0_i32_0 : i32, i32
  }
  func.func @transform_28(%arg0: i32) -> (i32, i32, i32) {
    %c0_i32 = arith.constant 0 : i32
    %c0_i32_0 = arith.constant 0 : i32
    %c0_i32_1 = arith.constant 0 : i32
    return %arg0, %c0_i32, %c0_i32_0 : i32, i32, i32
  }
}

module attributes {stable_mosaic.version = 11 : i64} {
  func.func @_loss_kernel(%arg0: i32, %arg1: memref<4x4x32xf32, #tpu.memory_space<vmem>>, %arg2: memref<4x4x8xf32, #tpu.memory_space<vmem>>, %arg3: memref<32x8xf32, #tpu.memory_space<vmem>>, %arg4: memref<4x32xf32, #tpu.memory_space<vmem>>, %arg5: memref<4x32xf32, #tpu.memory_space<vmem>>, %arg6: memref<1x32xf32, #tpu.memory_space<vmem>>, %arg7: memref<1x1xf32, #tpu.memory_space<vmem>>, %arg8: memref<1x1xf32, #tpu.memory_space<vmem>>) attributes {dimension_semantics = [#tpu.dimension_semantics<arbitrary>], iteration_bounds = array<i64: 1>, scalar_prefetch = 0 : i64, scratch_operands = 0 : i64, tpu.core_type = #tpu.core_type<tc>, window_params = [{pipeline_mode = #tpu.pipeline_mode<synchronous>, transform_indices = @transform_0, window_bounds = array<i64: 4, 4, 32>}, {pipeline_mode = #tpu.pipeline_mode<synchronous>, transform_indices = @transform_1, window_bounds = array<i64: 4, 4, 8>}, {pipeline_mode = #tpu.pipeline_mode<synchronous>, transform_indices = @transform_2, window_bounds = array<i64: 32, 8>}, {pipeline_mode = #tpu.pipeline_mode<synchronous>, transform_indices = @transform_3, window_bounds = array<i64: 4, 32>}, {pipeline_mode = #tpu.pipeline_mode<synchronous>, transform_indices = @transform_4, window_bounds = array<i64: 4, 32>}, {pipeline_mode = #tpu.pipeline_mode<synchronous>, transform_indices = @transform_5, window_bounds = array<i64: 1, 32>}, {pipeline_mode = #tpu.pipeline_mode<synchronous>, transform_indices = @transform_6, window_bounds = array<i64: 1, 1>}, {pipeline_mode = #tpu.pipeline_mode<synchronous>, transform_indices = @transform_7, window_bounds = array<i64: 1, 1>}]} {
    %c0 = arith.constant 0 : index
    %c0_0 = arith.constant 0 : index
    %c0_1 = arith.constant 0 : index
    %0 = vector.load %arg1[%c0, %c0_0, %c0_1] : memref<4x4x32xf32, #tpu.memory_space<vmem>>, vector<4x4x32xf32>
    %1 = vector.shape_cast %0 : vector<4x4x32xf32> to vector<16x32xf32>
    %c0_2 = arith.constant 0 : index
    %c0_3 = arith.constant 0 : index
    %2 = vector.load %arg3[%c0_2, %c0_3] : memref<32x8xf32, #tpu.memory_space<vmem>>, vector<32x8xf32>
    %cst = arith.constant dense<0.000000e+00> : vector<16x8xf32>
    %3 = tpu.matmul %1, %2, %cst {dimension_numbers = #tpu.dot_dimension_numbers<[1], [0], [0], [1], [0, 0, 1, 1], [], []>} : vector<16x32xf32>, vector<32x8xf32>, vector<16x8xf32> -> vector<16x8xf32>
    %4 = vector.shape_cast %3 : vector<16x8xf32> to vector<4x4x8xf32>
    %c0_4 = arith.constant 0 : index
    %c0_5 = arith.constant 0 : index
    %c0_6 = arith.constant 0 : index
    %5 = vector.load %arg2[%c0_4, %c0_5, %c0_6] : memref<4x4x8xf32, #tpu.memory_space<vmem>>, vector<4x4x8xf32>
    %cst_7 = arith.constant dense<0.000000e+00> : vector<4x4x4xf32>
    %6 = tpu.matmul %4, %5, %cst_7 {dimension_numbers = #tpu.dot_dimension_numbers<[2], [2], [1], [1], [0, 0, 0, 1, 1, 1], [0], [0]>} : vector<4x4x8xf32>, vector<4x4x8xf32>, vector<4x4x4xf32> -> vector<4x4x4xf32>
    %cst_8 = arith.constant dense<0xFF800000> : vector<4x4xf32>
    %7 = vector.multi_reduction <maximumf>, %6, %cst_8 [2] : vector<4x4x4xf32> to vector<4x4xf32>
    %8 = vector.shape_cast %7 : vector<4x4xf32> to vector<4x4x1xf32>
    %9 = vector.broadcast %8 : vector<4x4x1xf32> to vector<4x4x4xf32>
    %10 = arith.subf %6, %9 : vector<4x4x4xf32>
    %11 = math.exp %10 : vector<4x4x4xf32>
    %cst_9 = arith.constant dense<0.000000e+00> : vector<4x4xf32>
    %12 = vector.multi_reduction <add>, %11, %cst_9 [2] : vector<4x4x4xf32> to vector<4x4xf32>
    %13 = vector.shape_cast %12 : vector<4x4xf32> to vector<4x4x1xf32>
    %14 = math.log %13 : vector<4x4x1xf32>
    %15 = arith.addf %8, %14 : vector<4x4x1xf32>
    %16 = vector.broadcast %15 : vector<4x4x1xf32> to vector<4x4x4xf32>
    %17 = arith.subf %6, %16 : vector<4x4x4xf32>
    %18 = tpu.iota {dimensions = array<i32: 1>} : vector<4x4x4xi32>
    %19 = tpu.iota {dimensions = array<i32: 2>} : vector<4x4x4xi32>
    %20 = arith.cmpi eq, %18, %19 : vector<4x4x4xi32>
    %cst_10 = arith.constant 0.000000e+00 : f32
    %21 = vector.broadcast %cst_10 : f32 to vector<4x4x4xf32>
    %22 = arith.select %20, %17, %21 : vector<4x4x4xi1>, vector<4x4x4xf32>
    %23 = vector.shape_cast %22 : vector<4x4x4xf32> to vector<1x4x4x4xf32>
    %cst_11 = arith.constant dense<0.000000e+00> : vector<1xf32>
    %24 = vector.multi_reduction <add>, %23, %cst_11 [1, 2, 3] : vector<1x4x4x4xf32> to vector<1xf32>
    %25 = vector.shape_cast %24 : vector<1xf32> to vector<1x1x1x1xf32>
    %26 = vector.extract %25[0, 0, 0, 0] : f32 from vector<1x1x1x1xf32>
    %cst_12 = arith.constant 0.000000e+00 : f32
    %27 = arith.subf %cst_12, %26 : f32
    %cst_13 = arith.constant 1.600000e+01 : f32
    %28 = arith.divf %27, %cst_13 : f32
    %29 = vector.broadcast %28 : f32 to vector<1x1xf32>
    %c0_14 = arith.constant 0 : index
    %c0_15 = arith.constant 0 : index
    %30 = vector.load %arg7[%c0_14, %c0_15] : memref<1x1xf32, #tpu.memory_space<vmem>>, vector<1x1xf32>
    tpu.vector_store %arg7[%c0_14, %c0_15], %29 {strides = array<i32>} : memref<1x1xf32, #tpu.memory_space<vmem>>, vector<1x1xf32>,
    %c0_16 = arith.constant 0 : index
    %c0_17 = arith.constant 0 : index
    %31 = vector.load %arg6[%c0_16, %c0_17] : memref<1x32xf32, #tpu.memory_space<vmem>>, vector<1x32xf32>
    %c0_18 = arith.constant 0 : index
    %c0_19 = arith.constant 0 : index
    %32 = vector.load %arg4[%c0_18, %c0_19] : memref<4x32xf32, #tpu.memory_space<vmem>>, vector<4x32xf32>
    %33 = vector.broadcast %31 : vector<1x32xf32> to vector<4x32xf32>
    %34 = arith.mulf %32, %33 : vector<4x32xf32>
    %cst_20 = arith.constant dense<0.000000e+00> : vector<4xf32>
    %35 = vector.multi_reduction <add>, %34, %cst_20 [1] : vector<4x32xf32> to vector<4xf32>
    %36 = vector.shape_cast %35 : vector<4xf32> to vector<4x1xf32>
    %c0_21 = arith.constant 0 : index
    %c0_22 = arith.constant 0 : index
    %37 = vector.load %arg5[%c0_21, %c0_22] : memref<4x32xf32, #tpu.memory_space<vmem>>, vector<4x32xf32>
    %38 = vector.broadcast %31 : vector<1x32xf32> to vector<4x32xf32>
    %39 = arith.mulf %37, %38 : vector<4x32xf32>
    %cst_23 = arith.constant dense<0.000000e+00> : vector<4xf32>
    %40 = vector.multi_reduction <add>, %39, %cst_23 [1] : vector<4x32xf32> to vector<4xf32>
    %41 = vector.shape_cast %40 : vector<4xf32> to vector<4x1xf32>
    %cst_24 = arith.constant 0.000000e+00 : f32
    %42 = vector.broadcast %cst_24 : f32 to vector<4x1xf32>
    %43 = arith.minimumf %36, %42 : vector<4x1xf32>
    %44 = math.absf %36 : vector<4x1xf32>
    %cst_25 = arith.constant 0.000000e+00 : f32
    %45 = vector.broadcast %cst_25 : f32 to vector<4x1xf32>
    %46 = arith.subf %45, %44 : vector<4x1xf32>
    %47 = math.exp %46 : vector<4x1xf32>
    %cst_26 = arith.constant 1.000000e+00 : f32
    %48 = vector.broadcast %cst_26 : f32 to vector<4x1xf32>
    %49 = arith.addf %48, %47 : vector<4x1xf32>
    %50 = math.log %49 : vector<4x1xf32>
    %51 = arith.subf %43, %50 : vector<4x1xf32>
    %cst_27 = arith.constant 0.000000e+00 : f32
    %52 = vector.broadcast %cst_27 : f32 to vector<4x1xf32>
    %53 = arith.subf %52, %41 : vector<4x1xf32>
    %cst_28 = arith.constant 0.000000e+00 : f32
    %54 = vector.broadcast %cst_28 : f32 to vector<4x1xf32>
    %55 = arith.minimumf %53, %54 : vector<4x1xf32>
    %56 = math.absf %53 : vector<4x1xf32>
    %cst_29 = arith.constant 0.000000e+00 : f32
    %57 = vector.broadcast %cst_29 : f32 to vector<4x1xf32>
    %58 = arith.subf %57, %56 : vector<4x1xf32>
    %59 = math.exp %58 : vector<4x1xf32>
    %cst_30 = arith.constant 1.000000e+00 : f32
    %60 = vector.broadcast %cst_30 : f32 to vector<4x1xf32>
    %61 = arith.addf %60, %59 : vector<4x1xf32>
    %62 = math.log %61 : vector<4x1xf32>
    %63 = arith.subf %55, %62 : vector<4x1xf32>
    %64 = arith.addf %51, %63 : vector<4x1xf32>
    %65 = vector.shape_cast %64 : vector<4x1xf32> to vector<1x4x1xf32>
    %cst_31 = arith.constant dense<0.000000e+00> : vector<1xf32>
    %66 = vector.multi_reduction <add>, %65, %cst_31 [1, 2] : vector<1x4x1xf32> to vector<1xf32>
    %67 = vector.shape_cast %66 : vector<1xf32> to vector<1x1x1xf32>
    %68 = vector.extract %67[0, 0, 0] : f32 from vector<1x1x1xf32>
    %cst_32 = arith.constant 0.000000e+00 : f32
    %69 = arith.subf %cst_32, %68 : f32
    %cst_33 = arith.constant 4.000000e+00 : f32
    %70 = arith.divf %69, %cst_33 : f32
    %71 = vector.broadcast %70 : f32 to vector<1x1xf32>
    %c0_34 = arith.constant 0 : index
    %c0_35 = arith.constant 0 : index
    %72 = vector.load %arg8[%c0_34, %c0_35] : memref<1x1xf32, #tpu.memory_space<vmem>>, vector<1x1xf32>
    tpu.vector_store %arg8[%c0_34, %c0_35], %71 {strides = array<i32>} : memref<1x1xf32, #tpu.memory_space<vmem>>, vector<1x1xf32>,
    return
  }
  func.func @transform_0(%arg0: i32) -> (i32, i32, i32) {
    %c0_i32 = arith.constant 0 : i32
    %c0_i32_0 = arith.constant 0 : i32
    %c0_i32_1 = arith.constant 0 : i32
    %c0_i32_2 = arith.constant 0 : i32
    return %c0_i32, %c0_i32_0, %c0_i32_1 : i32, i32, i32
  }
  func.func @transform_1(%arg0: i32) -> (i32, i32, i32) {
    %c0_i32 = arith.constant 0 : i32
    %c0_i32_0 = arith.constant 0 : i32
    %c0_i32_1 = arith.constant 0 : i32
    %c0_i32_2 = arith.constant 0 : i32
    return %c0_i32, %c0_i32_0, %c0_i32_1 : i32, i32, i32
  }
  func.func @transform_2(%arg0: i32) -> (i32, i32) {
    %c0_i32 = arith.constant 0 : i32
    %c0_i32_0 = arith.constant 0 : i32
    %c0_i32_1 = arith.constant 0 : i32
    return %c0_i32, %c0_i32_0 : i32, i32
  }
  func.func @transform_3(%arg0: i32) -> (i32, i32) {
    %c0_i32 = arith.constant 0 : i32
    %c0_i32_0 = arith.constant 0 : i32
    %c0_i32_1 = arith.constant 0 : i32
    return %c0_i32, %c0_i32_0 : i32, i32
  }
  func.func @transform_4(%arg0: i32) -> (i32, i32) {
    %c0_i32 = arith.constant 0 : i32
    %c0_i32_0 = arith.constant 0 : i32
    %c0_i32_1 = arith.constant 0 : i32
    return %c0_i32, %c0_i32_0 : i32, i32
  }
  func.func @transform_5(%arg0: i32) -> (i32, i32) {
    %c0_i32 = arith.constant 0 : i32
    %c0_i32_0 = arith.constant 0 : i32
    %c0_i32_1 = arith.constant 0 : i32
    return %c0_i32, %c0_i32_0 : i32, i32
  }
  func.func @transform_6(%arg0: i32) -> (i32, i32) {
    %c0_i32 = arith.constant 0 : i32
    %c0_i32_0 = arith.constant 0 : i32
    %c0_i32_1 = arith.constant 0 : i32
    return %c0_i32, %c0_i32_0 : i32, i32
  }
  func.func @transform_7(%arg0: i32) -> (i32, i32) {
    %c0_i32 = arith.constant 0 : i32
    %c0_i32_0 = arith.constant 0 : i32
    %c0_i32_1 = arith.constant 0 : i32
    return %c0_i32, %c0_i32_0 : i32, i32
  }
}

</mosaic_0001>

<bundles_post_ra>
// kernel: tile.29
= control target key start
LH: loop header
LB: loop body
LE: loop exit
PB: predicated region body
PF: predicated region fallthrough
CT: control target
= control target key end

     0   :  { %vm3_vm0 = vcmask 261120   ;;  %s6_s6 = smov 3  ;;  %s22_s7 = smov 3  ;;  %s88_s0 = inlined_call_operand.vmem [shape: f32[4,9,32], index: 0, kind: input, shape index: {}]   ;;  %s89_s1 = inlined_call_operand.vmem [shape: f32[36,32], index: 1, kind: output, shape index: {}]  }
   0x1   :  { %v2_v0 = vld [vmem:[%s88_s0] sm:$0xff]   ;;  %v34_v2 = vld [vmem:[%s88_s0 + $0x11] sm:$0xff]  }
   0x2   :  { %v32_v1 = vld [vmem:[%s88_s0 + $0x8] ss:$8 sm:%s6_s6]   ;;  %4 = vst.msk [vmem:[%s89_s1] sm:$0xff] %vm3_vm0, %v2_v0   ;;  %35 = vst.msk [vmem:[%s89_s1 + $0xa] sm:$0xff] %vm3_vm0, %v34_v2  }
   0x3   :  { %33 = vst.msk [vmem:[%s89_s1 + $0x8] sm:$0x3] %vm3_vm0, %v32_v1   ;;  %v36_v3 = vld [vmem:[%s88_s0 + $0x20] sm:$0xff]   ;;  %v40_v5 = vld [vmem:[%s88_s0 + $0x31] sm:$0xff]  }
   0x4   :  { %v38_v4 = vld [vmem:[%s88_s0 + $0x28] ss:$8 sm:%s22_s7]   ;;  %37 = vst.msk [vmem:[%s89_s1 + $0x12] sm:$0xff] %vm3_vm0, %v36_v3   ;;  %41 = vst.msk [vmem:[%s89_s1 + $0x1c] sm:$0xff] %vm3_vm0, %v40_v5  }
   0x5   :  { %39 = vst.msk [vmem:[%s89_s1 + $0x1a] sm:$0x3] %vm3_vm0, %v38_v4  }

// kernel: tile.24
= control target key start
LH: loop header
LB: loop body
LE: loop exit
PB: predicated region body
PF: predicated region fallthrough
CT: control target
= control target key end

     0   :  { %vm3_vm0 = vcmask 97280   ;;  %s60_s0 = inlined_call_operand.vmem [shape: f32[2,2,1,6,12], index: 0, kind: input, shape index: {}]   ;;  %s61_s1 = inlined_call_operand.vmem [shape: f32[24,12], index: 1, kind: output, shape index: {}]  }
   0x1   :  { %v2_v0 = vld [vmem:[%s60_s0] sm:$0x3f]   ;;  %v20_v1 = vld [vmem:[%s60_s0 + $0x8] sm:$0x3f]   ;;  %v22_v2 = vld [vmem:[%s60_s0 + $0x10] sm:$0x3f]  }
   0x2   :  { %4 = vst.msk [vmem:[%s61_s1] sm:$0x3f] %vm3_vm0, %v2_v0   ;;  %21 = vst.msk [vmem:[%s61_s1 + $0x6] sm:$0x3f] %vm3_vm0, %v20_v1   ;;  %v24_v3 = vld [vmem:[%s60_s0 + $0x18] sm:$0x3f]  }
   0x3   :  { %23 = vst.msk [vmem:[%s61_s1 + $0xc] sm:$0x3f] %vm3_vm0, %v22_v2   ;;  %25 = vst.msk [vmem:[%s61_s1 + $0x12] sm:$0x3f] %vm3_vm0, %v24_v3  }

// kernel: _device_forward.3
= control target key start
LH: loop header
LB: loop body
LE: loop exit
PB: predicated region body
PF: predicated region fallthrough
CT: control target
= control target key end

     0   :  { %13 = vsyncpa [#allocation3], 0  ;;  %vm41_vm0 = vcmask 261120   ;;  %v744_v5 = vmov 0.0   ;;  %vm129_vm1 = vcmask 64512   ;;  %s919_s0 = inlined_call_operand.vmem [shape: f32[4,4,32], index: 0, kind: input, shape index: {}]   ;;  %s920_s1 = inlined_call_operand.vmem [shape: f32[4,4,8], index: 1, kind: input, shape index: {}]   ;;  %s921_s2 = inlined_call_operand.vmem [shape: f32[32,8], index: 2, kind: input, shape index: {}]   ;;  %s922_s3 = inlined_call_operand.vmem [shape: f32[4,32], index: 3, kind: input, shape index: {}]   ;;  %s923_s4 = inlined_call_operand.vmem [shape: f32[4,32], index: 4, kind: input, shape index: {}]   ;;  %s924_s5 = inlined_call_operand.vmem [shape: f32[1,32], index: 5, kind: input, shape index: {}]   ;;  %s925_s6 = inlined_call_operand.hbm [shape: f32[1,1], index: 6, kind: output, shape index: {0}]   ;;  %s926_s7 = inlined_call_operand.hbm [shape: f32[1,1], index: 7, kind: output, shape index: {1}]  }
   0x1   :  { %v31_v0 = vld [vmem:[%s921_s2] sm:$0xff]  ;;  %v32_v1 = vld [vmem:[%s921_s2 + $0x8] sm:$0xff]  ;;  %v33_v2 = vld [vmem:[%s921_s2 + $0x10] sm:$0xff]  ;;  %634 = vmatprep.subr.mxu1 %v744_v5 }
   0x2   :  { %v654_v3 = vpack.c.bf16 %v32_v1, %v31_v0  ;;  %v34_v4 = vld [vmem:[%s921_s2 + $0x18] sm:$0xff]  ;;  %v670_v7 = vld [vmem:[%s919_s0] sm:$0xff]  }
   0x3   :  { %v658_v6 = vpack.c.bf16 %v34_v4, %v33_v2  ;;  %v125_v8 = vld [vmem:[%s920_s1] sm:$0xf]  ;;  %631 = vmatprep.mubr.msk.f32.mxu0 %vm41_vm0, %v670_v7 }
   0x4   :  { %655 = vmatprep.subr.bf16.mxu0 %v654_v3 }
   0x5   :  { %657 = vmatpush3.bf16.msra.mxu0 %v654_v3 }
   0x6   :  { %14 = vsyncpa [#allocation5], 0  ;;  %659 = vmatprep.subr.bf16.mxu0 %v658_v6  ;;  %635 = vmatpush3.xpose.msk.msra.mxu1 %vm129_vm1, %v125_v8  ;;  %v671_v9 = vld [vmem:[%s919_s0 + $0x8] sm:$0xff]   ;;  %vm745_vm2 = vmmov 0   ;;  %v126_v12 = vld [vmem:[%s920_s1 + $0x4] sm:$0xf] }
   0x7   :  { %639 = vmatprep.subr.mxu1 %v744_v5  ;;  %v127_v10 = vld [vmem:[%s920_s1 + $0x8] sm:$0xf]  ;;  %636 = vmatprep.mubr.msk.f32.mxu1 %vm745_vm2, %v744_v5  ;;  %v128_v15 = vld [vmem:[%s920_s1 + $0xc] sm:$0xf]  ;;  %vm430_vm3 = vcmask 27648   ;;  %vm524_vm4 = vcmask 257024  }
   0x8   :  { %v608_v18 = vld [vmem:[%s924_s5] ss:$0 sm:$0xff]  ;;  %vm553_vm5 = vcmask 3072   ;;  %s747_s27 = smov [#allocation4]   ;;  %vm513_vm7 = vcmask 0  }
   0x9   :  { %661 = vmatpush3.bf16.msra.mxu0 %v658_v6  ;;  %v528_v22 = vld [vmem:[%s923_s4] sm:$0xf]  ;;  %s746_s4 = smov [#allocation2]   ;;  %s586_s28 = sshll.u32 %s747_s27, 4  ;;  %s885_s28 = int_to_ptr.vmem [resolvable:$true] %s586_s28 }
   0xa   :  { %644 = vmatprep.subr.mxu0 %v744_v5  ;;  %v529_v25 = vmul.f32 %v608_v18, %v528_v22  ;;  %v516_v27 = vld [vmem:[%s922_s3] sm:$0xf]  ;;  %s576_s23 = sshll.u32 %s746_s4, 4  ;;  %s577_s23 = int_to_ptr.vmem [resolvable:$true] %s576_s23 }
   0xb   :  { %v523_v31 = vmul.f32 %v608_v18, %v516_v27  ;;  %s696_s8 = scalar_lea.vmem %s577_s23, 16  ;;  %s700_s9 = scalar_lea.vmem %s577_s23, 32 }
   0xc   :  { %632 = vmatmul.mubr.msk.f32.vlgmr.msra.gmra.mrb[0].mxu0 %vm41_vm0, %v671_v9  ;;  %v530_v30 = vsel %vm524_vm4, %v529_v25, 0.0  ;;  %p697_p0 = scmp.ne.s32.totalorder %s577_s23, %s696_s8  ;;  %p701_p1 = scmp.lt.s32.totalorder %s577_s23, %s577_s23 }
   0xd   :  { %646 = vmatprep.mubr.msk.f32.mxu0 %vm745_vm2, %v744_v5  ;;  %v525_v35 = vsel %vm524_vm4, %v523_v31, 0.0  ;;  %p702_p2 = scmp.lt.s32.totalorder %s700_s9, %s696_s8 }
   0xf   :  { %p703_p3 = por %p702_p2, %p701_p1 }
  0x11   :  { %p704_p4 = pnand %p703_p3, %p697_p0 }
  0x12   :  { %645 = vmatpush3.xpose.msk.msra.mxu0 %vm129_vm1, %v127_v10 }
  0xdf   :  { %v633_v11 = vpop.f32.mrb[0].mxu0 }
  0xe0   :  { %v112_v13 = vpop.f32.mrb[1].mxu0  ;;  %647 = vmatmul.mubr.msk.f32.vlgmr.msra.gmra.mrb[2].mxu0 %vm129_vm1, %v633_v11  ;;  %v124_v16 = vcombine.high %v633_v11, %v633_v11 }
  0xe1   :  { %637 = vmatmul.mubr.msk.f32.vlgmr.msra.gmra.mrb[0].mxu1 %vm129_vm1, %v112_v13  ;;  %v123_v14 = vcombine.high %v112_v13, %v112_v13 }
  0xe2   :  { %640 = vmatpush3.xpose.msk.msra.mxu1 %vm129_vm1, %v126_v12  ;;  %641 = vmatprep.mubr.msk.f32.mxu1 %vm745_vm2, %v744_v5 }
  0xe3   :  { %649 = vmatprep.subr.mxu1 %v744_v5 }
  0xe5   :  { %642 = vmatmul.mubr.msk.f32.vlgmr.msra.gmra.mrb[2].mxu1 %vm129_vm1, %v123_v14 }
  0xe6   :  { %650 = vmatpush3.xpose.msk.msra.mxu1 %vm129_vm1, %v128_v15  ;;  %651 = vmatprep.mubr.msk.f32.mxu1 %vm745_vm2, %v744_v5 }
  0xe9   :  { %652 = vmatmul.mubr.msk.f32.vlgmr.msra.gmra.mrb[4].mxu1 %vm129_vm1, %v124_v16 }
 0x1b3   :  { %v828_v17 = vpop.f32.mrb[2].mxu0 }
 0x1b4   :  { %v833_v19 = vpop.f32.mrb[0].mxu1  ;;  %v648_v20 = vpop.f32.mrb[3].mxu0  ;;  %v437_v21 = vsel %vm430_vm3, %v828_v17, -inf }
 0x1b5   :  { %438 = vmax.xlane.f32.xlu1 %v437_v21  ;;  %v638_v23 = vpop.f32.mrb[1].mxu1  ;;  %v431_v24 = vsel %vm430_vm3, %v833_v19, -inf  ;;  %v483_v21 = vlaneseq }
 0x1b6   :  { %432 = vmax.xlane.f32.xlu0 %v431_v24 }
 0x1b7   :  { %v484_v25 = vshrl.u32 %v483_v21, 7  ;;  %v486_v27 = vand.u32 127, %v483_v21 }
 0x1b8   :  { %v842_v26 = vpop.f32.mrb[2].mxu1 }
 0x1b9   :  { %v643_v28 = vpop.f32.mrb[3].mxu1  ;;  %v434_v29 = vsel %vm430_vm3, %v842_v26, -inf  ;;  %vm487_vm6 = vcmp.eq.s32.totalorder %v484_v25, %v486_v27 }
 0x1ba   :  { %435 = vmax.xlane.f32.xlu0 %v434_v29 }
 0x1bc   :  { %v849_v32 = vpop.f32.mrb[4].mxu1 }
 0x1bd   :  { %v653_v33 = vpop.f32.mrb[5].mxu1  ;;  %v440_v34 = vsel %vm430_vm3, %v849_v32, -inf }
 0x1be   :  { %441 = vmax.xlane.f32.xlu1 %v440_v34  ;;  %531 = vadd.xlane.f32.xlu0 %v530_v30 }
 0x1c2   :  { %526 = vadd.xlane.f32.xlu1 %v525_v35 }
 0x242   :  { %v853_v36 = vpop.xlane.xlu1 %438 }
 0x243   :  { %v445_v37 = vsub.f32 %v828_v17, %v853_v36  ;;  %v857_v38 = vpop.xlane.xlu0 %432 }
 0x244   :  { %v443_v39 = vsub.f32 %v833_v19, %v857_v38 }
 0x245   :  { %v451_v40 = vmul.f32 1.442695, %v445_v37 }
 0x246   :  { %v447_v41 = vmul.f32 1.442695, %v443_v39 }
 0x247   :  { %v861_v42 = vpop.xlane.xlu0 %435 }
 0x248   :  { %672 = vpow2.f32 %v447_v41  ;;  %v444_v43 = vsub.f32 %v842_v26, %v861_v42 }
 0x249   :  { %674 = vpow2.f32 %v451_v40 }
 0x24a   :  { %v449_v44 = vmul.f32 1.442695, %v444_v43 }
 0x24b   :  { %v865_v45 = vpop.xlane.xlu1 %441  ;;  %v532_v46 = vpop.xlane.xlu0 %531 }
 0x24c   :  { %676 = vpow2.f32 %v449_v44  ;;  %v446_v47 = vsub.f32 %v849_v32, %v865_v45  ;;  %v542_v48 = vsub.f32 0.0, %v532_v46 }
 0x24e   :  { %v453_v49 = vmul.f32 1.442695, %v446_v47  ;;  %v544_v50 = vand.u32 2147483647, %v542_v48  ;;  %v543_v5 = vmin.f32 %v542_v48, 0.0 }
 0x24f   :  { %v527_v51 = vpop.xlane.xlu1 %526 }
 0x250   :  { %678 = vpow2.f32 %v453_v49  ;;  %v545_v52 = vsub.f32 0.0, %v544_v50  ;;  %v534_v53 = vand.u32 2147483647, %v527_v51  ;;  %v533_v7 = vmin.f32 %v527_v51, 0.0 }
 0x252   :  { %v673_v54 = vpop.eup %672  ;;  %v546_v55 = vmul.f32 1.442695, %v545_v52  ;;  %v535_v56 = vsub.f32 0.0, %v534_v53 }
 0x253   :  { %v455_v57 = vsel %vm430_vm3, %v673_v54, 0.0  ;;  %v675_v58 = vpop.eup %674 }
 0x254   :  { %456 = vadd.xlane.f32.xlu0 %v455_v57  ;;  %680 = vpow2.f32 %v546_v55  ;;  %v536_v59 = vmul.f32 1.442695, %v535_v56  ;;  %v461_v61 = vsel %vm430_vm3, %v675_v58, 0.0 }
 0x256   :  { %v677_v60 = vpop.eup %676  ;;  %682 = vpow2.f32 %v536_v59 }
 0x257   :  { %v458_v62 = vsel %vm430_vm3, %v677_v60, 0.0 }
 0x258   :  { %462 = vadd.xlane.f32.xlu0 %v461_v61  ;;  %459 = vadd.xlane.f32.xlu1 %v458_v62 }
 0x25a   :  { %v679_v63 = vpop.eup %678 }
 0x25b   :  { %v464_v0 = vsel %vm430_vm3, %v679_v63, 0.0 }
 0x25c   :  { %465 = vadd.xlane.f32.xlu1 %v464_v0 }
 0x25e   :  { %v681_v1 = vpop.eup %680 }
 0x25f   :  { %v548_v2 = vadd.f32 1.0, %v681_v1 }
 0x260   :  { %v683_v3 = vpop.eup %682 }
 0x261   :  { %684 = vlog2.f32 %v548_v2  ;;  %v538_v4 = vadd.f32 1.0, %v683_v3 }
 0x263   :  { %686 = vlog2.f32 %v538_v4 }
 0x26b   :  { %v685_v6 = vpop.eup %684 }
 0x26c   :  { %v550_v8 = vmul.f32 0.6931472, %v685_v6 }
 0x26d   :  { %v687_v9 = vpop.eup %686 }
 0x26e   :  { %v540_v10 = vmul.f32 0.6931472, %v687_v9  ;;  %v551_v11 = vsub.f32 %v543_v5, %v550_v8 }
 0x270   :  { %v541_v12 = vsub.f32 %v533_v7, %v540_v10 }
 0x272   :  { %v552_v13 = vadd.f32 %v551_v11, %v541_v12 }
 0x274   :  { %v554_v14 = vsel %vm553_vm5, %v552_v13, 0.0 }
 0x275   :  { %555 = vadd.xlane.f32.xlu1 %v554_v14 }
 0x2e1   :  { %v457_v15 = vpop.xlane.xlu0 %456 }
 0x2e2   :  { %688 = vlog2.f32 %v457_v15 }
 0x2e5   :  { %v463_v16 = vpop.xlane.xlu0 %462  ;;  %v460_v18 = vpop.xlane.xlu1 %459 }
 0x2e6   :  { %690 = vlog2.f32 %v463_v16 }
 0x2e7   :  { %692 = vlog2.f32 %v460_v18 }
 0x2e9   :  { %v466_v20 = vpop.xlane.xlu1 %465 }
 0x2ea   :  { %694 = vlog2.f32 %v466_v20 }
 0x2ec   :  { %v689_v22 = vpop.eup %688 }
 0x2ed   :  { %v468_v23 = vmul.f32 0.6931472, %v689_v22 }
 0x2ef   :  { %v475_v24 = vadd.f32 %v468_v23, %v857_v38 }
 0x2f0   :  { %v691_v28 = vpop.eup %690 }
 0x2f1   :  { %v693_v29 = vpop.eup %692  ;;  %v472_v30 = vmul.f32 0.6931472, %v691_v28  ;;  %v479_v31 = vsub.f32 %v833_v19, %v475_v24 }
 0x2f2   :  { %v470_v33 = vmul.f32 0.6931472, %v693_v29 }
 0x2f3   :  { %v477_v34 = vadd.f32 %v472_v30, %v853_v36  ;;  %v488_v38 = vsel %vm487_vm6, %v479_v31, 0.0 }
 0x2f4   :  { %v695_v35 = vpop.eup %694  ;;  %v476_v37 = vadd.f32 %v470_v33, %v861_v42  ;;  %v492_v19 = vsel %vm430_vm3, %v488_v38, 0.0 }
 0x2f5   :  { %v481_v39 = vsub.f32 %v828_v17, %v477_v34  ;;  %v474_v40 = vmul.f32 0.6931472, %v695_v35 }
 0x2f6   :  { %v480_v41 = vsub.f32 %v842_v26, %v476_v37 }
 0x2f7   :  { %v478_v43 = vadd.f32 %v474_v40, %v865_v45  ;;  %v490_v46 = vsel %vm487_vm6, %v481_v39, 0.0 }
 0x2f8   :  { %v489_v44 = vsel %vm487_vm6, %v480_v41, 0.0  ;;  %v495_v42 = vsel %vm430_vm3, %v490_v46, 0.0 }
 0x2f9   :  { %v482_v47 = vsub.f32 %v849_v32, %v478_v43  ;;  %v493_v36 = vsel %vm430_vm3, %v489_v44, 0.0 }
 0x2fa   :  { %v494_v48 = vadd.f32 %v493_v36, %v492_v19 }
 0x2fb   :  { %v491_v49 = vsel %vm487_vm6, %v482_v47, 0.0 }
 0x2fc   :  { %v496_v50 = vadd.f32 %v495_v42, %v494_v48  ;;  %v497_v17 = vsel %vm430_vm3, %v491_v49, 0.0 }
 0x2fe   :  { %v498_v51 = vadd.f32 %v497_v17, %v496_v50 }
 0x300   :  { %499 = vadd.xlane.f32.xlu0 %v498_v51 }
 0x302   :  { %v556_v26 = vpop.xlane.xlu1 %555 }
 0x303   :  { %v557_v52 = vrot.slane %v556_v26, 4 }
 0x305   :  { %v558_v45 = vadd.f32 %v557_v52, %v556_v26 }
 0x307   :  { %v559_v53 = vrot.slane %v558_v45, 2 }
 0x309   :  { %v560_v56 = vadd.f32 %v559_v53, %v558_v45 }
 0x30b   :  { %v561_v59 = vrot.slane %v560_v56, 1 }
 0x30d   :  { %v562_v62 = vadd.f32 %v561_v59, %v560_v56 }
 0x38d   :  { %v500_v54 = vpop.xlane.xlu0 %499 }
 0x38e   :  { %v501_v55 = vrot.slane %v500_v54, 4 }
 0x390   :  { %v502_v32 = vadd.f32 %v501_v55, %v500_v54 }
 0x392   :  { %v503_v57 = vrot.slane %v502_v32, 2 }
 0x394   :  { %v504_v58 = vadd.f32 %v503_v57, %v502_v32 }
 0x396   :  { %v505_v60 = vrot.slane %v504_v58, 1 }
 0x398   :  { %v506_v61 = vadd.f32 %v505_v60, %v504_v58 }
 0x39a   :  { %662 = vpush %v506_v61 }
 0x39b   :  { %664 = vpush %v562_v62 }
 0x3cb   :  { %s663_s3 = spop %662 }
 0x3cc   :  { %s508_s24 = ssub.f32 0.0, %s663_s3  ;;  %s665_s25 = spop %664 }
 0x3cd   :  { %s564_s26 = ssub.f32 0.0, %s665_s25 }
 0x3ce   :  { %s511_s29 = smul.f32 0.0625, %s508_s24 }
 0x3cf   :  { %s567_s30 = smul.f32 0.25, %s564_s26 }
 0x3d0   :  { %v512_v63 = vstv %s511_s29 }
 0x3d1   :  { %v568_v0 = vstv %s567_s30  ;;  %514 = vst.msk [vmem:[#allocation2] sm:$0x1] %vm513_vm7, %v512_v63 }
 0x3d2   :  { %707 = shalt.err (!%p704_p4)
}
 0x3d3   :  { %s708_s12 = scalar_lea.hbm %s925_s6, 16 }
 0x3d4   :  { %p709_p5 = scmp.ne.s32.totalorder %s925_s6, %s708_s12  ;;  %p712_p6 = scmp.lt.u32.totalorder %s708_s12, %s925_s6 }
 0x3d6   :  { %p714_p7 = pnand %p712_p6, %p709_p5 }
 0x3d8   :  { %717 = shalt.err (!%p714_p7)
}
 0x3d9   :  { %579 = dma.vmem_to_hbm [thread:$0]  %s577_s23, 16, %s925_s6, [#allocation3]   ;;  %569 = vst.msk [vmem:[#allocation4] sm:$0x1] %vm513_vm7, %v568_v0 }
 0x3da   :  { %s718_s0 = scalar_lea.vmem %s885_s28, 16  ;;  %s722_s18 = scalar_lea.vmem %s885_s28, 32 }
 0x3db   :  { %p719_p8 = scmp.ne.s32.totalorder %s885_s28, %s718_s0  ;;  %p723_p9 = scmp.lt.s32.totalorder %s885_s28, %s885_s28 }
 0x3dc   :  { %p724_p10 = scmp.lt.s32.totalorder %s722_s18, %s718_s0 }
 0x3de   :  { %p725_p11 = por %p724_p10, %p723_p9 }
 0x3e0   :  { %p726_p12 = pnand %p725_p11, %p719_p8 }
 0x3e2   :  { %729 = shalt.err (!%p726_p12)
}
 0x3e3   :  { %s730_s1 = scalar_lea.hbm %s926_s7, 16 }
 0x3e4   :  { %p731_p13 = scmp.ne.s32.totalorder %s926_s7, %s730_s1  ;;  %p734_p0 = scmp.lt.u32.totalorder %s730_s1, %s926_s7 }
 0x3e6   :  { %p736_p1 = pnand %p734_p0, %p731_p13 }
 0x3e8   :  { %739 = shalt.err (!%p736_p1)
}
 0x3e9   :  { %589 = dma.vmem_to_hbm [thread:$0]  %s885_s28, 16, %s926_s7, [#allocation5]  }
 0x3ea   :  { %740 = dma.done.wait [#allocation3], 16  }
 0x3eb   :  { %741 = vsyncadd [#allocation3], 4294967280 }
 0x3ec   :  { %742 = dma.done.wait [#allocation5], 16  }
 0x3ed   :  { %743 = vsyncadd [#allocation5], 4294967280 }
 0x3ee   :  { %596 = vsyncpa [#allocation3], 1 }
 0x3ef   :  { %597 = vsyncpa [#allocation5], 1 }

// kernel: _device_forward.2
= control target key start
LH: loop header
LB: loop body
LE: loop exit
PB: predicated region body
PF: predicated region fallthrough
CT: control target
= control target key end

     0   :  { %s5765_s0 = inlined_call_operand.vmem [shape: f32[2,36,8], index: 0, kind: input, shape index: {}]   ;;  %s5766_s1 = inlined_call_operand.vmem [shape: f32[36,1], index: 1, kind: input, shape index: {}]   ;;  %s5767_s2 = inlined_call_operand.vmem [shape: f32[36,1], index: 2, kind: input, shape index: {}]   ;;  %s5768_s3 = inlined_call_operand.vmem [shape: f32[36,36], index: 3, kind: input, shape index: {}]   ;;  %s5769_s4 = inlined_call_operand.vmem [shape: f32[36,24], index: 4, kind: input, shape index: {}]   ;;  %s5770_s5 = inlined_call_operand.vmem [shape: f32[24,12], index: 5, kind: input, shape index: {}]   ;;  %s5771_s6 = inlined_call_operand.vmem [shape: f32[8,32], index: 6, kind: input, shape index: {}]   ;;  %s5772_s7 = inlined_call_operand.vmem [shape: f32[12,32], index: 7, kind: input, shape index: {}]   ;;  %s5773_s8 = inlined_call_operand.vmem [shape: f32[2,32], index: 8, kind: input, shape index: {}]   ;;  %s5774_s9 = inlined_call_operand.vmem [shape: f32[36,32], index: 9, kind: input, shape index: {}]   ;;  %s5775_s10 = inlined_call_operand.vmem [shape: f32[2,32], index: 10, kind: input, shape index: {}]   ;;  %s5776_s11 = inlined_call_operand.vmem [shape: f32[32,96], index: 11, kind: input, shape index: {}]   ;;  %s5777_s12 = inlined_call_operand.vmem [shape: f32[1,96], index: 12, kind: input, shape index: {}]   ;;  %s5778_s13 = inlined_call_operand.vmem [shape: f32[32,32], index: 13, kind: input, shape index: {}]   ;;  %s5779_s14 = inlined_call_operand.vmem [shape: f32[1,32], index: 14, kind: input, shape index: {}]   ;;  %s5780_s15 = inlined_call_operand.vmem [shape: f32[2,32], index: 15, kind: input, shape index: {}]   ;;  %s5781_s16 = inlined_call_operand.vmem [shape: f32[32,32], index: 16, kind: input, shape index: {}]   ;;  %s5782_s17 = inlined_call_operand.vmem [shape: f32[1,32], index: 17, kind: input, shape index: {}]   ;;  %s5783_s18 = inlined_call_operand.vmem [shape: f32[32,64], index: 18, kind: input, shape index: {}]   ;;  %s5784_s19 = inlined_call_operand.vmem [shape: f32[1,64], index: 19, kind: input, shape index: {}]   ;;  %s5785_s20 = inlined_call_operand.vmem [shape: f32[32,32], index: 20, kind: input, shape index: {}]   ;;  %s5786_s21 = inlined_call_operand.vmem [shape: f32[1,32], index: 21, kind: input, shape index: {}]   ;;  %s5787_s22 = inlined_call_operand.vmem [shape: f32[2,32], index: 22, kind: input, shape index: {}]   ;;  %s5788_s23 = inlined_call_operand.vmem [shape: f32[32,64], index: 23, kind: input, shape index: {}]   ;;  %s5789_s24 = inlined_call_operand.vmem [shape: f32[1,64], index: 24, kind: input, shape index: {}]   ;;  %s5790_s25 = inlined_call_operand.vmem [shape: f32[64,32], index: 25, kind: input, shape index: {}]   ;;  %s5791_s26 = inlined_call_operand.vmem [shape: f32[1,32], index: 26, kind: input, shape index: {}]   ;;  %s5792_s27 = inlined_call_operand.vmem [shape: f32[2,32], index: 27, kind: input, shape index: {}]   ;;  %s5793_s28 = inlined_call_operand.vmem [shape: f32[2,36,32], index: 28, kind: output, shape index: {}]  }
   0x1   :  { %5818 = sst [smem:[#allocation2_spill]] %s5765_s0 }
   0x2   :  { %5819 = sst [smem:[#allocation3_spill]] %s5766_s1 }
   0x3   :  { %5820 = sst [smem:[#allocation4_spill]] %s5767_s2 }
   0x4   :  { %5821 = sst [smem:[#allocation5_spill]] %s5768_s3 }
   0x5   :  { %5822 = sst [smem:[#allocation6_spill]] %s5769_s4 }
   0x6   :  { %5823 = sst [smem:[#allocation7_spill]] %s5770_s5 }
   0x7   :  { %5824 = sst [smem:[#allocation8_spill]] %s5771_s6 }
   0x8   :  { %5825 = sst [smem:[#allocation9_spill]] %s5772_s7 }
   0x9   :  { %5826 = sst [smem:[#allocation10_spill]] %s5773_s8  ;;  %s4807_s8 = smov 0  }
   0xa   :  { %5827 = sst [smem:[#allocation11_spill]] %s5774_s9 }
   0xb   :  { %5828 = sst [smem:[#allocation12_spill]] %s5775_s10 }
   0xc   :  { %5829 = sst [smem:[#allocation13_spill]] %s5776_s11 }
   0xd   :  { %5830 = sst [smem:[#allocation14_spill]] %s5777_s12 }
   0xe LB: > { %s3687_s5 = sadd.s32 4294967295, %s4649_s8   ;;  %p3691_p0 = scmp.ge.s32.totalorder %s4649_s8, 1  ;;  %s4649_s8 = sphi %s4807_s8, %s38_s8  }
   0xf   : > { %p762_p1 = scmp.lt.s32.totalorder %s4649_s8, 3 }
  0x11   : > { %p763_p2 = pnand %p3691_p0, %p762_p1 }
  0x12   : > { %s5831_s3 = sld [smem:[#allocation8_spill]] (!%p763_p2)  ;;  %p836_p3 = scmp.lt.s32.totalorder (!%p763_p2), %s3687_s5, 1  ;;  %v4651_v1 = vmov (!%p763_p2), 0.0   ;;  %vm4652_vm0 = vmmov (!%p763_p2), 0   ;;  %v4653_v5 = vmov (!%p763_p2), 0   ;;  %vm852_vm5 = vcmask (!%p763_p2), 64512  }
  0x13   : > { %766 = sbr.rel (%p763_p2) target bundleno = 4899 (0x1323), region = 132  ;;  %3961 = vmatprep.subr.mxu0 (!%p763_p2), %v4651_v1  ;;  %3963 = vmatprep.mubr.msk.f32.mxu0 (!%p763_p2), %vm4652_vm0, %v4651_v1  ;;  %s5832_s0 = sld [smem:[#allocation3_spill]] (!%p763_p2)  ;;  %vm1058_vm14 = vcmask (!%p763_p2), 261120  }
  0x14   : > { %s5833_s12 = sld [smem:[#allocation4_spill]] (!%p763_p2)  ;;  %4456 = vset.pattern.permute.xlu0 (!%p763_p2), %v4653_v5  ;;  %4457 = vset.pattern.permute.xlu1 (!%p763_p2), %v4653_v5  ;;  %s5834_s2 = sld [smem:[#allocation2_spill]] (!%p763_p2) }
  0x15   : > { %3986 = vmatprep.mubr.msk.f32.mxu1 (!%p763_p2), %vm4652_vm0, %v4651_v1  ;;  %s5835_s4 = sld [smem:[#allocation10_spill]] (!%p763_p2)  ;;  %s5836_s10 = sld [smem:[#allocation11_spill]] (!%p763_p2) }
  0x16   : > { %s5838_s9 = sld [smem:[#allocation12_spill]] (!%p763_p2)  ;;  %s5839_s29 = sld [smem:[#allocation14_spill]] (!%p763_p2) }
  0x17   : > { %s5807_s1 = smov (!%p763_p2), 96   ;;  %s5805_s30 = smov (!%p763_p2), 80  }
  0x18   : > { %v851_v0 = vld [vmem:[%s5831_s3] sm:$0xff] (!%p763_p2)  ;;  %s5847_s11 = smov (!%p763_p2), 96  }
  0x19   : > { %v958_v2 = vld [vmem:[%s5832_s0] sm:$0xff] (!%p763_p2)  ;;  %v959_v3 = vld [vmem:[%s5832_s0 + $0x8] sm:$0xff] (!%p763_p2)  ;;  %3962 = vmatpush3.msra.mxu0 (!%p763_p2), %v851_v0  ;;  %v960_v9 = vld [vmem:[%s5832_s0 + $0x10] sm:$0xff] (!%p763_p2) }
  0x1a   : > { %v1003_v4 = vld [vmem:[%s5833_s12] sm:$0xff]  ;;  %s5852_s5 = smov (!%p836_p3, %s3687_s5), 1  ;;  %vm963_vm1 = vcmp.gt.f32.partialorder %v958_v2, 0.5  ;;  %vm964_vm2 = vcmp.gt.f32.partialorder %v959_v3, 0.5  ;;  %v1004_v6 = vld [vmem:[%s5833_s12 + $0x8] sm:$0xff]  ;;  %v1005_v10 = vld [vmem:[%s5833_s12 + $0x10] sm:$0xff] }
  0x1b   : > { %vm1008_vm3 = vcmp.gt.f32.partialorder %v1003_v4, 0.5  ;;  %v969_v7 = vsel %vm963_vm1, 1, %v4653_v5  ;;  %v970_v8 = vsel %vm964_vm2, 1, %v4653_v5  ;;  %vm1009_vm4 = vcmp.gt.f32.partialorder %v1004_v6, 0.5  ;;  %s5804_s3 = smul.u32 40, %s5852_s5  ;;  %v961_v14 = vld [vmem:[%s5832_s0 + $0x18] sm:$0xff] }
  0x1c   : > { %975 = vperm.xlu0 %4456, %v969_v7   ;;  %978 = vperm.xlu1 %4457, %v970_v8   ;;  %v1014_v11 = vsel %vm1008_vm3, 1, %v4653_v5  ;;  %v1015_v12 = vsel %vm1009_vm4, 1, %v4653_v5  ;;  %vm965_vm6 = vcmp.gt.f32.partialorder %v960_v9, 0.5  ;;  %vm1010_vm7 = vcmp.gt.f32.partialorder %v1005_v10, 0.5  ;;  %v1006_v15 = vld [vmem:[%s5833_s12 + $0x18] sm:$0xff]  ;;  %v1048_v35 = vld [vmem:[%s5836_s10] sm:$0xff] }
  0x1d   : > { %s4849_s7 = scalar_lea.vmem %s5834_s2, %s5804_s3  ;;  %v971_v17 = vsel %vm965_vm6, 1, %v4653_v5  ;;  %v1016_v18 = vsel %vm1010_vm7, 1, %v4653_v5  ;;  %vm966_vm8 = vcmp.gt.f32.partialorder %v961_v14, 0.5  ;;  %vm1011_vm9 = vcmp.gt.f32.partialorder %v1006_v15, 0.5  ;;  %v962_v19 = vld [vmem:[%s5832_s0 + $0x20] sm:$0xf] }
  0x1e   : > { %v846_v13 = vld [vmem:[%s4849_s7] sm:$0xff]  ;;  %v847_v16 = vld [vmem:[%s4849_s7 + $0x8] sm:$0xff]  ;;  %v848_v21 = vld [vmem:[%s4849_s7 + $0x10] sm:$0xff]  ;;  %v972_v22 = vsel %vm966_vm8, 1, %v4653_v5  ;;  %v1017_v23 = vsel %vm1011_vm9, 1, %v4653_v5  ;;  %vm967_vm10 = vcmp.gt.f32.partialorder %v962_v19, 0.5 }
  0x1f   : > { %3964 = vmatmul.mubr.msk.f32.vlgmr.msra.gmra.mrb[0].mxu0 %vm852_vm5, %v846_v13  ;;  %v1007_v20 = vld [vmem:[%s5833_s12 + $0x20] sm:$0xf]  ;;  %v849_v24 = vld [vmem:[%s4849_s7 + $0x18] sm:$0xff]  ;;  %v973_v25 = vsel %vm967_vm10, 1, %v4653_v5  ;;  %v1049_v43 = vld [vmem:[%s5836_s10 + $0x8] sm:$0xff]  ;;  %vm1071_vm8 = vcmask 257024  }
  0x20   : > { %1020 = vperm.xlu0 %4456, %v1014_v11   ;;  %3966 = vmatprep.mubr.msk.f32.mxu0 %vm4652_vm0, %v4651_v1  ;;  %vm1012_vm11 = vcmp.gt.f32.partialorder %v1007_v20, 0.5  ;;  %v850_v27 = vld [vmem:[%s4849_s7 + $0x20] sm:$0xf]  ;;  %v1050_v52 = vld [vmem:[%s5836_s10 + $0x10] sm:$0xff]  ;;  %v1051_v59 = vld [vmem:[%s5836_s10 + $0x18] sm:$0xff]  ;;  %s5837_s2 = sld [smem:[#allocation13_spill]] }
  0x21   : > { %1023 = vperm.xlu1 %4457, %v1015_v12   ;;  %v1018_v26 = vsel %vm1012_vm11, 1, %v4653_v5  ;;  %v3699_v32 = vld [vmem:[%s5835_s4] ss:$0 sm:$0xff]  ;;  %v3700_v33 = vld [vmem:[%s5835_s4 + $0x1] ss:$0 sm:$0xff]  ;;  %s5809_s7 = smov 112  }
  0x22   : > { %v1052_v5 = vld [vmem:[%s5836_s10 + $0x20] sm:$0xf]  ;;  %vm1282_vm9 = vcmask 130048   ;;  %vm1403_vm11 = vcmask 293888   ;;  %s4658_s3 = smov 64   ;;  %s5813_s0 = smov 16  }
  0x23   : > { %3967 = vmatmul.mubr.msk.f32.gmra.mrb[2].mxu0 %vm852_vm5, %v847_v16  ;;  %vm5015_vm10 = vmpackc.low %vm1282_vm9, %vm1282_vm9 }
  0x24   : > { %981 = vperm.xlu0 %4456, %v971_v17   ;;  %3969 = vmatprep.mubr.msk.f32.mxu0 %vm4652_vm0, %v4651_v1 }
  0x25   : > { %1026 = vperm.xlu1 %4457, %v1016_v18  }
  0x27   : > { %3970 = vmatmul.mubr.msk.f32.gmra.mrb[4].mxu0 %vm852_vm5, %v848_v21 }
  0x28   : > { %984 = vperm.xlu0 %4456, %v972_v22   ;;  %3972 = vmatprep.mubr.msk.f32.mxu0 %vm4652_vm0, %v4651_v1 }
  0x29   : > { %1029 = vperm.xlu1 %4457, %v1017_v23  }
  0x2b   : > { %3973 = vmatmul.mubr.msk.f32.gmra.mrb[6].mxu0 %vm852_vm5, %v849_v24 }
  0x2c   : > { %987 = vperm.xlu0 %4456, %v973_v25   ;;  %3975 = vmatprep.mubr.msk.f32.mxu0 %vm4652_vm0, %v4651_v1 }
  0x2d   : > { %1032 = vperm.xlu1 %4457, %v1018_v26  }
  0x2f   : > { %3976 = vmatmul.mubr.msk.f32.gmra.mrb[8].mxu0 %vm852_vm5, %v850_v27 }
  0x30   : > { %4011 = vmatprep.mubr.msk.f32.mxu0 %vm4652_vm0, %v4651_v1 }
  0x9b   : > { %v976_v28 = vpop.permute.xlu0 %975  ;;  %v979_v29 = vpop.permute.xlu1 %978 }
  0x9c   : > { %vm989_vm12 = vcmp.eq.s32.totalorder %v976_v28, 1  ;;  %vm990_vm15 = vcmp.eq.s32.totalorder %v979_v29, 1 }
  0x9f   : > { %v1021_v30 = vpop.permute.xlu0 %1020 }
  0xa0   : > { %v1024_v31 = vpop.permute.xlu1 %1023  ;;  %vm1034_vm13 = vcmp.eq.s32.totalorder %v1021_v30, 1 }
  0xa1   : > { %vm1035_vm1 = vcmp.eq.s32.totalorder %v1024_v31, 1 }
  0xa3   : > { %v982_v36 = vpop.permute.xlu0 %981 }
  0xa4   : > { %v1027_v39 = vpop.permute.xlu1 %1026  ;;  %vm991_vm2 = vcmp.eq.s32.totalorder %v982_v36, 1 }
  0xa5   : > { %vm1036_vm3 = vcmp.eq.s32.totalorder %v1027_v39, 1 }
  0xa7   : > { %v985_v48 = vpop.permute.xlu0 %984 }
  0xa8   : > { %v1030_v50 = vpop.permute.xlu1 %1029  ;;  %vm992_vm4 = vcmp.eq.s32.totalorder %v985_v48, 1 }
  0xa9   : > { %vm1037_vm5 = vcmp.eq.s32.totalorder %v1030_v50, 1 }
  0xab   : > { %v988_v60 = vpop.permute.xlu0 %987 }
  0xac   : > { %v1033_v0 = vpop.permute.xlu1 %1032  ;;  %vm993_vm6 = vcmp.eq.s32.totalorder %v988_v60, 1 }
  0xad   : > { %vm1038_vm7 = vcmp.eq.s32.totalorder %v1033_v0, 1 }
  0xf2   : > { %v934_v34 = vpop.f32.mrb[0].mxu0 }
  0xf3   : > { %v998_v37 = vsel %vm989_vm12, %v3699_v32, %v934_v34  ;;  %v3965_v38 = vpop.f32.mrb[1].mxu0  ;;  %vm1416_vm12 = vcmask 289792  }
  0xf4   : > { %v1043_v40 = vsel %vm1034_vm13, %v3700_v33, %v998_v37  ;;  %v1146_v37 = vld [vmem:[%s5837_s2] sm:$0xff]  ;;  %v1147_v38 = vld [vmem:[%s5837_s2 + $0x8] sm:$0xff]  ;;  %vm1489_vm13 = vcmask 1043456  }
  0xf5   : > { %v1053_v41 = vadd.f32 %v1048_v35, %v1043_v40  ;;  %v4339_v39 = vpack.c.bf16 %v1147_v38, %v1146_v37  ;;  %v4654_v40 = vmov 0.0|0.0  }
  0xf6   : > { %v939_v42 = vpop.f32.mrb[2].mxu0  ;;  %4338 = vmatprep.subr.bf16.mxu1 %v4654_v40  ;;  %4344 = vmatprep.subr.bf16.mxu0 %v4654_v40 }
  0xf7   : > { %v999_v44 = vsel %vm990_vm15, %v3699_v32, %v939_v42  ;;  %v3968_v45 = vpop.f32.mrb[3].mxu0  ;;  %v1059_v46 = vsel %vm1058_vm14, %v1053_v41, 0.0  ;;  %4340 = vmatpush3.bf16.msra.mxu1 %v4339_v39  ;;  %v1149_v42 = vld [vmem:[%s5837_s2 + $0x18] sm:$0xff]  ;;  %vm4661_vm15 = vmmov 1  }
  0xf8   : > { %1060 = vadd.xlane.f32.xlu0 %v1059_v46  ;;  %v1044_v47 = vsel %vm1035_vm1, %v3700_v33, %v999_v44  ;;  %4341 = vmatprep.subr.bf16.mxu1 %v4654_v40  ;;  %vm4380_vm1 = vmpackc.low %vm1489_vm13, %vm4661_vm15 }
  0xf9   : > { %v1054_v49 = vadd.f32 %v1049_v43, %v1044_v47 }
  0xfa   : > { %v944_v51 = vpop.f32.mrb[4].mxu0 }
  0xfb   : > { %v1000_v53 = vsel %vm991_vm2, %v3699_v32, %v944_v51  ;;  %v3971_v54 = vpop.f32.mrb[5].mxu0  ;;  %v1062_v55 = vsel %vm1058_vm14, %v1054_v49, 0.0  ;;  %vm2134_vm2 = vcmask 97280  }
  0xfc   : > { %1063 = vadd.xlane.f32.xlu1 %v1062_v55  ;;  %v1045_v56 = vsel %vm1036_vm3, %v3700_v33, %v1000_v53  ;;  %vm2572_vm3 = vcmask 195584  }
  0xfd   : > { %v1055_v57 = vadd.f32 %v1050_v52, %v1045_v56 }
  0xfe   : > { %v949_v58 = vpop.f32.mrb[6].mxu0 }
  0xff   : > { %v1001_v61 = vsel %vm992_vm4, %v3699_v32, %v949_v58  ;;  %v3974_v62 = vpop.f32.mrb[7].mxu0  ;;  %v1065_v63 = vsel %vm1058_vm14, %v1055_v57, 0.0  ;;  %vm2585_vm4 = vcmask 191488  }
 0x100   : > { %1066 = vadd.xlane.f32.xlu0 %v1065_v63  ;;  %v1046_v2 = vsel %vm1037_vm5, %v3700_v33, %v1001_v61  ;;  %v3702_v61 = vld [vmem:[%s5838_s9 + $0x1] ss:$0 sm:$0xff]  ;;  %vm3431_vm5 = vcmask 523264  }
 0x101   : > { %v1056_v3 = vadd.f32 %v1051_v59, %v1046_v2 }
 0x102   : > { %v954_v4 = vpop.f32.mrb[8].mxu0 }
 0x103   : > { %v1002_v6 = vsel %vm993_vm6, %v3699_v32, %v954_v4  ;;  %v1068_v7 = vsel %vm1058_vm14, %v1056_v3, 0.0  ;;  %v3977_v8 = vpop.f32.mrb[9].mxu0 }
 0x104   : > { %1069 = vadd.xlane.f32.xlu0 %v1068_v7  ;;  %v1047_v9 = vsel %vm1038_vm7, %v3700_v33, %v1002_v6 }
 0x105   : > { %v1057_v10 = vadd.f32 %v1052_v5, %v1047_v9 }
 0x107   : > { %v1072_v11 = vsel %vm1071_vm8, %v1057_v10, 0.0 }
 0x108   : > { %1073 = vadd.xlane.f32.xlu1 %v1072_v11 }
 0x185   : > { %v1061_v12 = vpop.xlane.xlu0 %1060 }
 0x186   : > { %v1076_v13 = vmul.f32 0.03125, %v1061_v12 }
 0x188   : > { %v1081_v14 = vsub.f32 %v1053_v41, %v1076_v13  ;;  %v1148_v41 = vld [vmem:[%s5837_s2 + $0x10] sm:$0xff] }
 0x189   : > { %v1064_v15 = vpop.xlane.xlu1 %1063  ;;  %v4342_v43 = vpack.c.bf16 %v1149_v42, %v1148_v41 }
 0x18a   : > { %v1077_v16 = vmul.f32 0.03125, %v1064_v15  ;;  %v1086_v17 = vmul.f32 %v1081_v14, %v1081_v14 }
 0x18b   : > { %4343 = vmatpush3.bf16.msra.mxu1 %v4342_v43 }
 0x18c   : > { %v4909_v18 = vsub.f32 %v1054_v49, %v1077_v16  ;;  %v1091_v19 = vsel %vm1058_vm14, %v1086_v17, 0.0  ;;  %4352 = vmatprep.subr.bf16.mxu1 %v4654_v40 }
 0x18d   : > { %v1067_v20 = vpop.xlane.xlu0 %1066  ;;  %1092 = vadd.xlane.f32.xlu0 %v1091_v19 }
 0x18e   : > { %v1078_v21 = vmul.f32 0.03125, %v1067_v20  ;;  %v1087_v22 = vmul.f32 %v4909_v18, %v4909_v18  ;;  %v3703_v20 = vld [vmem:[%s5839_s29] ss:$0 sm:$0xff]  ;;  %s5842_s29 = sld [smem:[#allocation5_spill]] }
 0x190   : > { %v4914_v23 = vsub.f32 %v1055_v57, %v1078_v21  ;;  %v1094_v24 = vsel %vm1058_vm14, %v1087_v22, 0.0  ;;  %v3701_v57 = vld [vmem:[%s5838_s9] ss:$0 sm:$0xff] }
 0x191   : > { %v1070_v25 = vpop.xlane.xlu0 %1069  ;;  %1095 = vadd.xlane.f32.xlu1 %v1094_v24 }
 0x192   : > { %v1079_v26 = vmul.f32 0.03125, %v1070_v25  ;;  %v1088_v27 = vmul.f32 %v4914_v23, %v4914_v23 }
 0x194   : > { %v4919_v28 = vsub.f32 %v1056_v3, %v1079_v26  ;;  %v1097_v29 = vsel %vm1058_vm14, %v1088_v27, 0.0 }
 0x195   : > { %1098 = vadd.xlane.f32.xlu0 %v1097_v29  ;;  %v1074_v30 = vpop.xlane.xlu1 %1073 }
 0x196   : > { %v1080_v31 = vmul.f32 0.03125, %v1074_v30  ;;  %v1089_v32 = vmul.f32 %v4919_v28, %v4919_v28 }
 0x198   : > { %v4924_v33 = vsub.f32 %v1057_v10, %v1080_v31  ;;  %v1100_v34 = vsel %vm1058_vm14, %v1089_v32, 0.0 }
 0x199   : > { %1101 = vadd.xlane.f32.xlu1 %v1100_v34 }
 0x19a   : > { %v1090_v35 = vmul.f32 %v4924_v33, %v4924_v33 }
 0x19c   : > { %v1103_v36 = vsel %vm1071_vm8, %v1090_v35, 0.0 }
 0x19d   : > { %1104 = vadd.xlane.f32.xlu0 %v1103_v36 }
 0x21a   : > { %v1093_v44 = vpop.xlane.xlu0 %1092 }
 0x21b   : > { %v1106_v45 = vmul.f32 0.03125, %v1093_v44 }
 0x21d   : > { %v1111_v46 = vadd.f32 1e-12, %v1106_v45 }
 0x21e   : > { %v1096_v47 = vpop.xlane.xlu1 %1095 }
 0x21f   : > { %4513 = vrsqrt.f32 %v1111_v46  ;;  %v1107_v48 = vmul.f32 0.03125, %v1096_v47 }
 0x221   : > { %v1112_v49 = vadd.f32 1e-12, %v1107_v48 }
 0x222   : > { %v1099_v50 = vpop.xlane.xlu0 %1098 }
 0x223   : > { %4515 = vrsqrt.f32 %v1112_v49  ;;  %v1108_v51 = vmul.f32 0.03125, %v1099_v50 }
 0x225   : > { %v1113_v52 = vadd.f32 1e-12, %v1108_v51 }
 0x226   : > { %v1102_v53 = vpop.xlane.xlu1 %1101 }
 0x227   : > { %4517 = vrsqrt.f32 %v1113_v52  ;;  %v1109_v54 = vmul.f32 0.03125, %v1102_v53 }
 0x229   : > { %v4514_v55 = vpop.eup %4513  ;;  %v1114_v56 = vadd.f32 1e-12, %v1109_v54 }
 0x22a   : > { %v1105_v58 = vpop.xlane.xlu0 %1104  ;;  %v1121_v59 = vmul.f32 %v4514_v55, %v1081_v14 }
 0x22b   : > { %4519 = vrsqrt.f32 %v1114_v56  ;;  %v1110_v60 = vmul.f32 0.03125, %v1105_v58 }
 0x22c   : > { %v1131_v62 = vmul.f32 %v3701_v57, %v1121_v59 }
 0x22d   : > { %v4516_v63 = vpop.eup %4515  ;;  %v1115_v0 = vadd.f32 1e-12, %v1110_v60 }
 0x22e   : > { %v4952_v2 = vadd.f32 %v3702_v61, %v1131_v62  ;;  %v1122_v3 = vmul.f32 %v4516_v63, %v4909_v18  ;;  %v1262_v62 = vld [vmem:[%s5842_s29] sm:$0xff] }
 0x22f   : > { %4521 = vrsqrt.f32 %v1115_v0 }
 0x230   : > { %3987 = vmatmul.mubr.msk.f32.vlgmr.msra.gmra.mrb[0].mxu1 %vm1058_vm14, %v4952_v2  ;;  %v1132_v4 = vmul.f32 %v3701_v57, %v1122_v3 }
 0x231   : > { %v4518_v5 = vpop.eup %4517  ;;  %3989 = vmatprep.mubr.msk.f32.mxu1 %vm4652_vm0, %v4651_v1 }
 0x232   : > { %v4959_v6 = vadd.f32 %v3702_v61, %v1132_v4  ;;  %v1123_v7 = vmul.f32 %v4518_v5, %v4914_v23  ;;  %v1263_v5 = vld [vmem:[%s5842_s29 + $0x8] sm:$0xff] }
 0x234   : > { %3990 = vmatmul.mubr.msk.f32.gmra.mrb[2].mxu1 %vm1058_vm14, %v4959_v6  ;;  %v1133_v8 = vmul.f32 %v3701_v57, %v1123_v7 }
 0x235   : > { %v4520_v9 = vpop.eup %4519  ;;  %3992 = vmatprep.mubr.msk.f32.mxu1 %vm4652_vm0, %v4651_v1 }
 0x236   : > { %v4966_v10 = vadd.f32 %v3702_v61, %v1133_v8  ;;  %v1124_v11 = vmul.f32 %v4520_v9, %v4919_v28 }
 0x238   : > { %3993 = vmatmul.mubr.msk.f32.gmra.mrb[4].mxu1 %vm1058_vm14, %v4966_v10  ;;  %v1134_v12 = vmul.f32 %v3701_v57, %v1124_v11 }
 0x239   : > { %v4522_v13 = vpop.eup %4521  ;;  %3995 = vmatprep.mubr.msk.f32.mxu1 %vm4652_vm0, %v4651_v1 }
 0x23a   : > { %v4973_v14 = vadd.f32 %v3702_v61, %v1134_v12  ;;  %v1125_v15 = vmul.f32 %v4522_v13, %v4924_v33  ;;  %v1264_v13 = vld [vmem:[%s5842_s29 + $0x10] sm:$0xff] }
 0x23c   : > { %3996 = vmatmul.mubr.msk.f32.gmra.mrb[6].mxu1 %vm1058_vm14, %v4973_v14  ;;  %v1135_v16 = vmul.f32 %v3701_v57, %v1125_v15 }
 0x23d   : > { %3998 = vmatprep.mubr.msk.f32.mxu1 %vm4652_vm0, %v4651_v1 }
 0x23e   : > { %v4980_v17 = vadd.f32 %v3702_v61, %v1135_v16 }
 0x240   : > { %3999 = vmatmul.mubr.msk.f32.gmra.mrb[8].mxu1 %vm1058_vm14, %v4980_v17 }
 0x241   : > { %4036 = vmatprep.mubr.msk.f32.mxu1 %vm4652_vm0, %v4651_v1 }
 0x303   : > { %v1238_v18 = vpop.f32.mrb[0].mxu1 }
 0x304   : > { %v3988_v19 = vpop.f32.mrb[1].mxu1  ;;  %v1239_v22 = vadd.f32 %v3703_v20, %v1238_v18 }
 0x307   : > { %v1243_v21 = vpop.f32.mrb[2].mxu1 }
 0x308   : > { %v1244_v23 = vadd.f32 %v3703_v20, %v1243_v21  ;;  %v3991_v24 = vpop.f32.mrb[3].mxu1  ;;  %v1265_v21 = vld [vmem:[%s5842_s29 + $0x18] sm:$0xff] }
 0x30a   : > { %v4989_v25 = vpack.i.bf16 %v1244_v23, %v1239_v22 }
 0x30b   : > { %v1248_v26 = vpop.f32.mrb[4].mxu1 }
 0x30c   : > { %4459 = vrot.lane.b32.xlu1 %v4989_v25, %s5807_s1  ;;  %v3994_v27 = vpop.f32.mrb[5].mxu1  ;;  %v1249_v29 = vadd.f32 %v3703_v20, %v1248_v26 }
 0x30f   : > { %v1253_v28 = vpop.f32.mrb[6].mxu1 }
 0x310   : > { %v1254_v30 = vadd.f32 %v3703_v20, %v1253_v28  ;;  %v3997_v31 = vpop.f32.mrb[7].mxu1  ;;  %v1266_v28 = vld [vmem:[%s5842_s29 + $0x20] sm:$0xf] }
 0x312   : > { %v4993_v32 = vpack.i.bf16 %v1254_v30, %v1249_v29 }
 0x313   : > { %v1258_v33 = vpop.f32.mrb[8].mxu1 }
 0x314   : > { %v4995_v34 = vadd.f32 %v3703_v20, %v1258_v33  ;;  %4464 = vrot.lane.b32.xlu0 %v4993_v32, %s5807_s1  ;;  %v4000_v35 = vpop.f32.mrb[9].mxu1 }
 0x316   : > { %1280 = vrot.lane.b32.xlu1 %v4995_v34, %s5807_s1  ;;  %s5846_s1 = sld [smem:[#allocation6_spill]] }
 0x318   : > { %4474 = vrot.lane.b32.xlu0 %v4993_v32, %s5805_s30 }
 0x31a   : > { %4469 = vrot.lane.b32.xlu1 %v4989_v25, %s5805_s30 }
 0x31c   : > { %1582 = vrot.lane.b32.xlu0 %v1239_v22, %s5809_s7 }
 0x31e   : > { %1600 = vrot.lane.b32.xlu1 %v4995_v34, %s5805_s30  ;;  %s4659_s30 = smov 48  }
 0x320   : > { %1586 = vrot.lane.b32.xlu0 %v1249_v29, %s5809_s7 }
 0x322   : > { %1584 = vrot.lane.b32.xlu1 %v1244_v23, %s5809_s7 }
 0x324   : > { %1590 = vrot.lane.b32.xlu0 %v4995_v34, %s5809_s7 }
 0x326   : > { %1588 = vrot.lane.b32.xlu1 %v1254_v30, %s5809_s7  ;;  %s5843_s7 = sld [smem:[#allocation9_spill]] }
 0x37e   : > { %v4460_v36 = vpop.permute.xlu1 %4459 }
 0x37f   : > { %v4462_v37 = vunpack.i.h.bf16 %v4460_v36  ;;  %v4461_v38 = vunpack.i.l.bf16 %v4460_v36 }
 0x381   : > { %v4345_v41 = vpack.c.bf16 %v4462_v37, %v4461_v38 }
 0x383   : > { %4347 = vmatpush3.bf16.xpose.msk.msra.mxu0 %vm5015_vm10, %v4345_v41 }
 0x384   : > { %4348 = vmatprep.subr.bf16.mxu0 %v4654_v40 }
 0x386   : > { %v4465_v42 = vpop.permute.xlu0 %4464 }
 0x387   : > { %v4467_v43 = vunpack.i.h.bf16 %v4465_v42  ;;  %v4466_v44 = vunpack.i.l.bf16 %v4465_v42 }
 0x388   : > { %v1281_v45 = vpop.permute.xlu1 %1280 }
 0x389   : > { %v4349_v46 = vpack.c.bf16 %v4467_v43, %v4466_v44 }
 0x38a   : > { %v4475_v51 = vpop.permute.xlu0 %4474 }
 0x38b   : > { %4351 = vmatpush3.bf16.xpose.msk.msra.mxu0 %vm5015_vm10, %v4349_v46  ;;  %v4477_v52 = vunpack.i.h.bf16 %v4475_v51  ;;  %v4476_v53 = vunpack.i.l.bf16 %v4475_v51 }
 0x38c   : > { %4009 = vmatprep.subr.mxu0 %v4651_v1  ;;  %v4470_v47 = vpop.permute.xlu1 %4469 }
 0x38d   : > { %v4472_v48 = vunpack.i.h.bf16 %v4470_v47  ;;  %v4471_v49 = vunpack.i.l.bf16 %v4470_v47  ;;  %v4363_v54 = vpack.c.bf16 %v4477_v52, %v4476_v53 }
 0x38e   : > { %v1583_v56 = vpop.permute.xlu0 %1582 }
 0x38f   : > { %v4359_v50 = vpack.c.bf16 %v4472_v48, %v4471_v49 }
 0x390   : > { %v1601_v55 = vpop.permute.xlu1 %1600 }
 0x392   : > { %v1587_v58 = vpop.permute.xlu0 %1586 }
 0x393   : > { %4010 = vmatpush3.xpose.msk.msra.mxu0 %vm1282_vm9, %v1281_v45 }
 0x394   : > { %4358 = vmatprep.subr.bf16.mxu0 %v4654_v40  ;;  %v1585_v57 = vpop.permute.xlu1 %1584 }
 0x396   : > { %4012 = vmatmul.mubr.msk.f32.vlgmr.msra.gmra.mrb[10].mxu0 %vm1282_vm9, %v1239_v22  ;;  %v1591_v60 = vpop.permute.xlu0 %1590 }
 0x397   : > { %4361 = vmatpush3.bf16.xpose.msk.msra.mxu0 %vm5015_vm10, %v4359_v50  ;;  %4014 = vmatprep.mubr.msk.f32.mxu0 %vm4652_vm0, %v4651_v1 }
 0x398   : > { %4362 = vmatprep.subr.bf16.mxu0 %v4654_v40  ;;  %v1589_v59 = vpop.permute.xlu1 %1588 }
 0x39a   : > { %4015 = vmatmul.mubr.msk.f32.gmra.mrb[12].mxu0 %vm1282_vm9, %v1244_v23 }
 0x39b   : > { %4017 = vmatprep.mubr.msk.f32.mxu0 %vm4652_vm0, %v4651_v1 }
 0x39e   : > { %4018 = vmatmul.mubr.msk.f32.gmra.mrb[14].mxu0 %vm1282_vm9, %v1249_v29 }
 0x39f   : > { %4365 = vmatpush3.bf16.xpose.msk.msra.mxu0 %vm5015_vm10, %v4363_v54  ;;  %4020 = vmatprep.mubr.msk.f32.mxu0 %vm4652_vm0, %v4651_v1 }
 0x3a0   : > { %4059 = vmatprep.subr.mxu0 %v4651_v1 }
 0x3a2   : > { %4021 = vmatmul.mubr.msk.f32.gmra.mrb[16].mxu0 %vm1282_vm9, %v1254_v30 }
 0x3a3   : > { %4023 = vmatprep.mubr.msk.f32.mxu0 %vm4652_vm0, %v4651_v1 }
 0x3a6   : > { %4024 = vmatmul.mubr.msk.f32.gmra.mrb[18].mxu0 %vm1282_vm9, %v4995_v34 }
 0x3a7   : > { %4060 = vmatpush3.xpose.msk.msra.mxu0 %vm1282_vm9, %v1601_v55  ;;  %4061 = vmatprep.mubr.msk.f32.mxu0 %vm4652_vm0, %v4651_v1 }
 0x3a8   : > { %4372 = vmatprep.subr.bf16.mxu0 %v4654_v40 }
 0x3aa   : > { %4062 = vmatmul.mubr.msk.f32.vlgmr.msra.gmra.mrb[20].mxu0 %vm1282_vm9, %v1583_v56 }
 0x3ab   : > { %4064 = vmatprep.mubr.msk.f32.mxu0 %vm4652_vm0, %v4651_v1 }
 0x3ae   : > { %4065 = vmatmul.mubr.msk.f32.gmra.mrb[22].mxu0 %vm1282_vm9, %v1585_v57 }
 0x3af   : > { %4067 = vmatprep.mubr.msk.f32.mxu0 %vm4652_vm0, %v4651_v1 }
 0x3b2   : > { %4068 = vmatmul.mubr.msk.f32.gmra.mrb[24].mxu0 %vm1282_vm9, %v1587_v58 }
 0x3b3   : > { %4070 = vmatprep.mubr.msk.f32.mxu0 %vm4652_vm0, %v4651_v1 }
 0x3b6   : > { %4071 = vmatmul.mubr.msk.f32.gmra.mrb[26].mxu0 %vm1282_vm9, %v1589_v59 }
 0x3b7   : > { %4073 = vmatprep.mubr.msk.f32.mxu0 %vm4652_vm0, %v4651_v1 }
 0x3ba   : > { %4074 = vmatmul.mubr.msk.f32.gmra.mrb[28].mxu0 %vm1282_vm9, %v1591_v60 }
 0x3bb   : > { %4109 = vmatprep.mubr.msk.f32.mxu0 %vm4652_vm0, %v4651_v1 }
 0x469   : > { %v1369_v61 = vpop.f32.mrb[10].mxu0 }
 0x46a   : > { %v1393_v63 = vmul.f32 0.25, %v1369_v61  ;;  %v4013_v0 = vpop.f32.mrb[11].mxu0 }
 0x46c   : > { %v5069_v3 = vadd.f32 %v1393_v63, %v1262_v62 }
 0x46d   : > { %v1374_v4 = vpop.f32.mrb[12].mxu0 }
 0x46e   : > { %v1394_v7 = vmul.f32 0.25, %v1374_v4  ;;  %v4016_v8 = vpop.f32.mrb[13].mxu0  ;;  %v1404_v9 = vsel %vm1403_vm11, %v5069_v3, -inf }
 0x46f   : > { %1405 = vmax.xlane.f32.xlu1 %v1404_v9 }
 0x470   : > { %v5076_v11 = vadd.f32 %v1394_v7, %v1263_v5 }
 0x471   : > { %v1379_v12 = vpop.f32.mrb[14].mxu0 }
 0x472   : > { %v1395_v15 = vmul.f32 0.25, %v1379_v12  ;;  %v4019_v16 = vpop.f32.mrb[15].mxu0  ;;  %v1407_v18 = vsel %vm1403_vm11, %v5076_v11, -inf }
 0x473   : > { %1408 = vmax.xlane.f32.xlu0 %v1407_v18 }
 0x474   : > { %v1400_v19 = vadd.f32 %v1395_v15, %v1264_v13 }
 0x475   : > { %v1384_v20 = vpop.f32.mrb[16].mxu0 }
 0x476   : > { %v1396_v22 = vmul.f32 0.25, %v1384_v20  ;;  %v4022_v23 = vpop.f32.mrb[17].mxu0  ;;  %v1410_v24 = vsel %vm1403_vm11, %v1400_v19, -inf }
 0x477   : > { %1411 = vmax.xlane.f32.xlu0 %v1410_v24 }
 0x478   : > { %v1401_v26 = vadd.f32 %v1396_v22, %v1265_v21 }
 0x479   : > { %v1389_v27 = vpop.f32.mrb[18].mxu0 }
 0x47a   : > { %v1397_v29 = vmul.f32 0.25, %v1389_v27  ;;  %v4025_v30 = vpop.f32.mrb[19].mxu0  ;;  %v1413_v31 = vsel %vm1403_vm11, %v1401_v26, -inf }
 0x47b   : > { %1414 = vmax.xlane.f32.xlu1 %v1413_v31 }
 0x47c   : > { %v1402_v33 = vadd.f32 %v1397_v29, %v1266_v28 }
 0x47d   : > { %v1688_v35 = vpop.f32.mrb[20].mxu0 }
 0x47e   : > { %v1712_v36 = vmul.f32 0.25, %v1688_v35  ;;  %v4063_v37 = vpop.f32.mrb[21].mxu0  ;;  %v1417_v38 = vsel %vm1416_vm12, %v1402_v33, -inf }
 0x47f   : > { %1418 = vmax.xlane.f32.xlu0 %v1417_v38 }
 0x480   : > { %v1717_v41 = vadd.f32 %v1712_v36, %v1262_v62 }
 0x481   : > { %v1693_v42 = vpop.f32.mrb[22].mxu0 }
 0x482   : > { %v1713_v43 = vmul.f32 0.25, %v1693_v42  ;;  %v4066_v44 = vpop.f32.mrb[23].mxu0  ;;  %v1722_v45 = vsel %vm1403_vm11, %v1717_v41, -inf }
 0x483   : > { %1723 = vmax.xlane.f32.xlu1 %v1722_v45 }
 0x484   : > { %v5093_v46 = vadd.f32 %v1713_v43, %v1263_v5 }
 0x485   : > { %v1698_v47 = vpop.f32.mrb[24].mxu0 }
 0x486   : > { %v1714_v48 = vmul.f32 0.25, %v1698_v47  ;;  %v4069_v49 = vpop.f32.mrb[25].mxu0  ;;  %v1725_v50 = vsel %vm1403_vm11, %v5093_v46, -inf }
 0x487   : > { %1726 = vmax.xlane.f32.xlu0 %v1725_v50 }
 0x488   : > { %v5097_v51 = vadd.f32 %v1714_v48, %v1264_v13 }
 0x489   : > { %v1703_v52 = vpop.f32.mrb[26].mxu0 }
 0x48a   : > { %v1715_v53 = vmul.f32 0.25, %v1703_v52  ;;  %v4072_v54 = vpop.f32.mrb[27].mxu0  ;;  %v1728_v60 = vsel %vm1403_vm11, %v5097_v51, -inf }
 0x48c   : > { %v5099_v55 = vadd.f32 %v1715_v53, %v1265_v21 }
 0x48d   : > { %v1708_v56 = vpop.f32.mrb[28].mxu0 }
 0x48e   : > { %v4075_v57 = vpop.f32.mrb[29].mxu0  ;;  %v1731_v58 = vsel %vm1403_vm11, %v5099_v55, -inf  ;;  %v1716_v59 = vmul.f32 0.25, %v1708_v56 }
 0x48f   : > { %1732 = vmax.xlane.f32.xlu0 %v1731_v58 }
 0x490   : > { %v5107_v61 = vadd.f32 %v1716_v59, %v1266_v28 }
 0x492   : > { %v1734_v62 = vsel %vm1416_vm12, %v5107_v61, -inf }
 0x494   : > { %4479 = vrot.lane.b32.xlu1 %v4989_v25, %s4658_s3 }
 0x4a5   : > { %4484 = vrot.lane.b32.xlu0 %v4993_v32, %s4658_s3 }
 0x4b8   : > { %1729 = vmax.xlane.f32.xlu1 %v1728_v60 }
 0x4bc   : > { %1735 = vmax.xlane.f32.xlu1 %v1734_v62 }
 0x4cd   : > { %1468 = vrot.lane.b32.xlu1 %v4995_v34, %s4658_s3  ;;  %s5845_s3 = smov 112  }
 0x4fc   : > { %v1406_v63 = vpop.xlane.xlu1 %1405 }
 0x4fd   : > { %v1420_v0 = vsub.f32 %v5069_v3, %v1406_v63 }
 0x4ff   : > { %v1425_v4 = vmul.f32 1.442695, %v1420_v0 }
 0x500   : > { %v1409_v5 = vpop.xlane.xlu0 %1408 }
 0x501   : > { %4523 = vpow2.f32 %v1425_v4  ;;  %v1421_v7 = vsub.f32 %v5076_v11, %v1409_v5 }
 0x503   : > { %v1427_v8 = vmul.f32 1.442695, %v1421_v7 }
 0x504   : > { %v1412_v9 = vpop.xlane.xlu0 %1411 }
 0x505   : > { %4525 = vpow2.f32 %v1427_v8  ;;  %v1422_v12 = vsub.f32 %v1400_v19, %v1412_v9 }
 0x507   : > { %v1429_v13 = vmul.f32 1.442695, %v1422_v12 }
 0x508   : > { %v1415_v15 = vpop.xlane.xlu1 %1414 }
 0x509   : > { %4527 = vpow2.f32 %v1429_v13  ;;  %v1423_v16 = vsub.f32 %v1401_v26, %v1415_v15 }
 0x50b   : > { %v5114_v18 = vpop.eup %4523  ;;  %v1431_v20 = vmul.f32 1.442695, %v1423_v16 }
 0x50c   : > { %v1419_v21 = vpop.xlane.xlu0 %1418  ;;  %v1435_v3 = vsel %vm1403_vm11, %v5114_v18, 0.0 }
 0x50d   : > { %4529 = vpow2.f32 %v1431_v20  ;;  %v1424_v22 = vsub.f32 %v1402_v33, %v1419_v21  ;;  %1436 = vadd.xlane.f32.xlu0 %v1435_v3 }
 0x50f   : > { %v5118_v23 = vpop.eup %4525  ;;  %v1433_v11 = vmul.f32 1.442695, %v1424_v22 }
 0x510   : > { %v1724_v24 = vpop.xlane.xlu1 %1723  ;;  %v1438_v19 = vsel %vm1403_vm11, %v5118_v23, 0.0 }
 0x511   : > { %4531 = vpow2.f32 %v1433_v11  ;;  %v1737_v27 = vsub.f32 %v1717_v41, %v1724_v24  ;;  %1439 = vadd.xlane.f32.xlu1 %v1438_v19 }
 0x513   : > { %v5122_v26 = vpop.eup %4527  ;;  %v1742_v28 = vmul.f32 1.442695, %v1737_v27 }
 0x514   : > { %v4480_v29 = vpop.permute.xlu1 %4479  ;;  %v1727_v30 = vpop.xlane.xlu0 %1726  ;;  %v1441_v31 = vsel %vm1403_vm11, %v5122_v26, 0.0 }
 0x515   : > { %4533 = vpow2.f32 %v1742_v28  ;;  %v4482_v33 = vunpack.i.h.bf16 %v4480_v29  ;;  %v4481_v35 = vunpack.i.l.bf16 %v4480_v29  ;;  %v1738_v36 = vsub.f32 %v5093_v46, %v1727_v30  ;;  %1442 = vadd.xlane.f32.xlu0 %v1441_v31 }
 0x517   : > { %v5127_v37 = vpop.eup %4529  ;;  %v4353_v38 = vpack.c.bf16 %v4482_v33, %v4481_v35  ;;  %v1744_v42 = vmul.f32 1.442695, %v1738_v36 }
 0x518   : > { %v1444_v41 = vsel %vm1403_vm11, %v5127_v37, 0.0 }
 0x519   : > { %4535 = vpow2.f32 %v1744_v42  ;;  %4354 = vmatpush3.bf16.msra.mxu1 %v4353_v38  ;;  %1445 = vadd.xlane.f32.xlu1 %v1444_v41 }
 0x51a   : > { %4355 = vmatprep.subr.bf16.mxu1 %v4654_v40 }
 0x51b   : > { %v5132_v43 = vpop.eup %4531 }
 0x51c   : > { %v1733_v44 = vpop.xlane.xlu0 %1732  ;;  %v1447_v45 = vsel %vm1416_vm12, %v5132_v43, 0.0 }
 0x51d   : > { %1448 = vadd.xlane.f32.xlu0 %v1447_v45  ;;  %v1740_v56 = vsub.f32 %v5099_v55, %v1733_v44 }
 0x51f   : > { %v5136_v46 = vpop.eup %4533  ;;  %v1748_v59 = vmul.f32 1.442695, %v1740_v56  ;;  %v1925_v56 = vld [vmem:[%s5778_s13 + $0x10] sm:$0xff] }
 0x520   : > { %v4485_v47 = vpop.permute.xlu0 %4484  ;;  %v1752_v48 = vsel %vm1403_vm11, %v5136_v46, 0.0 }
 0x521   : > { %v4487_v49 = vunpack.i.h.bf16 %v4485_v47  ;;  %v4486_v50 = vunpack.i.l.bf16 %v4485_v47  ;;  %1753 = vadd.xlane.f32.xlu1 %v1752_v48 }
 0x523   : > { %v5140_v52 = vpop.eup %4535  ;;  %v4356_v53 = vpack.c.bf16 %v4487_v49, %v4486_v50 }
 0x524   : > { %v1755_v54 = vsel %vm1403_vm11, %v5140_v52, 0.0 }
 0x525   : > { %1756 = vadd.xlane.f32.xlu0 %v1755_v54  ;;  %4357 = vmatpush3.bf16.msra.mxu1 %v4356_v53  ;;  %v1923_v53 = vld [vmem:[%s5778_s13] sm:$0xff]  ;;  %v1924_v54 = vld [vmem:[%s5778_s13 + $0x8] sm:$0xff] }
 0x526   : > { %4034 = vmatprep.subr.mxu1 %v4651_v1 }
 0x532   : > { %4494 = vrot.lane.b32.xlu1 %v4993_v32, %s4659_s30 }
 0x536   : > { %1785 = vrot.lane.b32.xlu1 %v4995_v34, %s4659_s30 }
 0x545   : > { %v1730_v57 = vpop.xlane.xlu1 %1729 }
 0x546   : > { %v1739_v58 = vsub.f32 %v5097_v51, %v1730_v57  ;;  %v4373_v57 = vpack.c.bf16 %v1924_v54, %v1923_v53 }
 0x548   : > { %v1746_v60 = vmul.f32 1.442695, %v1739_v58  ;;  %v1926_v58 = vld [vmem:[%s5778_s13 + $0x18] sm:$0xff]  ;;  %4374 = vmatpush3.bf16.msra.mxu0 %v4373_v57 }
 0x549   : > { %v1736_v62 = vpop.xlane.xlu1 %1735  ;;  %4375 = vmatprep.subr.bf16.mxu0 %v4654_v40 }
 0x54a   : > { %4537 = vpow2.f32 %v1746_v60  ;;  %v1741_v63 = vsub.f32 %v5107_v61, %v1736_v62 }
 0x54b   : > { %4539 = vpow2.f32 %v1748_v59  ;;  %v4376_v59 = vpack.c.bf16 %v1926_v58, %v1925_v56 }
 0x54c   : > { %v1750_v0 = vmul.f32 1.442695, %v1741_v63 }
 0x54d   : > { %v1469_v4 = vpop.permute.xlu1 %1468  ;;  %4377 = vmatpush3.bf16.msra.mxu0 %v4376_v59 }
 0x54e   : > { %4035 = vmatpush3.msk.msra.mxu1 %vm1489_vm13, %v1469_v4  ;;  %4541 = vpow2.f32 %v1750_v0  ;;  %4388 = vmatprep.subr.bf16.mxu0 %v4654_v40 }
 0x54f   : > { %4366 = vmatprep.subr.bf16.mxu1 %v4654_v40 }
 0x554   : > { %v5152_v32 = vpop.eup %4537 }
 0x555   : > { %v1758_v34 = vsel %vm1403_vm11, %v5152_v32, 0.0  ;;  %v5156_v51 = vpop.eup %4539 }
 0x556   : > { %1759 = vadd.xlane.f32.xlu0 %v1758_v34  ;;  %v1761_v55 = vsel %vm1403_vm11, %v5156_v51, 0.0 }
 0x558   : > { %v5160_v61 = vpop.eup %4541 }
 0x559   : > { %v1764_v5 = vsel %vm1416_vm12, %v5160_v61, 0.0 }
 0x55a   : > { %1762 = vadd.xlane.f32.xlu0 %v1761_v55 }
 0x55e   : > { %1765 = vadd.xlane.f32.xlu0 %v1764_v5 }
 0x574   : > { %4489 = vrot.lane.b32.xlu0 %v4989_v25, %s4659_s30 }
 0x59a   : > { %v1437_v7 = vpop.xlane.xlu0 %1436 }
 0x59b   : > { %4543 = vrcp.f32 %v1437_v7 }
 0x59e   : > { %v1440_v8 = vpop.xlane.xlu1 %1439 }
 0x59f   : > { %4545 = vrcp.f32 %v1440_v8 }
 0x5a2   : > { %v1443_v9 = vpop.xlane.xlu0 %1442 }
 0x5a3   : > { %4547 = vrcp.f32 %v1443_v9 }
 0x5a5   : > { %v4544_v12 = vpop.eup %4543 }
 0x5a6   : > { %v1451_v13 = vmul.f32 %v4544_v12, %v5114_v18  ;;  %v1446_v15 = vpop.xlane.xlu1 %1445 }
 0x5a7   : > { %4549 = vrcp.f32 %v1446_v15 }
 0x5a8   : > { %4037 = vmatmul.mubr.msk.f32.vlgmr.msra.gmra.mrb[10].mxu1 %vm1403_vm11, %v1451_v13 }
 0x5a9   : > { %v4546_v16 = vpop.eup %4545  ;;  %4039 = vmatprep.mubr.msk.f32.mxu1 %vm4652_vm0, %v4651_v1 }
 0x5aa   : > { %v1449_v20 = vpop.xlane.xlu0 %1448  ;;  %v1453_v25 = vmul.f32 %v4546_v16, %v5118_v23 }
 0x5ab   : > { %4551 = vrcp.f32 %v1449_v20 }
 0x5ac   : > { %4040 = vmatmul.mubr.msk.f32.gmra.mrb[12].mxu1 %vm1403_vm11, %v1453_v25 }
 0x5ad   : > { %v4548_v21 = vpop.eup %4547  ;;  %4042 = vmatprep.mubr.msk.f32.mxu1 %vm4652_vm0, %v4651_v1 }
 0x5ae   : > { %v1455_v18 = vmul.f32 %v4548_v21, %v5122_v26  ;;  %v1754_v26 = vpop.xlane.xlu1 %1753 }
 0x5af   : > { %4553 = vrcp.f32 %v1754_v26 }
 0x5b0   : > { %4043 = vmatmul.mubr.msk.f32.gmra.mrb[14].mxu1 %vm1403_vm11, %v1455_v18 }
 0x5b1   : > { %v4550_v3 = vpop.eup %4549  ;;  %4045 = vmatprep.mubr.msk.f32.mxu1 %vm4652_vm0, %v4651_v1 }
 0x5b2   : > { %v1457_v22 = vmul.f32 %v4550_v3, %v5127_v37  ;;  %v1757_v24 = vpop.xlane.xlu0 %1756  ;;  %v4495_v29 = vpop.permute.xlu1 %4494 }
 0x5b3   : > { %4555 = vrcp.f32 %v1757_v24  ;;  %v4497_v35 = vunpack.i.h.bf16 %v4495_v29  ;;  %v4496_v36 = vunpack.i.l.bf16 %v4495_v29  ;;  %v2133_v29 = vld [vmem:[%s5843_s7 + $0x8] sm:$0xf] }
 0x5b4   : > { %4046 = vmatmul.mubr.msk.f32.gmra.mrb[16].mxu1 %vm1403_vm11, %v1457_v22 }
 0x5b5   : > { %v4552_v23 = vpop.eup %4551  ;;  %4048 = vmatprep.mubr.msk.f32.mxu1 %vm4652_vm0, %v4651_v1  ;;  %v4370_v38 = vpack.c.bf16 %v4497_v35, %v4496_v36  ;;  %v3741_v36 = vld [vmem:[%s5779_s14] ss:$0 sm:$0xff] }
 0x5b6   : > { %v1459_v11 = vmul.f32 %v4552_v23, %v5132_v43  ;;  %v1786_v43 = vpop.permute.xlu1 %1785 }
 0x5b8   : > { %4049 = vmatmul.mubr.msk.f32.gmra.mrb[18].mxu1 %vm1403_vm11, %v1459_v11 }
 0x5b9   : > { %4086 = vmatprep.mubr.msk.f32.mxu1 %vm4652_vm0, %v4651_v1  ;;  %v4554_v42 = vpop.eup %4553 }
 0x5ba   : > { %v1768_v41 = vmul.f32 %v4554_v42, %v5136_v46 }
 0x5bd   : > { %v4556_v44 = vpop.eup %4555 }
 0x5be   : > { %v1770_v45 = vmul.f32 %v4556_v44, %v5140_v52 }
 0x5e3   : > { %v1760_v19 = vpop.xlane.xlu0 %1759 }
 0x5e4   : > { %4557 = vrcp.f32 %v1760_v19 }
 0x5e7   : > { %v1763_v27 = vpop.xlane.xlu0 %1762 }
 0x5e8   : > { %4559 = vrcp.f32 %v1763_v27 }
 0x5eb   : > { %v1766_v28 = vpop.xlane.xlu0 %1765 }
 0x5ec   : > { %4561 = vrcp.f32 %v1766_v28  ;;  %v2132_v28 = vld [vmem:[%s5843_s7] sm:$0xff] }
 0x5ee   : > { %v4558_v47 = vpop.eup %4557 }
 0x5ef   : > { %v4490_v30 = vpop.permute.xlu0 %4489  ;;  %v1772_v46 = vmul.f32 %v4558_v47, %v5152_v32 }
 0x5f0   : > { %v4492_v31 = vunpack.i.h.bf16 %v4490_v30  ;;  %v4491_v33 = vunpack.i.l.bf16 %v4490_v30  ;;  %v4379_v30 = vpack.c.bf16 %v2133_v29, %v2132_v28 }
 0x5f2   : > { %v4367_v37 = vpack.c.bf16 %v4492_v31, %v4491_v33  ;;  %v4560_v48 = vpop.eup %4559 }
 0x5f3   : > { %v1774_v49 = vmul.f32 %v4560_v48, %v5156_v51 }
 0x5f4   : > { %4368 = vmatpush3.bf16.msra.mxu1 %v4367_v37 }
 0x5f5   : > { %4369 = vmatprep.subr.bf16.mxu1 %v4654_v40 }
 0x5f6   : > { %v4562_v50 = vpop.eup %4561 }
 0x5f7   : > { %v1776_v52 = vmul.f32 %v4562_v50, %v5160_v61 }
 0x5f8   : > { %4371 = vmatpush3.bf16.msra.mxu1 %v4370_v38 }
 0x5f9   : > { %4084 = vmatprep.subr.mxu1 %v4651_v1 }
 0x5fc   : > { %4085 = vmatpush3.msk.msra.mxu1 %vm1489_vm13, %v1786_v43 }
 0x5fd   : > { %4087 = vmatmul.mubr.msk.f32.vlgmr.msra.gmra.mrb[20].mxu1 %vm1403_vm11, %v1768_v41  ;;  %4378 = vmatprep.subr.bf16.mxu1 %v4654_v40 }
 0x5fe   : > { %4089 = vmatprep.mubr.msk.f32.mxu1 %vm4652_vm0, %v4651_v1  ;;  %4381 = vmatpush3.bf16.msk.msra.mxu1 %vm4380_vm1, %v4379_v30 }
 0x5ff   : > { %4382 = vmatprep.subr.bf16.mxu1 %v4654_v40 }
 0x601   : > { %4090 = vmatmul.mubr.msk.f32.gmra.mrb[22].mxu1 %vm1403_vm11, %v1770_v45 }
 0x602   : > { %4092 = vmatprep.mubr.msk.f32.mxu1 %vm4652_vm0, %v4651_v1 }
 0x605   : > { %4093 = vmatmul.mubr.msk.f32.gmra.mrb[24].mxu1 %vm1403_vm11, %v1772_v46 }
 0x606   : > { %4095 = vmatprep.mubr.msk.f32.mxu1 %vm4652_vm0, %v4651_v1 }
 0x609   : > { %4096 = vmatmul.mubr.msk.f32.gmra.mrb[26].mxu1 %vm1403_vm11, %v1774_v49 }
 0x60a   : > { %4098 = vmatprep.mubr.msk.f32.mxu1 %vm4652_vm0, %v4651_v1 }
 0x60d   : > { %4099 = vmatmul.mubr.msk.f32.gmra.mrb[28].mxu1 %vm1403_vm11, %v1776_v52 }
 0x60e   : > { %4128 = vmatprep.mubr.msk.f32.mxu1 %vm4652_vm0, %v4651_v1 }
 0x67b   : > { %v1558_v60 = vpop.f32.mrb[10].mxu1 }
 0x67c   : > { %v4038_v62 = vpop.f32.mrb[11].mxu1 }
 0x67f   : > { %v1563_v63 = vpop.f32.mrb[12].mxu1 }
 0x680   : > { %v4041_v0 = vpop.f32.mrb[13].mxu1 }
 0x683   : > { %v1568_v4 = vpop.f32.mrb[14].mxu1 }
 0x684   : > { %v4044_v32 = vpop.f32.mrb[15].mxu1 }
 0x687   : > { %v1573_v34 = vpop.f32.mrb[16].mxu1 }
 0x688   : > { %v4047_v51 = vpop.f32.mrb[17].mxu1 }
 0x68b   : > { %v1578_v55 = vpop.f32.mrb[18].mxu1 }
 0x68c   : > { %v4050_v61 = vpop.f32.mrb[19].mxu1 }
 0x6d0   : > { %v1874_v5 = vpop.f32.mrb[20].mxu1 }
 0x6d1   : > { %1903 = vrot.lane.b32.xlu1 %v1874_v5, %s5813_s0  ;;  %v4088_v7 = vpop.f32.mrb[21].mxu1 }
 0x6d4   : > { %v1879_v8 = vpop.f32.mrb[22].mxu1 }
 0x6d5   : > { %1905 = vrot.lane.b32.xlu1 %v1879_v8, %s5813_s0  ;;  %v4091_v9 = vpop.f32.mrb[23].mxu1 }
 0x6d8   : > { %v1884_v12 = vpop.f32.mrb[24].mxu1 }
 0x6d9   : > { %1907 = vrot.lane.b32.xlu1 %v1884_v12, %s5813_s0  ;;  %v4094_v13 = vpop.f32.mrb[25].mxu1 }
 0x6dc   : > { %v1889_v15 = vpop.f32.mrb[26].mxu1 }
 0x6dd   : > { %1909 = vrot.lane.b32.xlu0 %v1889_v15, %s5813_s0  ;;  %v4097_v16 = vpop.f32.mrb[27].mxu1 }
 0x6e0   : > { %v1894_v20 = vpop.f32.mrb[28].mxu1 }
 0x6e1   : > { %1911 = vrot.lane.b32.xlu1 %v1894_v20, %s5813_s0  ;;  %v4100_v25 = vpop.f32.mrb[29].mxu1  ;;  %s5844_s0 = sld [smem:[#allocation7_spill]] }
 0x6e7   : > { %v2129_v31 = vld [vmem:[%s5844_s0] sm:$0xff]  ;;  %v2130_v33 = vld [vmem:[%s5844_s0 + $0x8] sm:$0xff]  ;;  %v2131_v35 = vld [vmem:[%s5844_s0 + $0x10] sm:$0xff] }
 0x6e8   : > { %4129 = vmatmul.mubr.msk.f32.vlgmr.msra.gmra.mrb[30].mxu1 %vm2134_vm2, %v2129_v31 }
 0x6e9   : > { %4131 = vmatprep.mubr.msk.f32.mxu1 %vm4652_vm0, %v4651_v1 }
 0x6ec   : > { %4132 = vmatmul.mubr.msk.f32.gmra.mrb[32].mxu1 %vm2134_vm2, %v2130_v33 }
 0x6ed   : > { %4134 = vmatprep.mubr.msk.f32.mxu1 %vm4652_vm0, %v4651_v1 }
 0x6f0   : > { %4135 = vmatmul.mubr.msk.f32.gmra.mrb[34].mxu1 %vm2134_vm2, %v2131_v35 }
 0x6f1   : > { %4145 = vmatprep.mubr.msk.f32.mxu1 %vm4652_vm0, %v4651_v1 }
 0x743   : > { %v1904_v21 = vpop.permute.xlu1 %1903 }
 0x744   : > { %v1918_v18 = vsel %vm1282_vm9, %v1558_v60, %v1904_v21 }
 0x745   : > { %4110 = vmatmul.mubr.msk.f32.vlgmr.msra.gmra.mrb[30].mxu0 %vm1058_vm14, %v1918_v18 }
 0x746   : > { %4112 = vmatprep.mubr.msk.f32.mxu0 %vm4652_vm0, %v4651_v1 }
 0x747   : > { %v1906_v3 = vpop.permute.xlu1 %1905 }
 0x748   : > { %v1919_v22 = vsel %vm1282_vm9, %v1563_v63, %v1906_v3 }
 0x749   : > { %4113 = vmatmul.mubr.msk.f32.gmra.mrb[32].mxu0 %vm1058_vm14, %v1919_v22 }
 0x74a   : > { %4115 = vmatprep.mubr.msk.f32.mxu0 %vm4652_vm0, %v4651_v1 }
 0x74b   : > { %v1908_v23 = vpop.permute.xlu1 %1907 }
 0x74c   : > { %v1920_v11 = vsel %vm1282_vm9, %v1568_v4, %v1908_v23  ;;  %v2344_v4 = vld [vmem:[%s5783_s18 + $0x8] sm:$0xff] }
 0x74d   : > { %4116 = vmatmul.mubr.msk.f32.gmra.mrb[34].mxu0 %vm1058_vm14, %v1920_v11 }
 0x74e   : > { %4118 = vmatprep.mubr.msk.f32.mxu0 %vm4652_vm0, %v4651_v1 }
 0x74f   : > { %v1910_v24 = vpop.permute.xlu0 %1909 }
 0x750   : > { %v1921_v19 = vsel %vm1282_vm9, %v1573_v34, %v1910_v24 }
 0x751   : > { %4119 = vmatmul.mubr.msk.f32.gmra.mrb[36].mxu0 %vm1058_vm14, %v1921_v19 }
 0x752   : > { %4121 = vmatprep.mubr.msk.f32.mxu0 %vm4652_vm0, %v4651_v1 }
 0x753   : > { %v1912_v27 = vpop.permute.xlu1 %1911 }
 0x754   : > { %v1922_v26 = vsel %vm1282_vm9, %v1578_v55, %v1912_v27 }
 0x755   : > { %4122 = vmatmul.mubr.msk.f32.gmra.mrb[38].mxu0 %vm1058_vm14, %v1922_v26 }
 0x756   : > { %4168 = vmatprep.mubr.msk.f32.mxu0 %vm4652_vm0, %v4651_v1 }
 0x7bb   : > { %v2213_v51 = vpop.f32.mrb[30].mxu1 }
 0x7bc   : > { %v4130_v55 = vpop.f32.mrb[31].mxu1 }
 0x7bf   : > { %v2218_v61 = vpop.f32.mrb[32].mxu1 }
 0x7c0   : > { %v4133_v5 = vpop.f32.mrb[33].mxu1 }
 0x818   : > { %v2015_v37 = vpop.f32.mrb[30].mxu0 }
 0x819   : > { %v2016_v38 = vadd.f32 %v3741_v36, %v2015_v37  ;;  %v4111_v42 = vpop.f32.mrb[31].mxu0  ;;  %v2228_v37 = vld [vmem:[%s5781_s16 + $0x8] sm:$0xff] }
 0x81a   : > { %v2229_v42 = vld [vmem:[%s5781_s16 + $0x10] sm:$0xff] }
 0x81b   : > { %v2039_v41 = vadd.f32 %v2016_v38, %v4952_v2 }
 0x81c   : > { %v2020_v43 = vpop.f32.mrb[32].mxu0 }
 0x81d   : > { %v2021_v44 = vadd.f32 %v3741_v36, %v2020_v43  ;;  %v4114_v45 = vpop.f32.mrb[33].mxu0  ;;  %v2044_v47 = vsel %vm1058_vm14, %v2039_v41, 0.0  ;;  %v2223_v43 = vpop.f32.mrb[34].mxu1 }
 0x81e   : > { %2045 = vadd.xlane.f32.xlu0 %v2044_v47  ;;  %v4136_v45 = vpop.f32.mrb[35].mxu1 }
 0x81f   : > { %v2040_v46 = vadd.f32 %v2021_v44, %v4959_v6 }
 0x820   : > { %v2025_v48 = vpop.f32.mrb[34].mxu0 }
 0x821   : > { %v2026_v49 = vadd.f32 %v3741_v36, %v2025_v48  ;;  %v4117_v50 = vpop.f32.mrb[35].mxu0  ;;  %v2047_v52 = vsel %vm1058_vm14, %v2040_v46, 0.0 }
 0x822   : > { %2048 = vadd.xlane.f32.xlu1 %v2047_v52 }
 0x823   : > { %v2041_v53 = vadd.f32 %v2026_v49, %v4966_v10  ;;  %v2343_v10 = vld [vmem:[%s5783_s18] sm:$0xff] }
 0x824   : > { %v2030_v54 = vpop.f32.mrb[36].mxu0  ;;  %v4389_v32 = vpack.c.bf16 %v2344_v4, %v2343_v10 }
 0x825   : > { %v2031_v56 = vadd.f32 %v3741_v36, %v2030_v54  ;;  %v4120_v57 = vpop.f32.mrb[37].mxu0  ;;  %v2050_v2 = vsel %vm1058_vm14, %v2041_v53, 0.0 }
 0x826   : > { %2051 = vadd.xlane.f32.xlu0 %v2050_v2  ;;  %4390 = vmatpush3.bf16.msra.mxu0 %v4389_v32 }
 0x827   : > { %v2042_v58 = vadd.f32 %v2031_v56, %v4973_v14  ;;  %v2345_v14 = vld [vmem:[%s5783_s18 + $0x10] sm:$0xff]  ;;  %4391 = vmatprep.subr.bf16.mxu0 %v4654_v40 }
 0x828   : > { %v2035_v59 = vpop.f32.mrb[38].mxu0 }
 0x829   : > { %v2036_v60 = vadd.f32 %v3741_v36, %v2035_v59  ;;  %v4123_v62 = vpop.f32.mrb[39].mxu0  ;;  %v2053_v6 = vsel %vm1058_vm14, %v2042_v58, 0.0  ;;  %v2227_v36 = vld [vmem:[%s5781_s16] sm:$0xff] }
 0x82a   : > { %2054 = vadd.xlane.f32.xlu0 %v2053_v6  ;;  %v4383_v38 = vpack.c.bf16 %v2228_v37, %v2227_v36  ;;  %v3747_v59 = vld [vmem:[%s5780_s15] ss:$0 sm:$0xff] }
 0x82b   : > { %v2043_v63 = vadd.f32 %v2036_v60, %v4980_v17  ;;  %v2346_v17 = vld [vmem:[%s5783_s18 + $0x18] sm:$0xff] }
 0x82c   : > { %v4392_v34 = vpack.c.bf16 %v2346_v17, %v2345_v14  ;;  %4384 = vmatpush3.bf16.msra.mxu1 %v4383_v38 }
 0x82d   : > { %v2056_v0 = vsel %vm1071_vm8, %v2043_v63, 0.0  ;;  %4385 = vmatprep.subr.bf16.mxu1 %v4654_v40 }
 0x82e   : > { %2057 = vadd.xlane.f32.xlu1 %v2056_v0  ;;  %4393 = vmatpush3.bf16.msra.mxu0 %v4392_v34 }
 0x82f   : > { %4394 = vmatprep.subr.bf16.mxu0 %v4654_v40 }
 0x831   : > { %4169 = vmatmul.mubr.msk.f32.vlgmr.msra.gmra.mrb[40].mxu0 %vm1058_vm14, %v2213_v51 }
 0x832   : > { %4171 = vmatprep.mubr.msk.f32.mxu0 %vm4652_vm0, %v4651_v1 }
 0x835   : > { %4172 = vmatmul.mubr.msk.f32.gmra.mrb[42].mxu0 %vm1058_vm14, %v2218_v61 }
 0x836   : > { %4174 = vmatprep.mubr.msk.f32.mxu0 %vm4652_vm0, %v4651_v1 }
 0x839   : > { %4175 = vmatmul.mubr.msk.f32.gmra.mrb[44].mxu0 %vm1058_vm14, %v2223_v43 }
 0x83a   : > { %4183 = vmatprep.mubr.msk.f32.mxu0 %vm4652_vm0, %v4651_v1 }
 0x8ab   : > { %v2046_v7 = vpop.xlane.xlu0 %2045 }
 0x8ac   : > { %v2059_v8 = vmul.f32 0.03125, %v2046_v7 }
 0x8ae   : > { %v2064_v9 = vsub.f32 %v2039_v41, %v2059_v8  ;;  %v2230_v41 = vld [vmem:[%s5781_s16 + $0x18] sm:$0xff]  ;;  %v3759_v8 = vld [vmem:[%s5784_s19] ss:$0 sm:$0xff] }
 0x8af   : > { %v2049_v12 = vpop.xlane.xlu1 %2048  ;;  %v4386_v44 = vpack.c.bf16 %v2230_v41, %v2229_v42 }
 0x8b0   : > { %v2060_v13 = vmul.f32 0.03125, %v2049_v12  ;;  %v2069_v15 = vmul.f32 %v2064_v9, %v2064_v9 }
 0x8b1   : > { %4387 = vmatpush3.bf16.msra.mxu1 %v4386_v44 }
 0x8b2   : > { %v5304_v16 = vsub.f32 %v2040_v46, %v2060_v13  ;;  %v2074_v20 = vsel %vm1058_vm14, %v2069_v15, 0.0  ;;  %4432 = vmatprep.subr.bf16.mxu1 %v4654_v40 }
 0x8b3   : > { %v2052_v25 = vpop.xlane.xlu0 %2051  ;;  %2075 = vadd.xlane.f32.xlu0 %v2074_v20 }
 0x8b4   : > { %v2061_v21 = vmul.f32 0.03125, %v2052_v25  ;;  %v2070_v18 = vmul.f32 %v5304_v16, %v5304_v16 }
 0x8b6   : > { %v5309_v3 = vsub.f32 %v2041_v53, %v2061_v21  ;;  %v2077_v22 = vsel %vm1058_vm14, %v2070_v18, 0.0 }
 0x8b7   : > { %v2055_v23 = vpop.xlane.xlu0 %2054  ;;  %2078 = vadd.xlane.f32.xlu1 %v2077_v22 }
 0x8b8   : > { %v2062_v11 = vmul.f32 0.03125, %v2055_v23  ;;  %v2071_v24 = vmul.f32 %v5309_v3, %v5309_v3 }
 0x8ba   : > { %v5314_v19 = vsub.f32 %v2042_v58, %v2062_v11  ;;  %v2080_v27 = vsel %vm1058_vm14, %v2071_v24, 0.0 }
 0x8bb   : > { %2081 = vadd.xlane.f32.xlu0 %v2080_v27  ;;  %v2058_v26 = vpop.xlane.xlu1 %2057 }
 0x8bc   : > { %v2063_v28 = vmul.f32 0.03125, %v2058_v26  ;;  %v2072_v29 = vmul.f32 %v5314_v19, %v5314_v19 }
 0x8be   : > { %v5319_v30 = vsub.f32 %v2043_v63, %v2063_v28  ;;  %v2083_v31 = vsel %vm1058_vm14, %v2072_v29, 0.0  ;;  %v3748_v63 = vld [vmem:[%s5780_s15 + $0x1] ss:$0 sm:$0xff] }
 0x8bf   : > { %2084 = vadd.xlane.f32.xlu1 %v2083_v31 }
 0x8c0   : > { %v2073_v33 = vmul.f32 %v5319_v30, %v5319_v30 }
 0x8c2   : > { %v2086_v35 = vsel %vm1071_vm8, %v2073_v33, 0.0 }
 0x8c3   : > { %2087 = vadd.xlane.f32.xlu0 %v2086_v35  ;;  %v3753_v35 = vld [vmem:[%s5782_s17] ss:$0 sm:$0xff] }
 0x940   : > { %v2076_v47 = vpop.xlane.xlu0 %2075 }
 0x941   : > { %v2089_v46 = vmul.f32 0.03125, %v2076_v47 }
 0x943   : > { %v2094_v48 = vadd.f32 1e-12, %v2089_v46 }
 0x944   : > { %v2079_v49 = vpop.xlane.xlu1 %2078 }
 0x945   : > { %4563 = vrsqrt.f32 %v2094_v48  ;;  %v2090_v50 = vmul.f32 0.03125, %v2079_v49 }
 0x947   : > { %v2095_v52 = vadd.f32 1e-12, %v2090_v50 }
 0x948   : > { %v2082_v53 = vpop.xlane.xlu0 %2081 }
 0x949   : > { %4565 = vrsqrt.f32 %v2095_v52  ;;  %v2091_v54 = vmul.f32 0.03125, %v2082_v53 }
 0x94b   : > { %v2096_v56 = vadd.f32 1e-12, %v2091_v54 }
 0x94c   : > { %v2085_v57 = vpop.xlane.xlu1 %2084 }
 0x94d   : > { %4567 = vrsqrt.f32 %v2096_v56  ;;  %v2092_v2 = vmul.f32 0.03125, %v2085_v57 }
 0x94f   : > { %v4564_v58 = vpop.eup %4563  ;;  %v2097_v60 = vadd.f32 1e-12, %v2092_v2 }
 0x950   : > { %v2104_v62 = vmul.f32 %v4564_v58, %v2064_v9  ;;  %v2088_v6 = vpop.xlane.xlu0 %2087  ;;  %v2429_v9 = vpop.f32.mrb[40].mxu0 }
 0x951   : > { %4569 = vrsqrt.f32 %v2097_v60  ;;  %v2093_v0 = vmul.f32 0.03125, %v2088_v6  ;;  %v4170_v15 = vpop.f32.mrb[41].mxu0  ;;  %v2430_v20 = vadd.f32 %v3759_v8, %v2429_v9 }
 0x952   : > { %v2114_v10 = vmul.f32 %v3747_v59, %v2104_v62  ;;  %v2434_v21 = vpop.f32.mrb[42].mxu0  ;;  %v2443_v62 = vld [vmem:[%s5846_s1] sm:$0xff] }
 0x953   : > { %v4566_v4 = vpop.eup %4565  ;;  %v2098_v14 = vadd.f32 1e-12, %v2093_v0  ;;  %v2435_v22 = vadd.f32 %v3759_v8, %v2434_v21  ;;  %v4173_v23 = vpop.f32.mrb[43].mxu0 }
 0x954   : > { %v5348_v32 = vadd.f32 %v3748_v63, %v2114_v10  ;;  %v2105_v17 = vmul.f32 %v4566_v4, %v5304_v16  ;;  %v2439_v26 = vpop.f32.mrb[44].mxu0  ;;  %v2444_v4 = vld [vmem:[%s5846_s1 + $0x8] sm:$0xff]  ;;  %v2447_v23 = vld [vmem:[%s5846_s1 + $0x20] sm:$0xf] }
 0x955   : > { %4571 = vrsqrt.f32 %v2098_v14  ;;  %v4395_v24 = vpack.c.bf16 %v2435_v22, %v2430_v20  ;;  %v5395_v28 = vadd.f32 %v3759_v8, %v2439_v26  ;;  %v4176_v29 = vpop.f32.mrb[45].mxu0 }
 0x956   : > { %4146 = vmatmul.mubr.msk.f32.vlgmr.msra.gmra.mrb[36].mxu1 %vm1058_vm14, %v5348_v32  ;;  %v2115_v34 = vmul.f32 %v3747_v59, %v2105_v17 }
 0x957   : > { %v4568_v51 = vpop.eup %4567  ;;  %4148 = vmatprep.mubr.msk.f32.mxu1 %vm4652_vm0, %v4651_v1  ;;  %4397 = vmatpush3.bf16.xpose.msk.msra.mxu0 %vm5015_vm10, %v4395_v24 }
 0x958   : > { %v5355_v55 = vadd.f32 %v3748_v63, %v2115_v34  ;;  %v2106_v61 = vmul.f32 %v4568_v51, %v5309_v3  ;;  %4434 = vmatpush3.bf16.xpose.msk.msra.mxu1 %vm5015_vm10, %v4395_v24  ;;  %4181 = vmatprep.subr.mxu0 %v4651_v1 }
 0x959   : > { %4433 = vmatprep.subr.mxu1 %v4651_v1  ;;  %2757 = vrot.lane.b32.xlu0 %v5395_v28, %s5845_s3 }
 0x95a   : > { %4149 = vmatmul.mubr.msk.f32.gmra.mrb[38].mxu1 %vm1058_vm14, %v5355_v55  ;;  %v2116_v5 = vmul.f32 %v3747_v59, %v2106_v61 }
 0x95b   : > { %v4570_v7 = vpop.eup %4569  ;;  %4151 = vmatprep.mubr.msk.f32.mxu1 %vm4652_vm0, %v4651_v1 }
 0x95c   : > { %v5365_v12 = vadd.f32 %v3748_v63, %v2116_v5  ;;  %v2107_v13 = vmul.f32 %v4570_v7, %v5314_v19  ;;  %v5377_v19 = vpack.i.bf16 %v2435_v22, %v2430_v20  ;;  %v2445_v5 = vld [vmem:[%s5846_s1 + $0x10] sm:$0xff] }
 0x95e   : > { %4152 = vmatmul.mubr.msk.f32.gmra.mrb[40].mxu1 %vm1058_vm14, %v5365_v12  ;;  %v2117_v16 = vmul.f32 %v3747_v59, %v2107_v13  ;;  %4499 = vrot.lane.b32.xlu1 %v5377_v19, %s5845_s3 }
 0x95f   : > { %v4572_v25 = vpop.eup %4571  ;;  %4154 = vmatprep.mubr.msk.f32.mxu1 %vm4652_vm0, %v4651_v1  ;;  %4182 = vmatpush3.xpose.msk.msra.mxu0 %vm1282_vm9, %v5395_v28 }
 0x960   : > { %v5372_v18 = vadd.f32 %v3748_v63, %v2117_v16  ;;  %v2108_v3 = vmul.f32 %v4572_v25, %v5319_v30  ;;  %4435 = vmatpush3.xpose.msk.msra.mxu1 %vm1282_vm9, %v5395_v28  ;;  %4401 = vmatprep.subr.bf16.mxu0 %v4654_v40  ;;  %v2446_v16 = vld [vmem:[%s5846_s1 + $0x18] sm:$0xff]  ;;  %s5849_s1 = smov 16  }
 0x961   : > { %4398 = vmatprep.subr.bf16.mxu1 %v4654_v40 }
 0x962   : > { %4155 = vmatmul.mubr.msk.f32.gmra.mrb[42].mxu1 %vm1058_vm14, %v5372_v18  ;;  %v2118_v11 = vmul.f32 %v3747_v59, %v2108_v3 }
 0x963   : > { %4157 = vmatprep.mubr.msk.f32.mxu1 %vm4652_vm0, %v4651_v1 }
 0x964   : > { %v5381_v27 = vadd.f32 %v3748_v63, %v2118_v11 }
 0x966   : > { %4158 = vmatmul.mubr.msk.f32.gmra.mrb[44].mxu1 %vm1058_vm14, %v5381_v27 }
 0x967   : > { %4192 = vmatprep.mubr.msk.f32.mxu1 %vm4652_vm0, %v4651_v1 }
 0x9cb   : > { %v2758_v48 = vpop.permute.xlu0 %2757 }
 0x9d0   : > { %v4500_v30 = vpop.permute.xlu1 %4499 }
 0x9d1   : > { %v4502_v31 = vunpack.i.h.bf16 %v4500_v30  ;;  %v4501_v33 = vunpack.i.l.bf16 %v4500_v30 }
 0x9d3   : > { %v4402_v37 = vpack.c.bf16 %v4502_v31, %v4501_v33 }
 0xa29   : > { %v2319_v36 = vpop.f32.mrb[36].mxu1 }
 0xa2a   : > { %v2320_v38 = vadd.f32 %v3753_v35, %v2319_v36  ;;  %v4147_v42 = vpop.f32.mrb[37].mxu1 }
 0xa2c   : > { %2743 = vrot.lane.b32.xlu1 %v2320_v38, %s5845_s3  ;;  %4184 = vmatmul.mubr.msk.f32.vlgmr.msra.gmra.mrb[46].mxu0 %vm1282_vm9, %v2320_v38 }
 0xa2d   : > { %v2324_v41 = vpop.f32.mrb[38].mxu1  ;;  %4186 = vmatprep.mubr.msk.f32.mxu0 %vm4652_vm0, %v4651_v1  ;;  %4404 = vmatpush3.bf16.xpose.msk.msra.mxu0 %vm5015_vm10, %v4402_v37 }
 0xa2e   : > { %v2325_v43 = vadd.f32 %v3753_v35, %v2324_v41  ;;  %v4150_v44 = vpop.f32.mrb[39].mxu1  ;;  %4223 = vmatprep.subr.mxu0 %v4651_v1 }
 0xa30   : > { %2745 = vrot.lane.b32.xlu1 %v2325_v43, %s5845_s3  ;;  %4187 = vmatmul.mubr.msk.f32.gmra.mrb[48].mxu0 %vm1282_vm9, %v2325_v43 }
 0xa31   : > { %v2329_v45 = vpop.f32.mrb[40].mxu1  ;;  %4189 = vmatprep.mubr.msk.f32.mxu0 %vm4652_vm0, %v4651_v1 }
 0xa32   : > { %v2330_v47 = vadd.f32 %v3753_v35, %v2329_v45  ;;  %v4153_v46 = vpop.f32.mrb[41].mxu1 }
 0xa34   : > { %2747 = vrot.lane.b32.xlu0 %v2330_v47, %s5845_s3  ;;  %4190 = vmatmul.mubr.msk.f32.gmra.mrb[50].mxu0 %vm1282_vm9, %v2330_v47 }
 0xa35   : > { %v2334_v39 = vpop.f32.mrb[42].mxu1  ;;  %4224 = vmatpush3.xpose.msk.msra.mxu0 %vm1282_vm9, %v2758_v48  ;;  %4225 = vmatprep.mubr.msk.f32.mxu0 %vm4652_vm0, %v4651_v1 }
 0xa36   : > { %v2335_v49 = vadd.f32 %v3753_v35, %v2334_v39  ;;  %v4156_v50 = vpop.f32.mrb[43].mxu1  ;;  %4408 = vmatprep.subr.bf16.mxu0 %v4654_v40 }
 0xa38   : > { %2749 = vrot.lane.b32.xlu1 %v2335_v49, %s5845_s3  ;;  %4193 = vmatmul.mubr.msk.f32.vlgmr.msra.gmra.mrb[46].mxu1 %vm1282_vm9, %v2335_v49 }
 0xa39   : > { %v2339_v52 = vpop.f32.mrb[44].mxu1  ;;  %4195 = vmatprep.mubr.msk.f32.mxu1 %vm4652_vm0, %v4651_v1 }
 0xa3a   : > { %v2340_v53 = vadd.f32 %v3753_v35, %v2339_v52  ;;  %v4159_v54 = vpop.f32.mrb[45].mxu1 }
 0xa3c   : > { %2751 = vrot.lane.b32.xlu0 %v2340_v53, %s5845_s3  ;;  %4196 = vmatmul.mubr.msk.f32.gmra.mrb[48].mxu1 %vm1282_vm9, %v2340_v53  ;;  %s5848_s3 = smov 80  }
 0xa3d   : > { %4204 = vmatprep.mubr.msk.f32.mxu1 %vm4652_vm0, %v4651_v1 }
 0xa9e   : > { %v2744_v56 = vpop.permute.xlu1 %2743 }
 0xa9f   : > { %4226 = vmatmul.mubr.msk.f32.vlgmr.msra.gmra.mrb[52].mxu0 %vm1282_vm9, %v2744_v56 }
 0xaa0   : > { %4228 = vmatprep.mubr.msk.f32.mxu0 %vm4652_vm0, %v4651_v1 }
 0xaa2   : > { %v2746_v57 = vpop.permute.xlu1 %2745 }
 0xaa3   : > { %4229 = vmatmul.mubr.msk.f32.gmra.mrb[54].mxu0 %vm1282_vm9, %v2746_v57 }
 0xaa4   : > { %4231 = vmatprep.mubr.msk.f32.mxu0 %vm4652_vm0, %v4651_v1 }
 0xaa6   : > { %v2748_v2 = vpop.permute.xlu0 %2747 }
 0xaa7   : > { %4232 = vmatmul.mubr.msk.f32.gmra.mrb[56].mxu0 %vm1282_vm9, %v2748_v2 }
 0xaa8   : > { %4234 = vmatprep.mubr.msk.f32.mxu0 %vm4652_vm0, %v4651_v1 }
 0xaaa   : > { %v2750_v58 = vpop.permute.xlu1 %2749 }
 0xaab   : > { %4235 = vmatmul.mubr.msk.f32.gmra.mrb[58].mxu0 %vm1282_vm9, %v2750_v58 }
 0xaac   : > { %4237 = vmatprep.mubr.msk.f32.mxu0 %vm4652_vm0, %v4651_v1 }
 0xaae   : > { %v2752_v59 = vpop.permute.xlu0 %2751 }
 0xaaf   : > { %4238 = vmatmul.mubr.msk.f32.gmra.mrb[60].mxu0 %vm1282_vm9, %v2752_v59 }
 0xab0   : > { %4269 = vmatprep.mubr.msk.f32.mxu0 %vm4652_vm0, %v4651_v1 }
 0xaff   : > { %v2538_v60 = vpop.f32.mrb[46].mxu0 }
 0xb00   : > { %v2562_v6 = vmul.f32 0.25, %v2538_v60  ;;  %v4185_v63 = vpop.f32.mrb[47].mxu0 }
 0xb02   : > { %v5451_v0 = vadd.f32 %v2562_v6, %v2443_v62 }
 0xb03   : > { %v2543_v10 = vpop.f32.mrb[48].mxu0 }
 0xb04   : > { %v2563_v14 = vmul.f32 0.25, %v2543_v10  ;;  %v4188_v17 = vpop.f32.mrb[49].mxu0  ;;  %v2573_v34 = vsel %vm2572_vm3, %v5451_v0, -inf }
 0xb05   : > { %2574 = vmax.xlane.f32.xlu1 %v2573_v34 }
 0xb06   : > { %v5458_v51 = vadd.f32 %v2563_v14, %v2444_v4 }
 0xb07   : > { %v2548_v61 = vpop.f32.mrb[50].mxu0 }
 0xb08   : > { %v2564_v7 = vmul.f32 0.25, %v2548_v61  ;;  %v4191_v8 = vpop.f32.mrb[51].mxu0  ;;  %v2576_v9 = vsel %vm2572_vm3, %v5458_v51, -inf }
 0xb09   : > { %2577 = vmax.xlane.f32.xlu0 %v2576_v9 }
 0xb0a   : > { %v2569_v13 = vadd.f32 %v2564_v7, %v2445_v5 }
 0xb0b   : > { %v2553_v15 = vpop.f32.mrb[46].mxu1 }
 0xb0c   : > { %v2565_v20 = vmul.f32 0.25, %v2553_v15  ;;  %v4194_v25 = vpop.f32.mrb[47].mxu1  ;;  %v2579_v21 = vsel %vm2572_vm3, %v2569_v13, -inf }
 0xb0d   : > { %2580 = vmax.xlane.f32.xlu0 %v2579_v21 }
 0xb0e   : > { %v2570_v3 = vadd.f32 %v2565_v20, %v2446_v16 }
 0xb0f   : > { %v2558_v22 = vpop.f32.mrb[48].mxu1 }
 0xb10   : > { %v2566_v11 = vmul.f32 0.25, %v2558_v22  ;;  %v4197_v24 = vpop.f32.mrb[49].mxu1  ;;  %v2582_v26 = vsel %vm2572_vm3, %v2570_v3, -inf }
 0xb11   : > { %2583 = vmax.xlane.f32.xlu1 %v2582_v26 }
 0xb12   : > { %v2571_v29 = vadd.f32 %v2566_v11, %v2447_v23 }
 0xb14   : > { %v2586_v30 = vsel %vm2585_vm4, %v2571_v29, -inf }
 0xb15   : > { %2587 = vmax.xlane.f32.xlu0 %v2586_v30 }
 0xb72   : > { %v2841_v31 = vpop.f32.mrb[52].mxu0 }
 0xb73   : > { %v2865_v33 = vmul.f32 0.25, %v2841_v31  ;;  %v4227_v35 = vpop.f32.mrb[53].mxu0 }
 0xb75   : > { %v5474_v36 = vadd.f32 %v2865_v33, %v2443_v62 }
 0xb76   : > { %v2846_v37 = vpop.f32.mrb[54].mxu0 }
 0xb77   : > { %v2866_v38 = vmul.f32 0.25, %v2846_v37  ;;  %v4230_v42 = vpop.f32.mrb[55].mxu0  ;;  %v2875_v41 = vsel %vm2572_vm3, %v5474_v36, -inf }
 0xb78   : > { %2876 = vmax.xlane.f32.xlu1 %v2875_v41 }
 0xb79   : > { %v5478_v43 = vadd.f32 %v2866_v38, %v2444_v4 }
 0xb7a   : > { %v2851_v44 = vpop.f32.mrb[56].mxu0 }
 0xb7b   : > { %v2867_v45 = vmul.f32 0.25, %v2851_v44  ;;  %v4233_v47 = vpop.f32.mrb[57].mxu0  ;;  %v2878_v46 = vsel %vm2572_vm3, %v5478_v43, -inf }
 0xb7c   : > { %2879 = vmax.xlane.f32.xlu0 %v2878_v46 }
 0xb7d   : > { %v2872_v48 = vadd.f32 %v2867_v45, %v2445_v5 }
 0xb7e   : > { %v2856_v39 = vpop.f32.mrb[58].mxu0 }
 0xb7f   : > { %v2868_v49 = vmul.f32 0.25, %v2856_v39  ;;  %v4236_v50 = vpop.f32.mrb[59].mxu0  ;;  %v2881_v52 = vsel %vm2572_vm3, %v2872_v48, -inf }
 0xb80   : > { %2882 = vmax.xlane.f32.xlu1 %v2881_v52 }
 0xb81   : > { %v2873_v53 = vadd.f32 %v2868_v49, %v2446_v16 }
 0xb82   : > { %v2861_v54 = vpop.f32.mrb[60].mxu0 }
 0xb83   : > { %v2869_v56 = vmul.f32 0.25, %v2861_v54  ;;  %v4239_v57 = vpop.f32.mrb[61].mxu0  ;;  %v2884_v2 = vsel %vm2572_vm3, %v2873_v53, -inf }
 0xb84   : > { %2885 = vmax.xlane.f32.xlu0 %v2884_v2 }
 0xb85   : > { %v2874_v58 = vadd.f32 %v2869_v56, %v2447_v23 }
 0xb87   : > { %v2887_v59 = vsel %vm2585_vm4, %v2874_v58, -inf }
 0xb88   : > { %2888 = vmax.xlane.f32.xlu1 %v2887_v59 }
 0xb92   : > { %v2575_v62 = vpop.xlane.xlu1 %2574 }
 0xb93   : > { %v2589_v6 = vsub.f32 %v5451_v0, %v2575_v62 }
 0xb95   : > { %v2594_v4 = vmul.f32 1.442695, %v2589_v6 }
 0xb96   : > { %v2578_v60 = vpop.xlane.xlu0 %2577 }
 0xb97   : > { %v2590_v10 = vsub.f32 %v5458_v51, %v2578_v60  ;;  %4573 = vpow2.f32 %v2594_v4 }
 0xb99   : > { %4504 = vrot.lane.b32.xlu1 %v5377_v19, %s5847_s11  ;;  %v2596_v61 = vmul.f32 1.442695, %v2590_v10 }
 0xb9a   : > { %2633 = vrot.lane.b32.xlu0 %v5395_v28, %s5847_s11  ;;  %v2581_v63 = vpop.xlane.xlu0 %2580 }
 0xb9b   : > { %v2591_v14 = vsub.f32 %v2569_v13, %v2581_v63  ;;  %4575 = vpow2.f32 %v2596_v61 }
 0xb9d   : > { %v2598_v7 = vmul.f32 1.442695, %v2591_v14 }
 0xb9e   : > { %v2584_v17 = vpop.xlane.xlu1 %2583 }
 0xb9f   : > { %v2592_v5 = vsub.f32 %v2570_v3, %v2584_v17  ;;  %4577 = vpow2.f32 %v2598_v7 }
 0xba1   : > { %v2600_v9 = vmul.f32 1.442695, %v2592_v5  ;;  %v5491_v16 = vpop.eup %4573 }
 0xba2   : > { %v2588_v34 = vpop.xlane.xlu0 %2587  ;;  %v2604_v51 = vsel %vm2572_vm3, %v5491_v16, 0.0 }
 0xba3   : > { %v2593_v8 = vsub.f32 %v2571_v29, %v2588_v34  ;;  %4579 = vpow2.f32 %v2600_v9 }
 0xba5   : > { %v2602_v15 = vmul.f32 1.442695, %v2593_v8  ;;  %v5493_v0 = vpop.eup %4575 }
 0xba6   : > { %v2607_v21 = vsel %vm2572_vm3, %v5493_v0, 0.0 }
 0xba7   : > { %4581 = vpow2.f32 %v2602_v15 }
 0xba9   : > { %v5497_v13 = vpop.eup %4577 }
 0xbaa   : > { %v2610_v25 = vsel %vm2572_vm3, %v5497_v13, 0.0 }
 0xbad   : > { %v5499_v20 = vpop.eup %4579 }
 0xbae   : > { %v2613_v23 = vsel %vm2572_vm3, %v5499_v20, 0.0 }
 0xbb1   : > { %v5505_v3 = vpop.eup %4581 }
 0xbb2   : > { %v2616_v22 = vsel %vm2585_vm4, %v5505_v3, 0.0 }
 0xbb9   : > { %2605 = vadd.xlane.f32.xlu0 %v2604_v51 }
 0xbbd   : > { %2611 = vadd.xlane.f32.xlu0 %v2610_v25  ;;  %2608 = vadd.xlane.f32.xlu1 %v2607_v21 }
 0xbc1   : > { %2617 = vadd.xlane.f32.xlu0 %v2616_v22  ;;  %2614 = vadd.xlane.f32.xlu1 %v2613_v23 }
 0xc05   : > { %v2877_v11 = vpop.xlane.xlu1 %2876 }
 0xc06   : > { %v2890_v24 = vsub.f32 %v5474_v36, %v2877_v11 }
 0xc08   : > { %v2895_v26 = vmul.f32 1.442695, %v2890_v24 }
 0xc09   : > { %v2880_v29 = vpop.xlane.xlu0 %2879 }
 0xc0a   : > { %4583 = vpow2.f32 %v2895_v26  ;;  %v2891_v30 = vsub.f32 %v5478_v43, %v2880_v29 }
 0xc0c   : > { %v2897_v31 = vmul.f32 1.442695, %v2891_v30 }
 0xc0d   : > { %v2883_v33 = vpop.xlane.xlu1 %2882 }
 0xc0e   : > { %4585 = vpow2.f32 %v2897_v31  ;;  %v2892_v35 = vsub.f32 %v2872_v48, %v2883_v33 }
 0xc10   : > { %v2899_v37 = vmul.f32 1.442695, %v2892_v35 }
 0xc11   : > { %v2886_v38 = vpop.xlane.xlu0 %2885 }
 0xc12   : > { %4587 = vpow2.f32 %v2899_v37  ;;  %v2893_v42 = vsub.f32 %v2873_v53, %v2886_v38  ;;  %v3069_v37 = vld [vmem:[%s5785_s20] sm:$0xff]  ;;  %v3070_v38 = vld [vmem:[%s5785_s20 + $0x8] sm:$0xff] }
 0xc14   : > { %v5513_v41 = vpop.eup %4583  ;;  %v2901_v44 = vmul.f32 1.442695, %v2893_v42  ;;  %v3071_v42 = vld [vmem:[%s5785_s20 + $0x10] sm:$0xff] }
 0xc15   : > { %v2889_v45 = vpop.xlane.xlu1 %2888  ;;  %v2905_v36 = vsel %vm2572_vm3, %v5513_v41, 0.0  ;;  %v2634_v57 = vpop.permute.xlu0 %2633 }
 0xc16   : > { %4589 = vpow2.f32 %v2901_v44  ;;  %v2894_v47 = vsub.f32 %v2874_v58, %v2889_v45  ;;  %2906 = vadd.xlane.f32.xlu0 %v2905_v36  ;;  %v3072_v44 = vld [vmem:[%s5785_s20 + $0x18] sm:$0xff] }
 0xc18   : > { %v5517_v46 = vpop.eup %4585  ;;  %v2903_v43 = vmul.f32 1.442695, %v2894_v47  ;;  %v4412_v47 = vpack.c.bf16 %v3072_v44, %v3071_v42 }
 0xc19   : > { %v4505_v39 = vpop.permute.xlu1 %4504  ;;  %v2908_v48 = vsel %vm2572_vm3, %v5517_v46, 0.0 }
 0xc1a   : > { %4591 = vpow2.f32 %v2903_v43  ;;  %v4507_v49 = vunpack.i.h.bf16 %v4505_v39  ;;  %v4506_v50 = vunpack.i.l.bf16 %v4505_v39  ;;  %2909 = vadd.xlane.f32.xlu0 %v2908_v48 }
 0xc1c   : > { %v5521_v52 = vpop.eup %4587  ;;  %v4399_v53 = vpack.c.bf16 %v4507_v49, %v4506_v50 }
 0xc1d   : > { %v2911_v54 = vsel %vm2572_vm3, %v5521_v52, 0.0 }
 0xc1e   : > { %2912 = vadd.xlane.f32.xlu1 %v2911_v54  ;;  %4400 = vmatpush3.bf16.msra.mxu1 %v4399_v53 }
 0xc1f   : > { %4202 = vmatprep.subr.mxu1 %v4651_v1 }
 0xc20   : > { %v5526_v56 = vpop.eup %4589 }
 0xc21   : > { %v2914_v2 = vsel %vm2572_vm3, %v5526_v56, 0.0 }
 0xc22   : > { %2915 = vadd.xlane.f32.xlu0 %v2914_v2  ;;  %4203 = vmatpush3.msra.mxu1 %v2634_v57 }
 0xc23   : > { %4405 = vmatprep.subr.bf16.mxu1 %v4654_v40 }
 0xc24   : > { %v5531_v58 = vpop.eup %4591 }
 0xc25   : > { %v2917_v59 = vsel %vm2585_vm4, %v5531_v58, 0.0 }
 0xc26   : > { %2918 = vadd.xlane.f32.xlu1 %v2917_v59 }
 0xc37   : > { %4509 = vrot.lane.b32.xlu1 %v5377_v19, %s5848_s3 }
 0xc38   : > { %2934 = vrot.lane.b32.xlu0 %v5395_v28, %s5848_s3  ;;  %s5850_s3 = smul.u32 40, %s5852_s5 }
 0xc3a   : > { %s845_s4 = scalar_lea.vmem %s5793_s28, %s5850_s3 }
 0xc46   : > { %v2606_v60 = vpop.xlane.xlu0 %2605 }
 0xc47   : > { %4593 = vrcp.f32 %v2606_v60 }
 0xc4a   : > { %v2609_v62 = vpop.xlane.xlu1 %2608  ;;  %v2612_v6 = vpop.xlane.xlu0 %2611 }
 0xc4b   : > { %4595 = vrcp.f32 %v2609_v62 }
 0xc4c   : > { %4597 = vrcp.f32 %v2612_v6 }
 0xc4e   : > { %v2615_v63 = vpop.xlane.xlu1 %2614  ;;  %v2618_v14 = vpop.xlane.xlu0 %2617 }
 0xc4f   : > { %4599 = vrcp.f32 %v2615_v63 }
 0xc50   : > { %4601 = vrcp.f32 %v2618_v14 }
 0xc51   : > { %v4594_v10 = vpop.eup %4593 }
 0xc52   : > { %v2620_v4 = vmul.f32 %v4594_v10, %v5491_v16 }
 0xc54   : > { %4205 = vmatmul.mubr.msk.f32.vlgmr.msra.gmra.mrb[50].mxu1 %vm2572_vm3, %v2620_v4 }
 0xc55   : > { %4207 = vmatprep.mubr.msk.f32.mxu1 %vm4652_vm0, %v4651_v1  ;;  %v4596_v19 = vpop.eup %4595 }
 0xc56   : > { %v2622_v28 = vmul.f32 %v4596_v19, %v5493_v0  ;;  %v4598_v17 = vpop.eup %4597 }
 0xc57   : > { %v2624_v34 = vmul.f32 %v4598_v17, %v5497_v13 }
 0xc58   : > { %4208 = vmatmul.mubr.msk.f32.gmra.mrb[52].mxu1 %vm2572_vm3, %v2622_v28 }
 0xc59   : > { %4210 = vmatprep.mubr.msk.f32.mxu1 %vm4652_vm0, %v4651_v1  ;;  %v4600_v61 = vpop.eup %4599 }
 0xc5a   : > { %v2626_v5 = vmul.f32 %v4600_v61, %v5499_v20  ;;  %v4602_v7 = vpop.eup %4601 }
 0xc5b   : > { %v2628_v8 = vmul.f32 %v4602_v7, %v5505_v3 }
 0xc5c   : > { %4211 = vmatmul.mubr.msk.f32.gmra.mrb[54].mxu1 %vm2572_vm3, %v2624_v34 }
 0xc5d   : > { %4213 = vmatprep.mubr.msk.f32.mxu1 %vm4652_vm0, %v4651_v1 }
 0xc60   : > { %4214 = vmatmul.mubr.msk.f32.gmra.mrb[56].mxu1 %vm2572_vm3, %v2626_v5 }
 0xc61   : > { %4216 = vmatprep.mubr.msk.f32.mxu1 %vm4652_vm0, %v4651_v1 }
 0xc64   : > { %4217 = vmatmul.mubr.msk.f32.gmra.mrb[58].mxu1 %vm2572_vm3, %v2628_v8  ;;  %v3789_v8 = vld [vmem:[%s5786_s21] ss:$0 sm:$0xff] }
 0xc65   : > { %4246 = vmatprep.mubr.msk.f32.mxu1 %vm4652_vm0, %v4651_v1 }
 0xca3   : > { %v2907_v9 = vpop.xlane.xlu0 %2906 }
 0xca4   : > { %4603 = vrcp.f32 %v2907_v9 }
 0xca7   : > { %v2910_v16 = vpop.xlane.xlu0 %2909 }
 0xca8   : > { %4605 = vrcp.f32 %v2910_v16 }
 0xcab   : > { %v2913_v15 = vpop.xlane.xlu1 %2912 }
 0xcac   : > { %4607 = vrcp.f32 %v2913_v15 }
 0xcae   : > { %v4604_v22 = vpop.eup %4603 }
 0xcaf   : > { %v2916_v25 = vpop.xlane.xlu0 %2915  ;;  %v2921_v3 = vmul.f32 %v4604_v22, %v5513_v41  ;;  %v4409_v41 = vpack.c.bf16 %v3070_v38, %v3069_v37 }
 0xcb0   : > { %4609 = vrcp.f32 %v2916_v25 }
 0xcb1   : > { %4410 = vmatpush3.bf16.msra.mxu0 %v4409_v41 }
 0xcb2   : > { %v4606_v11 = vpop.eup %4605  ;;  %4411 = vmatprep.subr.bf16.mxu0 %v4654_v40 }
 0xcb3   : > { %v2919_v0 = vpop.xlane.xlu1 %2918  ;;  %v2935_v23 = vpop.permute.xlu0 %2934  ;;  %v2923_v24 = vmul.f32 %v4606_v11, %v5517_v46 }
 0xcb4   : > { %4611 = vrcp.f32 %v2919_v0 }
 0xcb5   : > { %4413 = vmatpush3.bf16.msra.mxu0 %v4412_v47 }
 0xcb6   : > { %v4608_v26 = vpop.eup %4607  ;;  %4420 = vmatprep.subr.bf16.mxu0 %v4654_v40 }
 0xcb7   : > { %v4510_v51 = vpop.permute.xlu1 %4509  ;;  %v2925_v29 = vmul.f32 %v4608_v26, %v5521_v52 }
 0xcb8   : > { %v4512_v13 = vunpack.i.h.bf16 %v4510_v51  ;;  %v4511_v20 = vunpack.i.l.bf16 %v4510_v51 }
 0xcba   : > { %v4406_v21 = vpack.c.bf16 %v4512_v13, %v4511_v20  ;;  %v4610_v30 = vpop.eup %4609 }
 0xcbb   : > { %v2927_v31 = vmul.f32 %v4610_v30, %v5526_v56 }
 0xcbc   : > { %4407 = vmatpush3.bf16.msra.mxu1 %v4406_v21 }
 0xcbd   : > { %4244 = vmatprep.subr.mxu1 %v4651_v1 }
 0xcbe   : > { %v4612_v33 = vpop.eup %4611 }
 0xcbf   : > { %v2929_v35 = vmul.f32 %v4612_v33, %v5531_v58 }
 0xcc0   : > { %4245 = vmatpush3.msra.mxu1 %v2935_v23 }
 0xcc1   : > { %4247 = vmatmul.mubr.msk.f32.vlgmr.msra.gmra.mrb[60].mxu1 %vm2572_vm3, %v2921_v3  ;;  %4414 = vmatprep.subr.bf16.mxu1 %v4654_v40 }
 0xcc2   : > { %4249 = vmatprep.mubr.msk.f32.mxu1 %vm4652_vm0, %v4651_v1 }
 0xcc5   : > { %4250 = vmatmul.mubr.msk.f32.gmra.mrb[62].mxu1 %vm2572_vm3, %v2923_v24 }
 0xcc6   : > { %4252 = vmatprep.mubr.msk.f32.mxu1 %vm4652_vm0, %v4651_v1 }
 0xcc9   : > { %4253 = vmatmul.mubr.msk.f32.gmra.mrb[64].mxu1 %vm2572_vm3, %v2925_v29 }
 0xcca   : > { %4255 = vmatprep.mubr.msk.f32.mxu1 %vm4652_vm0, %v4651_v1 }
 0xccd   : > { %4256 = vmatmul.mubr.msk.f32.gmra.mrb[66].mxu1 %vm2572_vm3, %v2927_v31 }
 0xcce   : > { %4258 = vmatprep.mubr.msk.f32.mxu1 %vm4652_vm0, %v4651_v1 }
 0xcd1   : > { %4259 = vmatmul.mubr.msk.f32.gmra.mrb[68].mxu1 %vm2572_vm3, %v2929_v35 }
 0xcd2   : > { %4292 = vmatprep.mubr.msk.f32.mxu1 %vm4652_vm0, %v4651_v1 }
 0xd27   : > { %v2719_v45 = vpop.f32.mrb[50].mxu1 }
 0xd28   : > { %v4206_v36 = vpop.f32.mrb[51].mxu1 }
 0xd2b   : > { %v2724_v46 = vpop.f32.mrb[52].mxu1 }
 0xd2c   : > { %v4209_v43 = vpop.f32.mrb[53].mxu1 }
 0xd2f   : > { %v2729_v39 = vpop.f32.mrb[54].mxu1 }
 0xd30   : > { %v4212_v48 = vpop.f32.mrb[55].mxu1 }
 0xd33   : > { %v2734_v49 = vpop.f32.mrb[56].mxu1 }
 0xd34   : > { %v4215_v50 = vpop.f32.mrb[57].mxu1 }
 0xd37   : > { %v2739_v52 = vpop.f32.mrb[58].mxu1 }
 0xd38   : > { %v4218_v53 = vpop.f32.mrb[59].mxu1 }
 0xd94   : > { %v3020_v54 = vpop.f32.mrb[60].mxu1 }
 0xd95   : > { %3049 = vrot.lane.b32.xlu1 %v3020_v54, %s5849_s1  ;;  %v4248_v56 = vpop.f32.mrb[61].mxu1 }
 0xd98   : > { %v3025_v57 = vpop.f32.mrb[62].mxu1 }
 0xd99   : > { %3051 = vrot.lane.b32.xlu1 %v3025_v57, %s5849_s1  ;;  %v4251_v2 = vpop.f32.mrb[63].mxu1 }
 0xd9c   : > { %v3030_v58 = vpop.f32.mrb[64].mxu1 }
 0xd9d   : > { %3053 = vrot.lane.b32.xlu1 %v3030_v58, %s5849_s1  ;;  %v4254_v59 = vpop.f32.mrb[65].mxu1 }
 0xda0   : > { %v3035_v60 = vpop.f32.mrb[66].mxu1 }
 0xda1   : > { %3055 = vrot.lane.b32.xlu0 %v3035_v60, %s5849_s1  ;;  %v4257_v62 = vpop.f32.mrb[67].mxu1 }
 0xda4   : > { %v3040_v6 = vpop.f32.mrb[68].mxu1 }
 0xda5   : > { %3057 = vrot.lane.b32.xlu1 %v3040_v6, %s5849_s1  ;;  %v4260_v63 = vpop.f32.mrb[69].mxu1 }
 0xda6   : > { %v3275_v63 = vld [vmem:[%s5788_s23] sm:$0xff] }
 0xe07   : > { %v3050_v10 = vpop.permute.xlu1 %3049 }
 0xe08   : > { %v3064_v4 = vsel %vm1282_vm9, %v2719_v45, %v3050_v10  ;;  %v3276_v10 = vld [vmem:[%s5788_s23 + $0x8] sm:$0xff] }
 0xe09   : > { %4270 = vmatmul.mubr.msk.f32.vlgmr.msra.gmra.mrb[62].mxu0 %vm1058_vm14, %v3064_v4  ;;  %v4415_v4 = vpack.c.bf16 %v3276_v10, %v3275_v63 }
 0xe0a   : > { %4272 = vmatprep.mubr.msk.f32.mxu0 %vm4652_vm0, %v4651_v1 }
 0xe0b   : > { %v3052_v14 = vpop.permute.xlu1 %3051  ;;  %4416 = vmatpush3.bf16.msra.mxu1 %v4415_v4 }
 0xe0c   : > { %v3065_v19 = vsel %vm1282_vm9, %v2724_v46, %v3052_v14  ;;  %4417 = vmatprep.subr.bf16.mxu1 %v4654_v40  ;;  %v3277_v14 = vld [vmem:[%s5788_s23 + $0x10] sm:$0xff] }
 0xe0d   : > { %4273 = vmatmul.mubr.msk.f32.gmra.mrb[64].mxu0 %vm1058_vm14, %v3065_v19  ;;  %v3278_v19 = vld [vmem:[%s5788_s23 + $0x18] sm:$0xff] }
 0xe0e   : > { %4275 = vmatprep.mubr.msk.f32.mxu0 %vm4652_vm0, %v4651_v1 }
 0xe0f   : > { %v3054_v28 = vpop.permute.xlu1 %3053 }
 0xe10   : > { %v3066_v17 = vsel %vm1282_vm9, %v2729_v39, %v3054_v28  ;;  %v4418_v28 = vpack.c.bf16 %v3278_v19, %v3277_v14 }
 0xe11   : > { %4276 = vmatmul.mubr.msk.f32.gmra.mrb[66].mxu0 %vm1058_vm14, %v3066_v17 }
 0xe12   : > { %4278 = vmatprep.mubr.msk.f32.mxu0 %vm4652_vm0, %v4651_v1  ;;  %4419 = vmatpush3.bf16.msra.mxu1 %v4418_v28 }
 0xe13   : > { %v3056_v34 = vpop.permute.xlu0 %3055 }
 0xe14   : > { %v3067_v61 = vsel %vm1282_vm9, %v2734_v49, %v3056_v34 }
 0xe15   : > { %4279 = vmatmul.mubr.msk.f32.gmra.mrb[68].mxu0 %vm1058_vm14, %v3067_v61 }
 0xe16   : > { %4281 = vmatprep.mubr.msk.f32.mxu0 %vm4652_vm0, %v4651_v1 }
 0xe17   : > { %v3058_v5 = vpop.permute.xlu1 %3057 }
 0xe18   : > { %v3068_v7 = vsel %vm1282_vm9, %v2739_v52, %v3058_v5 }
 0xe19   : > { %4282 = vmatmul.mubr.msk.f32.gmra.mrb[70].mxu0 %vm1058_vm14, %v3068_v7 }
 0xe1a   : > { %4323 = vmatprep.mubr.msk.f32.mxu0 %vm4652_vm0, %v4651_v1 }
 0xedc   : > { %v3161_v9 = vpop.f32.mrb[62].mxu0 }
 0xedd   : > { %v3162_v15 = vadd.f32 %v3789_v8, %v3161_v9  ;;  %v4271_v16 = vpop.f32.mrb[63].mxu0 }
 0xedf   : > { %v3185_v0 = vadd.f32 %v3162_v15, %v5348_v32 }
 0xee0   : > { %v3166_v51 = vpop.f32.mrb[64].mxu0 }
 0xee1   : > { %v3167_v13 = vadd.f32 %v3789_v8, %v3166_v51  ;;  %v4274_v20 = vpop.f32.mrb[65].mxu0  ;;  %v3190_v25 = vsel %vm1058_vm14, %v3185_v0, 0.0 }
 0xee2   : > { %3191 = vadd.xlane.f32.xlu0 %v3190_v25  ;;  %v3795_v20 = vld [vmem:[%s5787_s22] ss:$0 sm:$0xff] }
 0xee3   : > { %v3186_v21 = vadd.f32 %v3167_v13, %v5355_v55 }
 0xee4   : > { %v3171_v22 = vpop.f32.mrb[66].mxu0 }
 0xee5   : > { %v3172_v3 = vadd.f32 %v3789_v8, %v3171_v22  ;;  %v4277_v23 = vpop.f32.mrb[67].mxu0  ;;  %v3193_v11 = vsel %vm1058_vm14, %v3186_v21, 0.0 }
 0xee6   : > { %3194 = vadd.xlane.f32.xlu1 %v3193_v11 }
 0xee7   : > { %v3187_v24 = vadd.f32 %v3172_v3, %v5365_v12  ;;  %v3796_v3 = vld [vmem:[%s5787_s22 + $0x1] ss:$0 sm:$0xff] }
 0xee8   : > { %v3176_v26 = vpop.f32.mrb[68].mxu0 }
 0xee9   : > { %v3177_v29 = vadd.f32 %v3789_v8, %v3176_v26  ;;  %v4280_v30 = vpop.f32.mrb[69].mxu0  ;;  %v3196_v32 = vsel %vm1058_vm14, %v3187_v24, 0.0 }
 0xeea   : > { %3197 = vadd.xlane.f32.xlu0 %v3196_v32 }
 0xeeb   : > { %v3188_v31 = vadd.f32 %v3177_v29, %v5372_v18 }
 0xeec   : > { %v3181_v33 = vpop.f32.mrb[70].mxu0 }
 0xeed   : > { %v3182_v35 = vadd.f32 %v3789_v8, %v3181_v33  ;;  %v4283_v37 = vpop.f32.mrb[71].mxu0  ;;  %v3199_v55 = vsel %vm1058_vm14, %v3188_v31, 0.0 }
 0xeee   : > { %3200 = vadd.xlane.f32.xlu0 %v3199_v55 }
 0xeef   : > { %v3189_v38 = vadd.f32 %v3182_v35, %v5381_v27 }
 0xef1   : > { %v3202_v42 = vsel %vm1071_vm8, %v3189_v38, 0.0 }
 0xef2   : > { %3203 = vadd.xlane.f32.xlu1 %v3202_v42 }
 0xf6f   : > { %v3192_v12 = vpop.xlane.xlu0 %3191 }
 0xf70   : > { %v3205_v41 = vmul.f32 0.03125, %v3192_v12 }
 0xf72   : > { %v3210_v44 = vsub.f32 %v3185_v0, %v3205_v41 }
 0xf73   : > { %v3195_v45 = vpop.xlane.xlu1 %3194 }
 0xf74   : > { %v3206_v36 = vmul.f32 0.03125, %v3195_v45  ;;  %v3215_v47 = vmul.f32 %v3210_v44, %v3210_v44 }
 0xf76   : > { %v3211_v46 = vsub.f32 %v3186_v21, %v3206_v36  ;;  %v3220_v18 = vsel %vm1058_vm14, %v3215_v47, 0.0 }
 0xf77   : > { %v3198_v43 = vpop.xlane.xlu0 %3197  ;;  %3221 = vadd.xlane.f32.xlu0 %v3220_v18  ;;  %v3417_v18 = vld [vmem:[%s5790_s25 + $0x8] sm:$0xff] }
 0xf78   : > { %v3207_v39 = vmul.f32 0.03125, %v3198_v43  ;;  %v3216_v48 = vmul.f32 %v3211_v46, %v3211_v46 }
 0xf7a   : > { %v3212_v49 = vsub.f32 %v3187_v24, %v3207_v39  ;;  %v3223_v50 = vsel %vm1058_vm14, %v3216_v48, 0.0  ;;  %v3418_v39 = vld [vmem:[%s5790_s25 + $0x10] sm:$0xff]  ;;  %v3419_v48 = vld [vmem:[%s5790_s25 + $0x18] sm:$0xff] }
 0xf7b   : > { %v3201_v27 = vpop.xlane.xlu0 %3200  ;;  %3224 = vadd.xlane.f32.xlu1 %v3223_v50  ;;  %v3420_v50 = vld [vmem:[%s5790_s25 + $0x20] sm:$0xff] }
 0xf7c   : > { %v3208_v52 = vmul.f32 0.03125, %v3201_v27  ;;  %v3217_v53 = vmul.f32 %v3212_v49, %v3212_v49  ;;  %v3421_v27 = vld [vmem:[%s5790_s25 + $0x28] sm:$0xff] }
 0xf7e   : > { %v3213_v54 = vsub.f32 %v3188_v31, %v3208_v52  ;;  %v3226_v56 = vsel %vm1058_vm14, %v3217_v53, 0.0  ;;  %v4427_v52 = vpack.c.bf16 %v3421_v27, %v3420_v50  ;;  %v3422_v53 = vld [vmem:[%s5790_s25 + $0x30] sm:$0xff] }
 0xf7f   : > { %3227 = vadd.xlane.f32.xlu0 %v3226_v56  ;;  %v3204_v57 = vpop.xlane.xlu1 %3203 }
 0xf80   : > { %v3209_v2 = vmul.f32 0.03125, %v3204_v57  ;;  %v3218_v58 = vmul.f32 %v3213_v54, %v3213_v54  ;;  %v3797_v57 = vld [vmem:[%s5789_s24] ss:$0 sm:$0xff] }
 0xf82   : > { %v3214_v59 = vsub.f32 %v3189_v38, %v3209_v2  ;;  %v3229_v60 = vsel %vm1058_vm14, %v3218_v58, 0.0 }
 0xf83   : > { %3230 = vadd.xlane.f32.xlu1 %v3229_v60 }
 0xf84   : > { %v3219_v62 = vmul.f32 %v3214_v59, %v3214_v59 }
 0xf86   : > { %v3232_v6 = vsel %vm1071_vm8, %v3219_v62, 0.0 }
 0xf87   : > { %3233 = vadd.xlane.f32.xlu0 %v3232_v6 }
0x1004   : > { %v3222_v17 = vpop.xlane.xlu0 %3221 }
0x1005   : > { %v3235_v34 = vmul.f32 0.03125, %v3222_v17 }
0x1007   : > { %v3240_v61 = vadd.f32 1e-12, %v3235_v34 }
0x1008   : > { %v3225_v5 = vpop.xlane.xlu1 %3224 }
0x1009   : > { %4613 = vrsqrt.f32 %v3240_v61  ;;  %v3236_v7 = vmul.f32 0.03125, %v3225_v5 }
0x100b   : > { %v3241_v8 = vadd.f32 1e-12, %v3236_v7 }
0x100c   : > { %v3228_v9 = vpop.xlane.xlu0 %3227 }
0x100d   : > { %4615 = vrsqrt.f32 %v3241_v8  ;;  %v3237_v15 = vmul.f32 0.03125, %v3228_v9 }
0x100f   : > { %v3242_v16 = vadd.f32 1e-12, %v3237_v15 }
0x1010   : > { %v3231_v0 = vpop.xlane.xlu1 %3230 }
0x1011   : > { %4617 = vrsqrt.f32 %v3242_v16  ;;  %v3238_v51 = vmul.f32 0.03125, %v3231_v0 }
0x1013   : > { %v4614_v13 = vpop.eup %4613  ;;  %v3243_v25 = vadd.f32 1e-12, %v3238_v51 }
0x1014   : > { %v3250_v21 = vmul.f32 %v4614_v13, %v3210_v44  ;;  %v3234_v22 = vpop.xlane.xlu0 %3233 }
0x1015   : > { %4619 = vrsqrt.f32 %v3243_v25  ;;  %v3239_v23 = vmul.f32 0.03125, %v3234_v22 }
0x1016   : > { %v3260_v11 = vmul.f32 %v3795_v20, %v3250_v21 }
0x1017   : > { %v4616_v24 = vpop.eup %4615  ;;  %v3244_v26 = vadd.f32 1e-12, %v3239_v23 }
0x1018   : > { %v5657_v29 = vadd.f32 %v3796_v3, %v3260_v11  ;;  %v3251_v30 = vmul.f32 %v4616_v24, %v3211_v46  ;;  %v3416_v46 = vld [vmem:[%s5790_s25] sm:$0xff] }
0x1019   : > { %4621 = vrsqrt.f32 %v3244_v26  ;;  %v4421_v43 = vpack.c.bf16 %v3417_v18, %v3416_v46 }
0x101a   : > { %4293 = vmatmul.mubr.msk.f32.vlgmr.msra.gmra.mrb[70].mxu1 %vm1058_vm14, %v5657_v29  ;;  %v3261_v32 = vmul.f32 %v3795_v20, %v3251_v30 }
0x101b   : > { %v4618_v31 = vpop.eup %4617  ;;  %4295 = vmatprep.mubr.msk.f32.mxu1 %vm4652_vm0, %v4651_v1  ;;  %4422 = vmatpush3.bf16.msra.mxu0 %v4421_v43 }
0x101c   : > { %v5663_v33 = vadd.f32 %v3796_v3, %v3261_v32  ;;  %v3252_v35 = vmul.f32 %v4618_v31, %v3212_v49  ;;  %4423 = vmatprep.subr.bf16.mxu0 %v4654_v40  ;;  %v4424_v49 = vpack.c.bf16 %v3419_v48, %v3418_v39 }
0x101e   : > { %4296 = vmatmul.mubr.msk.f32.gmra.mrb[72].mxu1 %vm1058_vm14, %v5663_v33  ;;  %v3262_v37 = vmul.f32 %v3795_v20, %v3252_v35 }
0x101f   : > { %v4620_v55 = vpop.eup %4619  ;;  %4298 = vmatprep.mubr.msk.f32.mxu1 %vm4652_vm0, %v4651_v1  ;;  %4425 = vmatpush3.bf16.msra.mxu0 %v4424_v49 }
0x1020   : > { %v5669_v38 = vadd.f32 %v3796_v3, %v3262_v37  ;;  %v3253_v42 = vmul.f32 %v4620_v55, %v3213_v54  ;;  %4426 = vmatprep.subr.bf16.mxu0 %v4654_v40  ;;  %v3423_v54 = vld [vmem:[%s5790_s25 + $0x38] sm:$0xff] }
0x1021   : > { %v4430_v56 = vpack.c.bf16 %v3423_v54, %v3422_v53 }
0x1022   : > { %4299 = vmatmul.mubr.msk.f32.gmra.mrb[74].mxu1 %vm1058_vm14, %v5669_v38  ;;  %v3263_v12 = vmul.f32 %v3795_v20, %v3253_v42  ;;  %v3803_v42 = vld [vmem:[%s5791_s26] ss:$0 sm:$0xff] }
0x1023   : > { %v4622_v41 = vpop.eup %4621  ;;  %4301 = vmatprep.mubr.msk.f32.mxu1 %vm4652_vm0, %v4651_v1  ;;  %4428 = vmatpush3.bf16.msra.mxu0 %v4427_v52 }
0x1024   : > { %v5675_v44 = vadd.f32 %v3796_v3, %v3263_v12  ;;  %v3254_v45 = vmul.f32 %v4622_v41, %v3214_v59  ;;  %4429 = vmatprep.subr.bf16.mxu0 %v4654_v40 }
0x1026   : > { %4302 = vmatmul.mubr.msk.f32.gmra.mrb[76].mxu1 %vm1058_vm14, %v5675_v44  ;;  %v3264_v36 = vmul.f32 %v3795_v20, %v3254_v45 }
0x1027   : > { %4304 = vmatprep.mubr.msk.f32.mxu1 %vm4652_vm0, %v4651_v1  ;;  %4431 = vmatpush3.bf16.msra.mxu0 %v4430_v56 }
0x1028   : > { %v5681_v47 = vadd.f32 %v3796_v3, %v3264_v36 }
0x102a   : > { %4305 = vmatmul.mubr.msk.f32.gmra.mrb[78].mxu1 %vm1058_vm14, %v5681_v47 }
0x10ed   : > { %v3367_v2 = vpop.f32.mrb[70].mxu1 }
0x10ee   : > { %v3368_v58 = vadd.f32 %v3797_v57, %v3367_v2  ;;  %v4294_v59 = vpop.f32.mrb[71].mxu1 }
0x10f0   : > { %v3396_v60 = vmul.f32 0.70710677, %v3368_v58  ;;  %v3391_v7 = vmul.f32 0.5, %v3368_v58 }
0x10f1   : > { %v3372_v62 = vpop.f32.mrb[72].mxu1 }
0x10f2   : > { %4623 = verf.f32 %v3396_v60  ;;  %v3373_v40 = vadd.f32 %v3797_v57, %v3372_v62  ;;  %v4297_v6 = vpop.f32.mrb[73].mxu1 }
0x10f4   : > { %v3397_v63 = vmul.f32 0.70710677, %v3373_v40  ;;  %v3392_v20 = vmul.f32 0.5, %v3373_v40 }
0x10f5   : > { %v3377_v10 = vpop.f32.mrb[74].mxu1 }
0x10f6   : > { %4625 = verf.f32 %v3397_v63  ;;  %v3378_v4 = vadd.f32 %v3797_v57, %v3377_v10  ;;  %v4300_v14 = vpop.f32.mrb[75].mxu1 }
0x10f8   : > { %v3398_v19 = vmul.f32 0.70710677, %v3378_v4  ;;  %v3393_v3 = vmul.f32 0.5, %v3378_v4 }
0x10f9   : > { %v3382_v28 = vpop.f32.mrb[76].mxu1 }
0x10fa   : > { %4627 = verf.f32 %v3398_v19  ;;  %v3383_v17 = vadd.f32 %v3797_v57, %v3382_v28  ;;  %v4303_v34 = vpop.f32.mrb[77].mxu1 }
0x10fc   : > { %v4624_v61 = vpop.eup %4623  ;;  %v3399_v5 = vmul.f32 0.70710677, %v3383_v17  ;;  %v3394_v26 = vmul.f32 0.5, %v3383_v17 }
0x10fd   : > { %v3406_v8 = vadd.f32 1.0, %v4624_v61  ;;  %v3387_v9 = vpop.f32.mrb[78].mxu1 }
0x10fe   : > { %4629 = verf.f32 %v3399_v5  ;;  %v3388_v15 = vadd.f32 %v3797_v57, %v3387_v9  ;;  %v4306_v16 = vpop.f32.mrb[79].mxu1 }
0x10ff   : > { %v3411_v0 = vmul.f32 %v3406_v8, %v3391_v7 }
0x1100   : > { %v4626_v51 = vpop.eup %4625  ;;  %v3400_v13 = vmul.f32 0.70710677, %v3388_v15  ;;  %v3395_v35 = vmul.f32 0.5, %v3388_v15 }
0x1101   : > { %v3407_v25 = vadd.f32 1.0, %v4626_v51  ;;  %4324 = vmatmul.mubr.msk.f32.vlgmr.msra.gmra.mrb[72].mxu0 %vm3431_vm5, %v3411_v0 }
0x1102   : > { %4631 = verf.f32 %v3400_v13  ;;  %4326 = vmatprep.mubr.msk.f32.mxu0 %vm4652_vm0, %v4651_v1 }
0x1103   : > { %v3412_v21 = vmul.f32 %v3407_v25, %v3392_v20 }
0x1104   : > { %v4628_v22 = vpop.eup %4627 }
0x1105   : > { %v3408_v23 = vadd.f32 1.0, %v4628_v22  ;;  %4327 = vmatmul.mubr.msk.f32.gmra.mrb[74].mxu0 %vm3431_vm5, %v3412_v21 }
0x1106   : > { %4329 = vmatprep.mubr.msk.f32.mxu0 %vm4652_vm0, %v4651_v1 }
0x1107   : > { %v3413_v11 = vmul.f32 %v3408_v23, %v3393_v3 }
0x1108   : > { %v4630_v24 = vpop.eup %4629 }
0x1109   : > { %v3409_v30 = vadd.f32 1.0, %v4630_v24  ;;  %4330 = vmatmul.mubr.msk.f32.gmra.mrb[76].mxu0 %vm3431_vm5, %v3413_v11 }
0x110a   : > { %4332 = vmatprep.mubr.msk.f32.mxu0 %vm4652_vm0, %v4651_v1 }
0x110b   : > { %v3414_v32 = vmul.f32 %v3409_v30, %v3394_v26 }
0x110c   : > { %v4632_v31 = vpop.eup %4631 }
0x110d   : > { %v3410_v37 = vadd.f32 1.0, %v4632_v31  ;;  %4333 = vmatmul.mubr.msk.f32.gmra.mrb[78].mxu0 %vm3431_vm5, %v3414_v32 }
0x110e   : > { %4335 = vmatprep.mubr.msk.f32.mxu0 %vm4652_vm0, %v4651_v1 }
0x110f   : > { %v3415_v55 = vmul.f32 %v3410_v37, %v3395_v35 }
0x1111   : > { %4336 = vmatmul.mubr.msk.f32.gmra.mrb[80].mxu0 %vm3431_vm5, %v3415_v55  ;;  %v3809_v55 = vld [vmem:[%s5792_s27] ss:$0 sm:$0xff] }
0x11d4   : > { %v3513_v12 = vpop.f32.mrb[72].mxu0 }
0x11d5   : > { %v3514_v41 = vadd.f32 %v3803_v42, %v3513_v12  ;;  %v4325_v45 = vpop.f32.mrb[73].mxu0 }
0x11d6   : > { %v3810_v45 = vld [vmem:[%s5792_s27 + $0x1] ss:$0 sm:$0xff] }
0x11d7   : > { %v3537_v36 = vadd.f32 %v3514_v41, %v5657_v29 }
0x11d8   : > { %v3518_v46 = vpop.f32.mrb[74].mxu0 }
0x11d9   : > { %v3519_v18 = vadd.f32 %v3803_v42, %v3518_v46  ;;  %v4328_v43 = vpop.f32.mrb[75].mxu0  ;;  %v3542_v39 = vsel %vm1058_vm14, %v3537_v36, 0.0 }
0x11da   : > { %3543 = vadd.xlane.f32.xlu1 %v3542_v39 }
0x11db   : > { %v3538_v1 = vadd.f32 %v3519_v18, %v5663_v33 }
0x11dc   : > { %v3523_v48 = vpop.f32.mrb[76].mxu0 }
0x11dd   : > { %v3524_v49 = vadd.f32 %v3803_v42, %v3523_v48  ;;  %v4331_v50 = vpop.f32.mrb[77].mxu0  ;;  %v3545_v27 = vsel %vm1058_vm14, %v3538_v1, 0.0 }
0x11de   : > { %3546 = vadd.xlane.f32.xlu0 %v3545_v27 }
0x11df   : > { %v3539_v52 = vadd.f32 %v3524_v49, %v5669_v38 }
0x11e0   : > { %v3528_v53 = vpop.f32.mrb[78].mxu0 }
0x11e1   : > { %v3529_v54 = vadd.f32 %v3803_v42, %v3528_v53  ;;  %v4334_v56 = vpop.f32.mrb[79].mxu0  ;;  %v3548_v29 = vsel %vm1058_vm14, %v3539_v52, 0.0 }
0x11e2   : > { %3549 = vadd.xlane.f32.xlu1 %v3548_v29 }
0x11e3   : > { %v3540_v57 = vadd.f32 %v3529_v54, %v5675_v44 }
0x11e4   : > { %v3533_v2 = vpop.f32.mrb[80].mxu0 }
0x11e5   : > { %v3534_v58 = vadd.f32 %v3803_v42, %v3533_v2  ;;  %v4337_v59 = vpop.f32.mrb[81].mxu0  ;;  %v3551_v33 = vsel %vm1058_vm14, %v3540_v57, 0.0 }
0x11e6   : > { %3552 = vadd.xlane.f32.xlu0 %v3551_v33 }
0x11e7   : > { %v3541_v60 = vadd.f32 %v3534_v58, %v5681_v47 }
0x11e9   : > { %v3554_v62 = vsel %vm1071_vm8, %v3541_v60, 0.0 }
0x11ea   : > { %3555 = vadd.xlane.f32.xlu1 %v3554_v62 }
0x1267   : > { %v3544_v38 = vpop.xlane.xlu1 %3543 }
0x1268   : > { %v3557_v40 = vmul.f32 0.03125, %v3544_v38 }
0x126a   : > { %v3562_v6 = vsub.f32 %v3537_v36, %v3557_v40 }
0x126b   : > { %v3547_v63 = vpop.xlane.xlu0 %3546 }
0x126c   : > { %v3558_v10 = vmul.f32 0.03125, %v3547_v63  ;;  %v3567_v4 = vmul.f32 %v3562_v6, %v3562_v6 }
0x126e   : > { %v3563_v14 = vsub.f32 %v3538_v1, %v3558_v10  ;;  %v3572_v44 = vsel %vm1058_vm14, %v3567_v4, 0.0 }
0x126f   : > { %v3550_v19 = vpop.xlane.xlu1 %3549  ;;  %3573 = vadd.xlane.f32.xlu0 %v3572_v44 }
0x1270   : > { %v3559_v28 = vmul.f32 0.03125, %v3550_v19  ;;  %v3568_v17 = vmul.f32 %v3563_v14, %v3563_v14 }
0x1272   : > { %v3564_v34 = vsub.f32 %v3539_v52, %v3559_v28  ;;  %v3575_v61 = vsel %vm1058_vm14, %v3568_v17, 0.0 }
0x1273   : > { %v3553_v47 = vpop.xlane.xlu0 %3552  ;;  %3576 = vadd.xlane.f32.xlu1 %v3575_v61 }
0x1274   : > { %v3560_v5 = vmul.f32 0.03125, %v3553_v47  ;;  %v3569_v7 = vmul.f32 %v3564_v34, %v3564_v34 }
0x1276   : > { %v3565_v8 = vsub.f32 %v3540_v57, %v3560_v5  ;;  %v3578_v9 = vsel %vm1058_vm14, %v3569_v7, 0.0 }
0x1277   : > { %3579 = vadd.xlane.f32.xlu0 %v3578_v9  ;;  %v3556_v15 = vpop.xlane.xlu1 %3555 }
0x1278   : > { %v3561_v16 = vmul.f32 0.03125, %v3556_v15  ;;  %v3570_v0 = vmul.f32 %v3565_v8, %v3565_v8 }
0x127a   : > { %v3566_v51 = vsub.f32 %v3541_v60, %v3561_v16  ;;  %v3581_v13 = vsel %vm1058_vm14, %v3570_v0, 0.0 }
0x127b   : > { %3582 = vadd.xlane.f32.xlu1 %v3581_v13 }
0x127c   : > { %v3571_v20 = vmul.f32 %v3566_v51, %v3566_v51 }
0x127e   : > { %v3584_v25 = vsel %vm1071_vm8, %v3571_v20, 0.0 }
0x127f   : > { %3585 = vadd.xlane.f32.xlu0 %v3584_v25 }
0x12fc   : > { %v3574_v21 = vpop.xlane.xlu0 %3573 }
0x12fd   : > { %v3587_v22 = vmul.f32 0.03125, %v3574_v21 }
0x12ff   : > { %v3592_v3 = vadd.f32 1e-12, %v3587_v22 }
0x1300   : > { %v3577_v23 = vpop.xlane.xlu1 %3576 }
0x1301   : > { %4633 = vrsqrt.f32 %v3592_v3  ;;  %v3588_v11 = vmul.f32 0.03125, %v3577_v23 }
0x1303   : > { %v3593_v24 = vadd.f32 1e-12, %v3588_v11 }
0x1304   : > { %v3580_v26 = vpop.xlane.xlu0 %3579 }
0x1305   : > { %4635 = vrsqrt.f32 %v3593_v24  ;;  %v3589_v30 = vmul.f32 0.03125, %v3580_v26 }
0x1307   : > { %v3594_v32 = vadd.f32 1e-12, %v3589_v30 }
0x1308   : > { %v3583_v31 = vpop.xlane.xlu1 %3582 }
0x1309   : > { %4637 = vrsqrt.f32 %v3594_v32  ;;  %v3590_v35 = vmul.f32 0.03125, %v3583_v31 }
0x130b   : > { %v4634_v37 = vpop.eup %4633  ;;  %v3595_v42 = vadd.f32 1e-12, %v3590_v35 }
0x130c   : > { %v3602_v12 = vmul.f32 %v4634_v37, %v3562_v6  ;;  %v3586_v41 = vpop.xlane.xlu0 %3585 }
0x130d   : > { %4639 = vrsqrt.f32 %v3595_v42  ;;  %v3591_v36 = vmul.f32 0.03125, %v3586_v41 }
0x130e   : > { %v3612_v46 = vmul.f32 %v3809_v55, %v3602_v12 }
0x130f   : > { %v4636_v18 = vpop.eup %4635  ;;  %v3596_v43 = vadd.f32 1e-12, %v3591_v36 }
0x1310   : > { %v3622_v39 = vadd.f32 %v3810_v45, %v3612_v46  ;;  %v3603_v1 = vmul.f32 %v4636_v18, %v3563_v14 }
0x1311   : > { %4641 = vrsqrt.f32 %v3596_v43 }
0x1312   : > { %3627 = vst.msk [vmem:[%s845_s4] sm:$0xff] %vm1058_vm14, %v3622_v39  ;;  %v3613_v48 = vmul.f32 %v3809_v55, %v3603_v1 }
0x1313   : > { %v4638_v49 = vpop.eup %4637 }
0x1314   : > { %v3623_v50 = vadd.f32 %v3810_v45, %v3613_v48  ;;  %v3604_v27 = vmul.f32 %v4638_v49, %v3564_v34 }
0x1316   : > { %3628 = vst.msk [vmem:[%s845_s4 + $0x8] sm:$0xff] %vm1058_vm14, %v3623_v50  ;;  %v3614_v52 = vmul.f32 %v3809_v55, %v3604_v27 }
0x1317   : > { %v4640_v53 = vpop.eup %4639 }
0x1318   : > { %v3624_v54 = vadd.f32 %v3810_v45, %v3614_v52  ;;  %v3605_v56 = vmul.f32 %v4640_v53, %v3565_v8 }
0x131a   : > { %3629 = vst.msk [vmem:[%s845_s4 + $0x10] sm:$0xff] %vm1058_vm14, %v3624_v54  ;;  %v3615_v29 = vmul.f32 %v3809_v55, %v3605_v56 }
0x131b   : > { %v4642_v57 = vpop.eup %4641 }
0x131c   : > { %v3625_v2 = vadd.f32 %v3810_v45, %v3615_v29  ;;  %v3606_v58 = vmul.f32 %v4642_v57, %v3566_v51 }
0x131e   : > { %3630 = vst.msk [vmem:[%s845_s4 + $0x18] sm:$0xff] %vm1058_vm14, %v3625_v2  ;;  %v3616_v59 = vmul.f32 %v3809_v55, %v3606_v58 }
0x1320   : > { %v3626_v33 = vadd.f32 %v3810_v45, %v3616_v59 }
0x1322   : > { %3631 = vst.msk [vmem:[%s845_s4 + $0x20] sm:$0xf] %vm1071_vm8, %v3626_v33 }
0x1323 PF: > { %s38_s8 = sadd.s32 1, %s4649_s8  }
0x1324   : > { %p35_p4 = scmp.ge.s32.totalorder %s38_s8, 4  }
0x1326   :  { %37 = sbr.rel (!%p35_p4) target bundleno = 14 (0xe), region = 162 }

</bundles_post_ra>
